<compile_context>
chip_gen: v7x
topology: tpu7x:2x2x1
jax: 0.10.0
libtpu: 0.0.40
codegen_flags: <defaults>
</compile_context>

<pallas_src>
import functools

import jax
import jax.numpy as jnp
from jax.experimental import pallas as pl
from jax.experimental.pallas import tpu as pltpu


def net_head_kernel(scal_ref, fmap_ref, w1b1_ref, w2b2_ref, out_ref, acc_ref, *, hw):
    step = pl.program_id(0)

    # ---- init the f32 pooling accumulator on the first HW tile ----
    @pl.when(step == 0)
    def _init():
        acc_ref[...] = jnp.zeros_like(acc_ref)

    # ---- partial AdaptiveAvgPool2d: sum this [B, C, tile_hw] f32 tile over HW ----
    acc_ref[...] += jnp.sum(fmap_ref[...], axis=-1)                 # [B, C]

    # ---- epilogue on the last HW tile: lin1, split lin2, softmax(dim=0) ----
    @pl.when(step == pl.num_programs(0) - 1)
    def _finalize():
        b_dim = acc_ref.shape[0]
        c_dim = acc_ref.shape[1]

        pooled = acc_ref[...] * (1.0 / hw)                          # [B, C] f32

        # lin1 on scalar_values: [B,3] @ [3,512] + b1, as scalar-broadcast VPU FMAs
        # (scalars come from SMEM, weight rows are lane-dense f32 vectors).
        w1b1 = w1b1_ref[...]                                        # [4, C] f32
        rows = []
        for b in range(b_dim):                                      # B is static
            rows.append(scal_ref[b, 0] * w1b1[0:1, :]
                        + scal_ref[b, 1] * w1b1[1:2, :]
                        + scal_ref[b, 2] * w1b1[2:3, :]
                        + w1b1[3:4, :])
        s = jnp.concatenate(rows, axis=0)                           # [B, C] f32

        # relu(cat(pooled, s)) with the concat eliminated: lin2's weight is split
        # into its top (pooled) and bottom (scalar-features) 512-row halves.
        p_act = jnp.maximum(pooled, 0.0).astype(jnp.bfloat16)
        s_act = jnp.maximum(s, 0.0).astype(jnp.bfloat16)

        w2_top = w2b2_ref[0:c_dim, :]                               # [512, OUT_PAD] bf16
        w2_bot = w2b2_ref[c_dim:2 * c_dim, :]                       # [512, OUT_PAD] bf16
        b2 = w2b2_ref[2 * c_dim:2 * c_dim + 1, :].astype(jnp.float32)  # [1, OUT_PAD]

        final = (jnp.dot(p_act, w2_top, preferred_element_type=jnp.float32)
                 + jnp.dot(s_act, w2_bot, preferred_element_type=jnp.float32)
                 + b2)                                              # [B, OUT_PAD] f32
        final = jnp.maximum(final, 0.0)

        # softmax over dim=0 (the batch axis, as in nn.Softmax(dim=0)); exact recip.
        m = jnp.max(final, axis=0, keepdims=True)
        e = jnp.exp(final - m)
        denom = jnp.sum(e, axis=0, keepdims=True)
        out_ref[...] = e * pl.reciprocal(denom)


def _choose_tile_hw(hw, max_tile=512):
    """Largest power-of-two multiple of 128 that divides hw, capped at max_tile.

    max_tile=512 keeps the double-buffered fmap tile (B * C * tile * 4 B * 2) at
    ~4 MiB for B=2/C=512 — comfortably inside v7x's 32 MiB scoped VMEM default and
    v5e's 16 MiB default, while amortizing the ~0.35 us per-grid-step overhead.
    """
    if hw % 128 != 0:
        return hw          # single full-extent block (exception to the (8,128) rule)
    tile = 128
    while tile * 2 <= max_tile and hw % (tile * 2) == 0:
        tile *= 2
    return tile


def net_head(fused_fmap, local_goal_point, angle, w1, b1, w2, b2):
    """fused_fmap: [B, C, H, W] f32 NCHW (C must be 512 so pooled(512)+lin1(512)=1024)."""
    B, C, H, W = fused_fmap.shape
    assert C == 512, "lin2 weight split assumes the pooled feature width is exactly 512"
    HW = H * W
    out_dim = w2.shape[1]
    out_pad = ((out_dim + 127) // 128) * 128     # lane-dense (128-multiple) output

    # Free reshape (no HBM pass, no dtype change): kernel reads the f32 map directly.
    fmap = fused_fmap.reshape(B, C, HW)

    # scalar_values = cat(local_goal_point.view(-1,2), angle.view(-1,1)) -> [B, 3]
    scal = jnp.concatenate(
        [local_goal_point.reshape(-1, 2).astype(jnp.float32),
         angle.reshape(-1, 1).astype(jnp.float32)], axis=1)

    # Pack lin1 weight+bias (tiny, stays f32 for the VPU FMAs).
    w1b1 = jnp.concatenate(
        [w1.astype(jnp.float32), b1.reshape(1, -1).astype(jnp.float32)], axis=0)  # [4, 512]

    # Pack lin2 weight+bias: pad out_dim -> 128 lanes, bf16 (single-pass MXU operand,
    # half the DMA bytes). Row 1024 holds the bias; rows 1025..1031 are zero padding.
    # (In deployment this packing/cast would be done once at weight-load time.)
    w2p = jnp.zeros((2 * C + 8, out_pad), jnp.float32)
    w2p = w2p.at[0:2 * C, 0:out_dim].set(w2.astype(jnp.float32))
    w2p = w2p.at[2 * C, 0:out_dim].set(b2.reshape(-1).astype(jnp.float32))
    w2b2 = w2p.astype(jnp.bfloat16)                                 # [1032, out_pad]

    tile_hw = _choose_tile_hw(HW)
    grid = (HW // tile_hw,)

    cost = pl.CostEstimate(
        flops=B * C * HW                      # pooling sum
        + 7 * B * C                           # lin1 FMAs (+bias) per lane
        + 4 * B * C * out_pad,                # two K=512 MXU dots
        transcendentals=B * out_pad,          # softmax exp
        bytes_accessed=(fmap.size * 4 + scal.size * 4
                        + w1b1.size * 4 + w2b2.size * 2
                        + B * out_pad * 4),
    )

    kernel = functools.partial(net_head_kernel, hw=HW)

    out = pl.pallas_call(
        kernel,
        out_shape=jax.ShapeDtypeStruct((B, out_pad), jnp.float32),
        grid_spec=pltpu.PrefetchScalarGridSpec(
            num_scalar_prefetch=0,
            grid=grid,
            in_specs=[
                # [B,3] scalars live in SMEM (scalar-broadcast FMAs in the kernel).
                pl.BlockSpec(memory_space=pltpu.MemorySpace.SMEM),
                # Pipelined f32 NCHW feature-map tiles over the HW axis.
                pl.BlockSpec((B, C, tile_hw), lambda i: (0, 0, i)),
                # Small parameters: constant block index -> fetched once, kept resident.
                pl.BlockSpec((4, C), lambda i: (0, 0)),
                pl.BlockSpec((2 * C + 8, out_pad), lambda i: (0, 0)),
            ],
            out_specs=pl.BlockSpec((B, out_pad), lambda i: (0, 0)),
            scratch_shapes=[pltpu.VMEM((B, C), jnp.float32)],        # pooling accumulator
        ),
        compiler_params=pltpu.CompilerParams(
            dimension_semantics=("arbitrary",),                      # HW is a reduction axis
            vmem_limit_bytes=32 * 1024 * 1024,                       # safe on v5e/v6e/v7x
        ),
        cost_estimate=cost,
    )(scal, fmap, w1b1, w2b2)

    return out[:, :out_dim]


def net_head_ref(fused_fmap, local_goal_point, angle, w1, b1, w2, b2):
    """Pure-JAX f32 reference, faithful to the PyTorch head."""
    B, C, H, W = fused_fmap.shape
    pooled = jnp.mean(fused_fmap.reshape(B, C, H * W), axis=-1)
    scal = jnp.concatenate(
        [local_goal_point.reshape(-1, 2).astype(jnp.float32),
         angle.reshape(-1, 1).astype(jnp.float32)], axis=1)
    s = scal @ w1 + b1.reshape(1, -1)
    cat = jnp.maximum(jnp.concatenate([pooled, s], axis=1), 0.0)
    final = jnp.maximum(cat @ w2 + b2.reshape(1, -1), 0.0)
    return jax.nn.softmax(final, axis=0)


if __name__ == "__main__":
    # Small shapes consistent with the module's head:
    #   fused feature map: [B, 512, H, W] (512 channels so pooled(512)+lin1(512)=1024)
    #   local_goal_point:  [B, 2],  angle: [B, 1],  out_dim = 32
    # H = W = 32 -> HW = 1024 -> tile_hw = 512 -> a 2-step pipelined reduction grid.
    B, C, H, W = 2, 512, 32, 32
    OUT_DIM = 32

    key = jax.random.PRNGKey(0)
    k_fmap, k_goal, k_ang, k_w1, k_b1, k_w2, k_b2 = jax.random.split(key, 7)

    fused_fmap = jax.random.normal(k_fmap, (B, C, H, W), dtype=jnp.float32)
    local_goal_point = jax.random.normal(k_goal, (B, 2), dtype=jnp.float32)
    angle = jax.random.normal(k_ang, (B, 1), dtype=jnp.float32)

    # Deterministic parameter init (PyTorch-style uniform(+-1/sqrt(fan_in))).
    lim1 = 1.0 / jnp.sqrt(3.0)
    w1 = jax.random.uniform(k_w1, (3, 512), jnp.float32, -lim1, lim1)         # lin1 weight^T
    b1 = jax.random.uniform(k_b1, (1, 512), jnp.float32, -lim1, lim1)         # lin1 bias
    lim2 = 1.0 / jnp.sqrt(1024.0)
    w2 = jax.random.uniform(k_w2, (1024, OUT_DIM), jnp.float32, -lim2, lim2)  # lin2 weight^T
    b2 = jax.random.uniform(k_b2, (1, OUT_DIM), jnp.float32, -lim2, lim2)     # lin2 bias

    out = net_head(fused_fmap, local_goal_point, angle, w1, b1, w2, b2)
    out = jax.block_until_ready(out)

    assert out.shape == (B, OUT_DIM)
    # softmax over dim=0 -> each column sums to 1 (exact reciprocal -> tight tol)
    assert bool(jnp.allclose(jnp.sum(out, axis=0), 1.0, atol=1e-3))

    ref = net_head_ref(fused_fmap, local_goal_point, angle, w1, b1, w2, b2)
    # Kernel uses bf16 lin2 operands (f32 MXU accumulation); reference is pure f32.
    assert bool(jnp.allclose(out, ref, rtol=2e-2, atol=1e-2))

    print("KERNEL_OK")
</pallas_src>

<mosaic_0001>
module attributes {stable_mosaic.version = 11 : i64} {
  func.func @net_head_kernel(%arg0: i32, %arg1: memref<2x3xf32, #tpu.memory_space<smem>>, %arg2: memref<2x512x512xf32, #tpu.memory_space<vmem>>, %arg3: memref<4x512xf32, #tpu.memory_space<vmem>>, %arg4: memref<1032x128xbf16, #tpu.memory_space<vmem>>, %arg5: memref<2x128xf32, #tpu.memory_space<vmem>>, %arg6: memref<2x512xf32, #tpu.memory_space<vmem>>) attributes {dimension_semantics = [#tpu.dimension_semantics<arbitrary>], iteration_bounds = array<i64: 2>, scalar_prefetch = 0 : i64, scratch_operands = 1 : i64, tpu.core_type = #tpu.core_type<tc>, window_params = [{transform_indices = @transform_0, window_bounds = array<i64: 2, 3>}, {transform_indices = @transform_1, window_bounds = array<i64: 2, 512, 512>}, {pipeline_mode = #tpu.pipeline_mode<synchronous>, transform_indices = @transform_2, window_bounds = array<i64: 4, 512>}, {pipeline_mode = #tpu.pipeline_mode<synchronous>, transform_indices = @transform_3, window_bounds = array<i64: 1032, 128>}, {pipeline_mode = #tpu.pipeline_mode<synchronous>, transform_indices = @transform_4, window_bounds = array<i64: 2, 128>}]} {
    %c0_i32 = arith.constant 0 : i32
    %0 = arith.cmpi eq, %arg0, %c0_i32 : i32
    %1 = arith.extui %0 : i1 to i32
    %c0_i32_0 = arith.constant 0 : i32
    %2 = arith.cmpi ne, %1, %c0_i32_0 : i32
    scf.if %2 {
      %cst_8 = arith.constant 0.000000e+00 : f32
      %11 = vector.broadcast %cst_8 : f32 to vector<2x512xf32>
      %c0_9 = arith.constant 0 : index
      %c0_10 = arith.constant 0 : index
      %12 = vector.load %arg6[%c0_9, %c0_10] : memref<2x512xf32, #tpu.memory_space<vmem>>, vector<2x512xf32>
      tpu.vector_store %arg6[%c0_9, %c0_10], %11 {strides = array<i32>} : memref<2x512xf32, #tpu.memory_space<vmem>>, vector<2x512xf32>,
    } else {
    }
    %c0 = arith.constant 0 : index
    %c0_1 = arith.constant 0 : index
    %3 = vector.load %arg6[%c0, %c0_1] : memref<2x512xf32, #tpu.memory_space<vmem>>, vector<2x512xf32>
    %c0_2 = arith.constant 0 : index
    %c0_3 = arith.constant 0 : index
    %c0_4 = arith.constant 0 : index
    %4 = vector.load %arg2[%c0_2, %c0_3, %c0_4] : memref<2x512x512xf32, #tpu.memory_space<vmem>>, vector<2x512x512xf32>
    %cst = arith.constant dense<0.000000e+00> : vector<2x512xf32>
    %5 = vector.multi_reduction <add>, %4, %cst [2] : vector<2x512x512xf32> to vector<2x512xf32>
    %6 = arith.addf %3, %5 : vector<2x512xf32>
    %c0_5 = arith.constant 0 : index
    %c0_6 = arith.constant 0 : index
    %7 = vector.load %arg6[%c0_5, %c0_6] : memref<2x512xf32, #tpu.memory_space<vmem>>, vector<2x512xf32>
    tpu.vector_store %arg6[%c0_5, %c0_6], %6 {strides = array<i32>} : memref<2x512xf32, #tpu.memory_space<vmem>>, vector<2x512xf32>,
    %c1_i32 = arith.constant 1 : i32
    %8 = arith.cmpi eq, %arg0, %c1_i32 : i32
    %9 = arith.extui %8 : i1 to i32
    %c0_i32_7 = arith.constant 0 : i32
    %10 = arith.cmpi ne, %9, %c0_i32_7 : i32
    scf.if %10 {
      %c0_8 = arith.constant 0 : index
      %c0_9 = arith.constant 0 : index
      %11 = vector.load %arg6[%c0_8, %c0_9] : memref<2x512xf32, #tpu.memory_space<vmem>>, vector<2x512xf32>
      %cst_10 = arith.constant 9.765625E-4 : f32
      %12 = vector.broadcast %cst_10 : f32 to vector<2x512xf32>
      %13 = arith.mulf %11, %12 : vector<2x512xf32>
      %c0_11 = arith.constant 0 : index
      %c0_12 = arith.constant 0 : index
      %14 = vector.load %arg3[%c0_11, %c0_12] : memref<4x512xf32, #tpu.memory_space<vmem>>, vector<4x512xf32>
      %c0_13 = arith.constant 0 : index
      %c0_14 = arith.constant 0 : index
      %15 = memref.load %arg1[%c0_13, %c0_14] : memref<2x3xf32, #tpu.memory_space<smem>>
      %16 = vector.extract_strided_slice %14 {offsets = [0, 0], sizes = [1, 512], strides = [1, 1]} : vector<4x512xf32> to vector<1x512xf32>
      %17 = vector.broadcast %15 : f32 to vector<1x512xf32>
      %18 = arith.mulf %17, %16 : vector<1x512xf32>
      %c0_15 = arith.constant 0 : index
      %c1 = arith.constant 1 : index
      %19 = memref.load %arg1[%c0_15, %c1] : memref<2x3xf32, #tpu.memory_space<smem>>
      %20 = vector.extract_strided_slice %14 {offsets = [1, 0], sizes = [1, 512], strides = [1, 1]} : vector<4x512xf32> to vector<1x512xf32>
      %21 = vector.broadcast %19 : f32 to vector<1x512xf32>
      %22 = arith.mulf %21, %20 : vector<1x512xf32>
      %23 = arith.addf %18, %22 : vector<1x512xf32>
      %c0_16 = arith.constant 0 : index
      %c2 = arith.constant 2 : index
      %24 = memref.load %arg1[%c0_16, %c2] : memref<2x3xf32, #tpu.memory_space<smem>>
      %25 = vector.extract_strided_slice %14 {offsets = [2, 0], sizes = [1, 512], strides = [1, 1]} : vector<4x512xf32> to vector<1x512xf32>
      %26 = vector.broadcast %24 : f32 to vector<1x512xf32>
      %27 = arith.mulf %26, %25 : vector<1x512xf32>
      %28 = arith.addf %23, %27 : vector<1x512xf32>
      %29 = vector.extract_strided_slice %14 {offsets = [3, 0], sizes = [1, 512], strides = [1, 1]} : vector<4x512xf32> to vector<1x512xf32>
      %30 = arith.addf %28, %29 : vector<1x512xf32>
      %c1_17 = arith.constant 1 : index
      %c0_18 = arith.constant 0 : index
      %31 = memref.load %arg1[%c1_17, %c0_18] : memref<2x3xf32, #tpu.memory_space<smem>>
      %32 = vector.extract_strided_slice %14 {offsets = [0, 0], sizes = [1, 512], strides = [1, 1]} : vector<4x512xf32> to vector<1x512xf32>
      %33 = vector.broadcast %31 : f32 to vector<1x512xf32>
      %34 = arith.mulf %33, %32 : vector<1x512xf32>
      %c1_19 = arith.constant 1 : index
      %c1_20 = arith.constant 1 : index
      %35 = memref.load %arg1[%c1_19, %c1_20] : memref<2x3xf32, #tpu.memory_space<smem>>
      %36 = vector.extract_strided_slice %14 {offsets = [1, 0], sizes = [1, 512], strides = [1, 1]} : vector<4x512xf32> to vector<1x512xf32>
      %37 = vector.broadcast %35 : f32 to vector<1x512xf32>
      %38 = arith.mulf %37, %36 : vector<1x512xf32>
      %39 = arith.addf %34, %38 : vector<1x512xf32>
      %c1_21 = arith.constant 1 : index
      %c2_22 = arith.constant 2 : index
      %40 = memref.load %arg1[%c1_21, %c2_22] : memref<2x3xf32, #tpu.memory_space<smem>>
      %41 = vector.extract_strided_slice %14 {offsets = [2, 0], sizes = [1, 512], strides = [1, 1]} : vector<4x512xf32> to vector<1x512xf32>
      %42 = vector.broadcast %40 : f32 to vector<1x512xf32>
      %43 = arith.mulf %42, %41 : vector<1x512xf32>
      %44 = arith.addf %39, %43 : vector<1x512xf32>
      %45 = vector.extract_strided_slice %14 {offsets = [3, 0], sizes = [1, 512], strides = [1, 1]} : vector<4x512xf32> to vector<1x512xf32>
      %46 = arith.addf %44, %45 : vector<1x512xf32>
      %47 = tpu.concatenate %30, %46 in 0 : vector<1x512xf32>, vector<1x512xf32> -> vector<2x512xf32>
      %cst_23 = arith.constant 0.000000e+00 : f32
      %48 = vector.broadcast %cst_23 : f32 to vector<2x512xf32>
      %49 = arith.maximumf %13, %48 : vector<2x512xf32>
      %50 = arith.truncf %49 : vector<2x512xf32> to vector<2x512xbf16>
      %cst_24 = arith.constant 0.000000e+00 : f32
      %51 = vector.broadcast %cst_24 : f32 to vector<2x512xf32>
      %52 = arith.maximumf %47, %51 : vector<2x512xf32>
      %53 = arith.truncf %52 : vector<2x512xf32> to vector<2x512xbf16>
      %c0_25 = arith.constant 0 : index
      %c0_26 = arith.constant 0 : index
      %54 = vector.load %arg4[%c0_25, %c0_26] : memref<1032x128xbf16, #tpu.memory_space<vmem>>, vector<512x128xbf16>
      %c512 = arith.constant 512 : index
      %c0_27 = arith.constant 0 : index
      %55 = vector.load %arg4[%c512, %c0_27] : memref<1032x128xbf16, #tpu.memory_space<vmem>>, vector<512x128xbf16>
      %c1024 = arith.constant 1024 : index
      %c0_28 = arith.constant 0 : index
      %56 = vector.load %arg4[%c1024, %c0_28] : memref<1032x128xbf16, #tpu.memory_space<vmem>>, vector<1x128xbf16>
      %57 = arith.extf %56 : vector<1x128xbf16> to vector<1x128xf32>
      %cst_29 = arith.constant dense<0.000000e+00> : vector<2x128xf32>
      %58 = tpu.matmul %50, %54, %cst_29 {dimension_numbers = #tpu.dot_dimension_numbers<[1], [0], [0], [1], [0, 0, 1, 1], [], []>} : vector<2x512xbf16>, vector<512x128xbf16>, vector<2x128xf32> -> vector<2x128xf32>
      %cst_30 = arith.constant dense<0.000000e+00> : vector<2x128xf32>
      %59 = tpu.matmul %53, %55, %cst_30 {dimension_numbers = #tpu.dot_dimension_numbers<[1], [0], [0], [1], [0, 0, 1, 1], [], []>} : vector<2x512xbf16>, vector<512x128xbf16>, vector<2x128xf32> -> vector<2x128xf32>
      %60 = arith.addf %58, %59 : vector<2x128xf32>
      %61 = vector.broadcast %57 : vector<1x128xf32> to vector<2x128xf32>
      %62 = arith.addf %60, %61 : vector<2x128xf32>
      %cst_31 = arith.constant 0.000000e+00 : f32
      %63 = vector.broadcast %cst_31 : f32 to vector<2x128xf32>
      %64 = arith.maximumf %62, %63 : vector<2x128xf32>
      %cst_32 = arith.constant dense<0xFF800000> : vector<128xf32>
      %65 = vector.multi_reduction <maximumf>, %64, %cst_32 [0] : vector<2x128xf32> to vector<128xf32>
      %66 = vector.shape_cast %65 : vector<128xf32> to vector<1x128xf32>
      %67 = vector.broadcast %66 : vector<1x128xf32> to vector<2x128xf32>
      %68 = arith.subf %64, %67 : vector<2x128xf32>
      %69 = math.exp %68 : vector<2x128xf32>
      %cst_33 = arith.constant dense<0.000000e+00> : vector<128xf32>
      %70 = vector.multi_reduction <add>, %69, %cst_33 [0] : vector<2x128xf32> to vector<128xf32>
      %71 = vector.shape_cast %70 : vector<128xf32> to vector<1x128xf32>
      %72 = tpu.reciprocal %71 : vector<1x128xf32> -> vector<1x128xf32>
      %73 = vector.broadcast %72 : vector<1x128xf32> to vector<2x128xf32>
      %74 = arith.mulf %69, %73 : vector<2x128xf32>
      %c0_34 = arith.constant 0 : index
      %c0_35 = arith.constant 0 : index
      %75 = vector.load %arg5[%c0_34, %c0_35] : memref<2x128xf32, #tpu.memory_space<vmem>>, vector<2x128xf32>
      tpu.vector_store %arg5[%c0_34, %c0_35], %74 {strides = array<i32>} : memref<2x128xf32, #tpu.memory_space<vmem>>, vector<2x128xf32>,
    } else {
    }
    return
  }
  func.func @transform_0(%arg0: i32) -> (i32, i32) {
    %c0_i32 = arith.constant 0 : i32
    %c0_i32_0 = arith.constant 0 : i32
    %c0_i32_1 = arith.constant 0 : i32
    return %c0_i32, %c0_i32_0 : i32, i32
  }
  func.func @transform_1(%arg0: i32) -> (i32, i32, i32) {
    %c0_i32 = arith.constant 0 : i32
    %c0_i32_0 = arith.constant 0 : i32
    %c0_i32_1 = arith.constant 0 : i32
    return %c0_i32, %c0_i32_0, %arg0 : i32, i32, i32
  }
  func.func @transform_2(%arg0: i32) -> (i32, i32) {
    %c0_i32 = arith.constant 0 : i32
    %c0_i32_0 = arith.constant 0 : i32
    %c0_i32_1 = arith.constant 0 : i32
    return %c0_i32, %c0_i32_0 : i32, i32
  }
  func.func @transform_3(%arg0: i32) -> (i32, i32) {
    %c0_i32 = arith.constant 0 : i32
    %c0_i32_0 = arith.constant 0 : i32
    %c0_i32_1 = arith.constant 0 : i32
    return %c0_i32, %c0_i32_0 : i32, i32
  }
  func.func @transform_4(%arg0: i32) -> (i32, i32) {
    %c0_i32 = arith.constant 0 : i32
    %c0_i32_0 = arith.constant 0 : i32
    %c0_i32_1 = arith.constant 0 : i32
    return %c0_i32, %c0_i32_0 : i32, i32
  }
}

</mosaic_0001>

<bundles_post_ra>
// kernel: tpu_custom_call.1
= control target key start
LH: loop header
LB: loop body
LE: loop exit
PB: predicated region body
PF: predicated region fallthrough
CT: control target
= control target key end

     0   :  { %9 = vsyncpa [#allocation6], 0  ;;  %s13512_s0 = inlined_call_operand.hbm [shape: f32[2,3], index: 0, kind: input, shape index: {}]   ;;  %s13513_s1 = inlined_call_operand.hbm [shape: f32[2,512,1024], index: 1, kind: input, shape index: {}]   ;;  %s13514_s2 = inlined_call_operand.hbm [shape: f32[4,512], index: 2, kind: input, shape index: {}]   ;;  %s13515_s3 = inlined_call_operand.hbm [shape: bf16[1032,128], index: 3, kind: input, shape index: {}]   ;;  %s13516_s4 = inlined_call_operand.hbm [shape: f32[2,128], index: 4, kind: output, shape index: {}]  }
   0x1   :  { %10 = vsyncpa [#allocation4], 0 }
   0x2   :  { %12 = vsyncpa [#allocation4 + $0x1], 0 }
   0x3   :  { %13 = vsyncpa [#allocation9], 0 }
   0x4   :  { %14 = vsyncpa [#allocation5], 0  ;;  %s9881_s15 = smov 0   ;;  %s9883_s16 = smov 0  }
   0x5   :  { %s9885_s17 = smov 0   ;;  %s9887_s18 = smov 0  }
   0x6 LB: > { %s9900_s19 = sadd.s32 4294967295, %s9837_s18   ;;  %s9903_s20 = sadd.s32 1, %s9837_s18   ;;  %s9837_s18 = sphi %s9887_s18, %s14113_s18   ;;  %s9833_s17 = sphi %s9885_s17, %s14112_s17   ;;  %s9829_s16 = sphi %s9883_s16, %s14111_s16   ;;  %s9825_s15 = sphi %s9881_s15, %s14110_s15  }
   0x7   : > { %s45_s21 = ssub.s32 %s9837_s18, %s9903_s20  ;;  %s48_s22 = sadd.s32 1, %s9833_s17 }
   0x8   : > { %p46_p0 = scmp.eq.s32.totalorder %s45_s21, 0  ;;  %p55_p1 = scmp.ne.s32.totalorder %s9833_s17, %s9829_s16 }
   0x9   : > { %p56_p2 = scmp.eq.s32.totalorder %s9837_s18, 0  ;;  %p61_p3 = scmp.ne.s32.totalorder %s9829_s16, %s9825_s15 }
   0xa   : > { %s9913_s23 = scalar_select %p46_p0, %s9833_s17, %s48_s22  }
   0xb   : > { %p9915_p4 = por %p56_p2, %p55_p1  ;;  %p13517_p5 = scmp.eq.s32.totalorder %s9900_s19, 0 }
   0xc   : > { %p9322_p6 = scmp.ge.s32.totalorder %s9837_s18, 1  ;;  %p135_p7 = scmp.lt.s32.totalorder %s9837_s18, 3 }
   0xd   : > { %p9924_p8 = por %p13517_p5, %p61_p3  ;;  %s9839_s27 = smov [#allocation8]  }
   0xe   : > { %p9929_p10 = pnand %p9322_p6, %p135_p7  ;;  %s157_s28 = sshll.u32 %s9839_s27, 4  ;;  %s158_s28 = int_to_ptr.vmem [resolvable:$true] %s157_s28 }
   0xf   : > { %s13593_s25 = scalar_select %p9924_p8, 1, 0 }
  0x10   : > { %s13594_s26 = scalar_select %p9929_p10, 1, 0 }
  0x11   : > { %p9525_p11 = pneg %p9929_p10  ;;  %p9542_p12 = scmp.lt.s32.totalorder %s9837_s18, 2 }
  0x12   : > { %s9840_s5 = smov [#allocation10]   ;;  %s9666_s9 = scalar_lea.hbm %s13514_s2, 256 }
  0x13   : > { %p9938_p13 = pnand %p9525_p11, %p13517_p5  ;;  %p9944_p0 = pnand %p9542_p12, %p9915_p4 }
  0x14   : > { %s167_s6 = sshll.u32 %s9840_s5, 4  ;;  %p9667_p1 = scmp.ne.s32.totalorder %s13514_s2, %s9666_s9  ;;  %s9948_s6 = int_to_ptr.vmem [resolvable:$true] %s167_s6 }
  0x15   : > { %s13596_s30 = scalar_select %p9944_p0, 1, 0 }
  0x16   : > { %p9958_p2 = pneg %p9938_p13  ;;  %p9673_p6 = scmp.lt.u32.totalorder %s9666_s9, %s13514_s2 }
  0x18   : > { %p9669_p3 = pnand %p9958_p2, %p9667_p1 }
  0x1a   : > { %p9670_p4 = pneg %p9669_p3 }
  0x1c   : > { %p9675_p7 = pnand %p9673_p6, %p9670_p4 }
  0x1e   : > { %9678 = shalt.err (!%p9675_p7)
}
  0x1f   : > { %s9679_s15 = scalar_lea.vmem %s158_s28, 256  ;;  %p9687_p5 = scmp.lt.s32.totalorder %s158_s28, %s158_s28 }
  0x20   : > { %p9680_p11 = scmp.ne.s32.totalorder %s158_s28, %s9679_s15  ;;  %p9688_p8 = scmp.lt.s32.totalorder %s9679_s15, %s9679_s15 }
  0x22   : > { %p9682_p12 = pnand %p9680_p11, %p9958_p2  ;;  %p9689_p10 = por %p9688_p8, %p9687_p5 }
  0x24   : > { %p9683_p9 = pneg %p9682_p12 }
  0x26   : > { %p9690_p0 = pnand %p9689_p10, %p9683_p9 }
  0x28   : > { %9693 = shalt.err (!%p9690_p0)
}
  0x29   : > { %9531 = dma.hbm_to_vmem [thread:$0]  (!%p9938_p13), %s13514_s2, 256, %s158_s28, [#allocation9]  }
  0x2a   : > { %s9694_s5 = scalar_lea.hbm %s13512_s0, 32 }
  0x2b   : > { %p9695_p1 = scmp.ne.s32.totalorder %s13512_s0, %s9694_s5  ;;  %p9701_p8 = scmp.lt.u32.totalorder %s9694_s5, %s13512_s0 }
  0x2d   : > { %p9697_p3 = pnand %p9695_p1, %p9958_p2 }
  0x2f   : > { %p9698_p5 = pneg %p9697_p3 }
  0x31   : > { %p9703_p9 = pnand %p9701_p8, %p9698_p5 }
  0x33   : > { %9706 = shalt.err (!%p9703_p9)
}
  0x34   : > { %s9841_s11 = smov [#allocation3]   ;;  %s181_s14 = sand.u32 1, %s9833_s17  }
  0x35   : > { %9528 = dma.hbm_to_smem (!%p9938_p13), %s13512_s0, 32, %s9841_s11, [#allocation6]  }
  0x36   : > { %s9707_s22 = scalar_lea.hbm %s13515_s3, 8256 }
  0x37   : > { %p9708_p10 = scmp.ne.s32.totalorder %s13515_s3, %s9707_s22  ;;  %p9714_p6 = scmp.lt.u32.totalorder %s9707_s22, %s13515_s3 }
  0x39   : > { %p9710_p0 = pnand %p9708_p10, %p9958_p2 }
  0x3b   : > { %p9711_p4 = pneg %p9710_p0 }
  0x3d   : > { %p9716_p7 = pnand %p9714_p6, %p9711_p4 }
  0x3f   : > { %9719 = shalt.err (!%p9716_p7)
}
  0x40   : > { %s9720_s8 = scalar_lea.vmem %s9948_s6, 8256  ;;  %p9728_p3 = scmp.lt.s32.totalorder %s9948_s6, %s9948_s6 }
  0x41   : > { %p9721_p11 = scmp.ne.s32.totalorder %s9948_s6, %s9720_s8  ;;  %p9729_p5 = scmp.lt.s32.totalorder %s9720_s8, %s9720_s8 }
  0x43   : > { %p9723_p12 = pnand %p9721_p11, %p9958_p2  ;;  %p9730_p8 = por %p9729_p5, %p9728_p3 }
  0x45   : > { %p9724_p1 = pneg %p9723_p12 }
  0x47   : > { %p9731_p9 = pnand %p9730_p8, %p9724_p1 }
  0x49   : > { %9734 = shalt.err (!%p9731_p9)
}
  0x4a   : > { %s9842_s9 = smov 64   ;;  %s9843_s10 = smov 4  }
  0x4b   : > { %9534 = dma.hbm_to_vmem [thread:$0]  (!%p9938_p13), %s13515_s3, 8256, %s9948_s6, [#allocation9], %s9842_s9, %s9842_s9, %s9843_s10  }
  0x4c   : > { %s9327_s12 = sshll.u32 %s181_s14, 12  ;;  %s9418_s13 = sshll.u32 %s9837_s18, 9 }
  0x4d   : > { %s10018_s22 = scalar_lea.hbm %s13513_s1, %s9418_s13  ;;  %s185_s24 = scalar_lea.vmem [#allocation7], %s9327_s12 }
  0x4e   : > { %s192_s27 = sshll.u32 %s185_s24, 4  ;;  %s10022_s29 = scalar_lea.sflag [#allocation4], %s181_s14  ;;  %s10020_s27 = int_to_ptr.vmem [resolvable:$true] %s192_s27 }
  0x4f   : > { %s9735_s5 = scalar_lea.hbm %s10018_s22, 65536  ;;  %p13598_p13 = scmp.ne.s32.totalorder %s13596_s30, 0 }
  0x50   : > { %p9736_p2 = scmp.ne.s32.totalorder %s10018_s22, %s9735_s5  ;;  %s9740_s7 = scalar_lea.hbm %s13513_s1, 131072 }
  0x51   : > { %p9737_p10 = pneg %p13598_p13  ;;  %p9741_p6 = scmp.lt.u32.totalorder %s10018_s22, %s13513_s1 }
  0x52   : > { %p9742_p7 = scmp.lt.u32.totalorder %s9740_s7, %s9735_s5  ;;  %p9744_p12 = scmp.lt.u32.totalorder %s9735_s5, %s10018_s22 }
  0x53   : > { %p9738_p0 = pnand %p9737_p10, %p9736_p2 }
  0x54   : > { %p9743_p11 = por %p9742_p7, %p9741_p6 }
  0x55   : > { %p9739_p4 = pneg %p9738_p0 }
  0x56   : > { %p9745_p1 = por %p9744_p12, %p9743_p11 }
  0x58   : > { %p9746_p3 = pnand %p9745_p1, %p9739_p4 }
  0x5a   : > { %9749 = shalt.err (!%p9746_p3)
}
  0x5b   : > { %s9750_s14 = scalar_lea.vmem %s10020_s27, 65536  ;;  %s9844_s10 = smov [#allocation7]  }
  0x5c   : > { %p9751_p5 = scmp.ne.s32.totalorder %s10020_s27, %s9750_s14  ;;  %s9755_s11 = sshll.u32 %s9844_s10, 4  ;;  %s9756_s11 = int_to_ptr.vmem [resolvable:$false] %s9755_s11 }
  0x5d   : > { %s9757_s28 = scalar_lea.vmem %s9756_s11, 131072  ;;  %p9758_p2 = scmp.lt.s32.totalorder %s10020_s27, %s9756_s11 }
  0x5e   : > { %p9753_p8 = pnand %p9751_p5, %p9737_p10  ;;  %p9759_p0 = scmp.lt.s32.totalorder %s9757_s28, %s9750_s14 }
  0x60   : > { %p9754_p9 = pneg %p9753_p8  ;;  %p9760_p6 = por %p9759_p0, %p9758_p2 }
  0x62   : > { %p9761_p7 = pnand %p9760_p6, %p9754_p9 }
  0x64   : > { %9764 = shalt.err (!%p9761_p7)
}
  0x65   : > { %s9845_s12 = smov 1024   ;;  %s9846_s13 = smov 512  }
  0x66   : > { %s9847_s15 = smov 32   ;;  %p13599_p10 = scmp.ne.s32.totalorder %s13594_s26, 0 }
  0x67   : > { %9538 = dma.hbm_to_vmem [thread:$0]  (!%p13598_p13), %s10018_s22, 65536, %s10020_s27, %s10022_s29, %s9845_s12, %s9846_s13, %s9847_s15  }
  0x68   : > { %204 = sbr.rel (%p13599_p10) target bundleno = 1187 (0x4a3), region = 36 }
  0x6f   : > { %p13600_p4 = scmp.eq.s32.totalorder %s9900_s19, 0 }
  0x71   : > { %9808 = dma.done.wait (%p13600_p4), [#allocation6], 32   ;;  %p13601_p11 = pmov %p13600_p4 }
  0x72   : > { %s210_s21 = sand.u32 1, %s9829_s16   ;;  %p13602_p12 = scmp.ne.s32.totalorder %s13593_s25, 0 }
  0x73   : > { %9810 = vsyncadd (%p13601_p11), [#allocation6], 4294967264  ;;  %s9332_s24 = sshll.u32 %s210_s21, 12  ;;  %s211_s5 = scalar_lea.sflag [#allocation4], %s210_s21 }
  0x74   : > { %s10057_s18 = scalar_lea.vmem [#allocation7], %s9332_s24 }
  0x75   : > { %9812 = dma.done.wait (%p13602_p12), %s211_s5, 65536  }
  0x76   : > { %9814 = vsyncadd (%p13602_p12), %s211_s5, 4294901760  ;;  %p13603_p13 = pmov %p13600_p4 }
  0x77   : > { %p13604_p1 = pmov %p13600_p4 }
  0x78   : > { %9816 = dma.done.wait (%p13603_p13), [#allocation9], 8512  }
  0x79   : > { %9818 = vsyncadd (%p13604_p1), [#allocation9], 4294958784 }
  0x7a   : > { %227 = sfence }
  0x7b   : > { %p13605_p3 = scmp.ne.s32.totalorder %s9900_s19, 0 }
  0x7c   : > { %v9848_v0 = vmov (!%p13605_p3), 0.0  }
  0x7d   : > { %248 = sbr.rel (%p13605_p3) target bundleno = 132 (0x84), region = 56  ;;  %249 = vst [vmem:[#allocation2] sm:$0xff] (!%p13605_p3), %v9848_v0 }
  0x84 PF: > { %v259_v1 = vld [vmem:[%s10057_s18 + $0x40] sm:$0xff]  ;;  %v260_v2 = vld [vmem:[%s10057_s18 + $0x48] sm:$0xff]  ;;  %v261_v3 = vld [vmem:[%s10057_s18 + $0x50] sm:$0xff]  ;;  %vm7686_vm0 = vcmask 130112   ;;  %vm7693_vm1 = vcmask 195712   ;;  %vm7700_vm2 = vcmask 261312  }
  0x85   : > { %v773_v4 = vadd.f32 %v260_v2, %v259_v1  ;;  %v251_v5 = vld [vmem:[%s10057_s18] sm:$0xff]  ;;  %v252_v6 = vld [vmem:[%s10057_s18 + $0x8] sm:$0xff]  ;;  %v262_v7 = vld [vmem:[%s10057_s18 + $0x58] sm:$0xff]  ;;  %vm7707_vm3 = vcmask 326912   ;;  %vm7714_vm4 = vcmask 392512   ;;  %vm7721_vm5 = vcmask 458112  }
  0x86   : > { %v253_v8 = vld [vmem:[%s10057_s18 + $0x10] sm:$0xff]  ;;  %v763_v9 = vadd.f32 %v252_v6, %v251_v5  ;;  %v263_v10 = vld [vmem:[%s10057_s18 + $0x60] sm:$0xff]  ;;  %v254_v12 = vld [vmem:[%s10057_s18 + $0x18] sm:$0xff]  ;;  %vm7728_vm6 = vcmask 523712   ;;  %vm7735_vm7 = vcmask 589312   ;;  %vm7742_vm8 = vcmask 654912  }
  0x87   : > { %v774_v11 = vadd.f32 %v773_v4, %v261_v3  ;;  %v264_v13 = vld [vmem:[%s10057_s18 + $0x68] sm:$0xff]  ;;  %v265_v14 = vld [vmem:[%s10057_s18 + $0x70] sm:$0xff]  ;;  %v255_v17 = vld [vmem:[%s10057_s18 + $0x20] sm:$0xff]  ;;  %vm7749_vm9 = vcmask 720512   ;;  %vm7756_vm10 = vcmask 786112   ;;  %vm7763_vm11 = vcmask 851712  }
  0x88   : > { %v764_v15 = vadd.f32 %v763_v9, %v253_v8  ;;  %v778_v16 = vadd.f32 %v264_v13, %v263_v10  ;;  %v256_v18 = vld [vmem:[%s10057_s18 + $0x28] sm:$0xff]  ;;  %v257_v19 = vld [vmem:[%s10057_s18 + $0x30] sm:$0xff]  ;;  %v266_v21 = vld [vmem:[%s10057_s18 + $0x78] sm:$0xff]  ;;  %vm7770_vm12 = vcmask 917312   ;;  %vm7777_vm13 = vcmask 982912   ;;  %p9336_p5 = scmp.ne.s32.totalorder %s9900_s19, 1 }
  0x89   : > { %v775_v20 = vadd.f32 %v774_v11, %v262_v7  ;;  %v768_v22 = vadd.f32 %v256_v18, %v255_v17  ;;  %v271_v23 = vld [vmem:[%s10057_s18 + $0xa0] sm:$0xff]  ;;  %v272_v24 = vld [vmem:[%s10057_s18 + $0xa8] sm:$0xff]  ;;  %v258_v27 = vld [vmem:[%s10057_s18 + $0x38] sm:$0xff]  ;;  %vm7784_vm14 = vcmask 1048512   ;;  %vm8339_vm15 = vcmask 1041409   ;;  %s8372_s25 = sld [smem:[#allocation3]] (!%p9336_p5) }
  0x8a   : > { %v765_v25 = vadd.f32 %v764_v15, %v254_v12  ;;  %v779_v26 = vadd.f32 %v778_v16, %v265_v14  ;;  %v273_v28 = vld [vmem:[%s10057_s18 + $0xb0] sm:$0xff]  ;;  %v788_v29 = vadd.f32 %v272_v24, %v271_v23  ;;  %v267_v30 = vld [vmem:[%s10057_s18 + $0x80] sm:$0xff]  ;;  %v274_v32 = vld [vmem:[%s10057_s18 + $0xb8] sm:$0xff]  ;;  %s9337_s26 = sld [smem:[#allocation3 + $0x1]] (!%p9336_p5)  ;;  %s9340_s30 = sld [smem:[#allocation3 + $0x2]] (!%p9336_p5) }
  0x8b   : > { %776 = vadd.xlane.f32.xlu1 %v775_v20  ;;  %v769_v31 = vadd.f32 %v768_v22, %v257_v19  ;;  %v268_v33 = vld [vmem:[%s10057_s18 + $0x88] sm:$0xff]  ;;  %v269_v34 = vld [vmem:[%s10057_s18 + $0x90] sm:$0xff]  ;;  %v279_v38 = vld [vmem:[%s10057_s18 + $0xe0] sm:$0xff]  ;;  %s9343_s22 = sld [smem:[#allocation3 + $0x80]] (!%p9336_p5)  ;;  %s13459_s27 = sld [smem:[#allocation3 + $0x81]] (!%p9336_p5) }
  0x8c   : > { %766 = vadd.xlane.f32.xlu0 %v765_v25  ;;  %v780_v35 = vadd.f32 %v779_v26, %v266_v21  ;;  %v789_v36 = vadd.f32 %v788_v29, %v273_v28  ;;  %v783_v37 = vadd.f32 %v268_v33, %v267_v30  ;;  %v280_v39 = vld [vmem:[%s10057_s18 + $0xe8] sm:$0xff]  ;;  %v281_v40 = vld [vmem:[%s10057_s18 + $0xf0] sm:$0xff]  ;;  %v270_v42 = vld [vmem:[%s10057_s18 + $0x98] sm:$0xff]  ;;  %s13461_s29 = sld [smem:[#allocation3 + $0x82]] (!%p9336_p5) }
  0x8d   : > { %v770_v41 = vadd.f32 %v769_v31, %v258_v27  ;;  %v798_v43 = vadd.f32 %v280_v39, %v279_v38  ;;  %v275_v44 = vld [vmem:[%s10057_s18 + $0xc0] sm:$0xff]  ;;  %v276_v45 = vld [vmem:[%s10057_s18 + $0xc8] sm:$0xff]  ;;  %v277_v47 = vld [vmem:[%s10057_s18 + $0xd0] sm:$0xff] }
  0x8e   : > { %v784_v46 = vadd.f32 %v783_v37, %v269_v34  ;;  %v793_v48 = vadd.f32 %v276_v45, %v275_v44  ;;  %v287_v49 = vld [vmem:[%s10057_s18 + $0x120] sm:$0xff]  ;;  %v790_v50 = vadd.f32 %v789_v36, %v274_v32  ;;  %v282_v51 = vld [vmem:[%s10057_s18 + $0xf8] sm:$0xff]  ;;  %v288_v54 = vld [vmem:[%s10057_s18 + $0x128] sm:$0xff] }
  0x8f   : > { %781 = vadd.xlane.f32.xlu1 %v780_v35  ;;  %v799_v52 = vadd.f32 %v798_v43, %v281_v40  ;;  %v278_v53 = vld [vmem:[%s10057_s18 + $0xd8] sm:$0xff]  ;;  %v289_v57 = vld [vmem:[%s10057_s18 + $0x130] sm:$0xff]  ;;  %v808_v58 = vadd.f32 %v288_v54, %v287_v49  ;;  %v283_v59 = vld [vmem:[%s10057_s18 + $0x100] sm:$0xff] }
  0x90   : > { %771 = vadd.xlane.f32.xlu0 %v770_v41  ;;  %v785_v55 = vadd.f32 %v784_v46, %v270_v42  ;;  %v794_v56 = vadd.f32 %v793_v48, %v277_v47  ;;  %v284_v60 = vld [vmem:[%s10057_s18 + $0x108] sm:$0xff]  ;;  %v285_v61 = vld [vmem:[%s10057_s18 + $0x110] sm:$0xff]  ;;  %v295_v63 = vld [vmem:[%s10057_s18 + $0x160] sm:$0xff] }
  0x91   : > { %v803_v62 = vadd.f32 %v284_v60, %v283_v59  ;;  %v296_v0 = vld [vmem:[%s10057_s18 + $0x168] sm:$0xff]  ;;  %v291_v1 = vld [vmem:[%s10057_s18 + $0x140] sm:$0xff]  ;;  %v800_v2 = vadd.f32 %v799_v52, %v282_v51  ;;  %v290_v3 = vld [vmem:[%s10057_s18 + $0x138] sm:$0xff]  ;;  %v809_v4 = vadd.f32 %v808_v58, %v289_v57 }
  0x92   : > { %v286_v5 = vld [vmem:[%s10057_s18 + $0x118] sm:$0xff]  ;;  %v818_v6 = vadd.f32 %v296_v0, %v295_v63  ;;  %v292_v7 = vld [vmem:[%s10057_s18 + $0x148] sm:$0xff]  ;;  %v795_v8 = vadd.f32 %v794_v56, %v278_v53  ;;  %v297_v10 = vld [vmem:[%s10057_s18 + $0x170] sm:$0xff] }
  0x93   : > { %791 = vadd.xlane.f32.xlu1 %v790_v50  ;;  %v804_v9 = vadd.f32 %v803_v62, %v285_v61  ;;  %v813_v11 = vadd.f32 %v292_v7, %v291_v1  ;;  %v303_v12 = vld [vmem:[%s10057_s18 + $0x1a0] sm:$0xff]  ;;  %v304_v13 = vld [vmem:[%s10057_s18 + $0x1a8] sm:$0xff]  ;;  %v293_v14 = vld [vmem:[%s10057_s18 + $0x150] sm:$0xff]  ;;  %v810_v17 = vadd.f32 %v809_v4, %v290_v3 }
  0x94   : > { %786 = vadd.xlane.f32.xlu0 %v785_v55  ;;  %v299_v15 = vld [vmem:[%s10057_s18 + $0x180] sm:$0xff]  ;;  %v300_v16 = vld [vmem:[%s10057_s18 + $0x188] sm:$0xff]  ;;  %v298_v18 = vld [vmem:[%s10057_s18 + $0x178] sm:$0xff]  ;;  %v819_v19 = vadd.f32 %v818_v6, %v297_v10  ;;  %v828_v21 = vadd.f32 %v304_v13, %v303_v12 }
  0x95   : > { %v294_v20 = vld [vmem:[%s10057_s18 + $0x158] sm:$0xff]  ;;  %v805_v22 = vadd.f32 %v804_v9, %v286_v5  ;;  %v814_v23 = vadd.f32 %v813_v11, %v293_v14  ;;  %v305_v24 = vld [vmem:[%s10057_s18 + $0x1b0] sm:$0xff]  ;;  %v823_v25 = vadd.f32 %v300_v16, %v299_v15  ;;  %v311_v26 = vld [vmem:[%s10057_s18 + $0x1e0] sm:$0xff] }
  0x96   : > { %v312_v27 = vld [vmem:[%s10057_s18 + $0x1e8] sm:$0xff]  ;;  %v301_v28 = vld [vmem:[%s10057_s18 + $0x190] sm:$0xff]  ;;  %v307_v29 = vld [vmem:[%s10057_s18 + $0x1c0] sm:$0xff]  ;;  %v820_v31 = vadd.f32 %v819_v19, %v298_v18  ;;  %v829_v33 = vadd.f32 %v828_v21, %v305_v24 }
  0x97   : > { %801 = vadd.xlane.f32.xlu1 %v800_v2  ;;  %v308_v30 = vld [vmem:[%s10057_s18 + $0x1c8] sm:$0xff]  ;;  %v306_v32 = vld [vmem:[%s10057_s18 + $0x1b8] sm:$0xff]  ;;  %v838_v35 = vadd.f32 %v312_v27, %v311_v26  ;;  %v815_v36 = vadd.f32 %v814_v23, %v294_v20  ;;  %v824_v37 = vadd.f32 %v823_v25, %v301_v28  ;;  %v313_v38 = vld [vmem:[%s10057_s18 + $0x1f0] sm:$0xff] }
  0x98   : > { %796 = vadd.xlane.f32.xlu0 %v795_v8  ;;  %v302_v34 = vld [vmem:[%s10057_s18 + $0x198] sm:$0xff]  ;;  %v833_v39 = vadd.f32 %v308_v30, %v307_v29  ;;  %v319_v40 = vld [vmem:[%s10057_s18 + $0x220] sm:$0xff]  ;;  %v320_v41 = vld [vmem:[%s10057_s18 + $0x228] sm:$0xff]  ;;  %v830_v45 = vadd.f32 %v829_v33, %v306_v32 }
  0x99   : > { %v309_v42 = vld [vmem:[%s10057_s18 + $0x1d0] sm:$0xff]  ;;  %v315_v43 = vld [vmem:[%s10057_s18 + $0x200] sm:$0xff]  ;;  %v316_v44 = vld [vmem:[%s10057_s18 + $0x208] sm:$0xff]  ;;  %v839_v47 = vadd.f32 %v838_v35, %v313_v38  ;;  %v848_v49 = vadd.f32 %v320_v41, %v319_v40  ;;  %v825_v50 = vadd.f32 %v824_v37, %v302_v34 }
  0x9a   : > { %v314_v46 = vld [vmem:[%s10057_s18 + $0x1f8] sm:$0xff]  ;;  %v834_v51 = vadd.f32 %v833_v39, %v309_v42  ;;  %v321_v52 = vld [vmem:[%s10057_s18 + $0x230] sm:$0xff]  ;;  %v843_v53 = vadd.f32 %v316_v44, %v315_v43  ;;  %v327_v54 = vld [vmem:[%s10057_s18 + $0x260] sm:$0xff] }
  0x9b   : > { %811 = vadd.xlane.f32.xlu1 %v810_v17  ;;  %v310_v48 = vld [vmem:[%s10057_s18 + $0x1d8] sm:$0xff]  ;;  %v328_v55 = vld [vmem:[%s10057_s18 + $0x268] sm:$0xff]  ;;  %v317_v56 = vld [vmem:[%s10057_s18 + $0x210] sm:$0xff]  ;;  %v840_v59 = vadd.f32 %v839_v47, %v314_v46  ;;  %v849_v61 = vadd.f32 %v848_v49, %v321_v52 }
  0x9c   : > { %806 = vadd.xlane.f32.xlu0 %v805_v22  ;;  %v323_v57 = vld [vmem:[%s10057_s18 + $0x240] sm:$0xff]  ;;  %v324_v58 = vld [vmem:[%s10057_s18 + $0x248] sm:$0xff]  ;;  %v322_v60 = vld [vmem:[%s10057_s18 + $0x238] sm:$0xff]  ;;  %v858_v63 = vadd.f32 %v328_v55, %v327_v54  ;;  %v835_v0 = vadd.f32 %v834_v51, %v310_v48  ;;  %v844_v1 = vadd.f32 %v843_v53, %v317_v56 }
  0x9d   : > { %v318_v62 = vld [vmem:[%s10057_s18 + $0x218] sm:$0xff]  ;;  %v329_v2 = vld [vmem:[%s10057_s18 + $0x270] sm:$0xff]  ;;  %v853_v3 = vadd.f32 %v324_v58, %v323_v57  ;;  %v335_v4 = vld [vmem:[%s10057_s18 + $0x2a0] sm:$0xff]  ;;  %v850_v9 = vadd.f32 %v849_v61, %v322_v60 }
  0x9e   : > { %v336_v5 = vld [vmem:[%s10057_s18 + $0x2a8] sm:$0xff]  ;;  %v325_v6 = vld [vmem:[%s10057_s18 + $0x250] sm:$0xff]  ;;  %v331_v7 = vld [vmem:[%s10057_s18 + $0x280] sm:$0xff]  ;;  %v859_v11 = vadd.f32 %v858_v63, %v329_v2  ;;  %v845_v14 = vadd.f32 %v844_v1, %v318_v62 }
  0x9f   : > { %821 = vadd.xlane.f32.xlu1 %v820_v31  ;;  %v332_v8 = vld [vmem:[%s10057_s18 + $0x288] sm:$0xff]  ;;  %v330_v10 = vld [vmem:[%s10057_s18 + $0x278] sm:$0xff]  ;;  %v868_v13 = vadd.f32 %v336_v5, %v335_v4  ;;  %v854_v15 = vadd.f32 %v853_v3, %v325_v6  ;;  %v337_v16 = vld [vmem:[%s10057_s18 + $0x2b0] sm:$0xff] }
  0xa0   : > { %816 = vadd.xlane.f32.xlu0 %v815_v36  ;;  %v326_v12 = vld [vmem:[%s10057_s18 + $0x258] sm:$0xff]  ;;  %v863_v17 = vadd.f32 %v332_v8, %v331_v7  ;;  %v343_v18 = vld [vmem:[%s10057_s18 + $0x2e0] sm:$0xff]  ;;  %v344_v19 = vld [vmem:[%s10057_s18 + $0x2e8] sm:$0xff]  ;;  %v860_v23 = vadd.f32 %v859_v11, %v330_v10 }
  0xa1   : > { %v333_v20 = vld [vmem:[%s10057_s18 + $0x290] sm:$0xff]  ;;  %v339_v21 = vld [vmem:[%s10057_s18 + $0x2c0] sm:$0xff]  ;;  %v340_v22 = vld [vmem:[%s10057_s18 + $0x2c8] sm:$0xff]  ;;  %v869_v25 = vadd.f32 %v868_v13, %v337_v16  ;;  %v878_v27 = vadd.f32 %v344_v19, %v343_v18  ;;  %v855_v28 = vadd.f32 %v854_v15, %v326_v12 }
  0xa2   : > { %v338_v24 = vld [vmem:[%s10057_s18 + $0x2b8] sm:$0xff]  ;;  %v864_v29 = vadd.f32 %v863_v17, %v333_v20  ;;  %v345_v30 = vld [vmem:[%s10057_s18 + $0x2f0] sm:$0xff]  ;;  %v873_v31 = vadd.f32 %v340_v22, %v339_v21  ;;  %v351_v32 = vld [vmem:[%s10057_s18 + $0x320] sm:$0xff] }
  0xa3   : > { %831 = vadd.xlane.f32.xlu1 %v830_v45  ;;  %v334_v26 = vld [vmem:[%s10057_s18 + $0x298] sm:$0xff]  ;;  %v352_v33 = vld [vmem:[%s10057_s18 + $0x328] sm:$0xff]  ;;  %v341_v34 = vld [vmem:[%s10057_s18 + $0x2d0] sm:$0xff]  ;;  %v870_v37 = vadd.f32 %v869_v25, %v338_v24  ;;  %v879_v39 = vadd.f32 %v878_v27, %v345_v30 }
  0xa4   : > { %826 = vadd.xlane.f32.xlu0 %v825_v50  ;;  %v347_v35 = vld [vmem:[%s10057_s18 + $0x300] sm:$0xff]  ;;  %v348_v36 = vld [vmem:[%s10057_s18 + $0x308] sm:$0xff]  ;;  %v346_v38 = vld [vmem:[%s10057_s18 + $0x2f8] sm:$0xff]  ;;  %v888_v41 = vadd.f32 %v352_v33, %v351_v32  ;;  %v865_v42 = vadd.f32 %v864_v29, %v334_v26  ;;  %v874_v43 = vadd.f32 %v873_v31, %v341_v34 }
  0xa5   : > { %v342_v40 = vld [vmem:[%s10057_s18 + $0x2d8] sm:$0xff]  ;;  %v353_v44 = vld [vmem:[%s10057_s18 + $0x330] sm:$0xff]  ;;  %v883_v45 = vadd.f32 %v348_v36, %v347_v35  ;;  %v359_v46 = vld [vmem:[%s10057_s18 + $0x360] sm:$0xff]  ;;  %v880_v51 = vadd.f32 %v879_v39, %v346_v38 }
  0xa6   : > { %v360_v47 = vld [vmem:[%s10057_s18 + $0x368] sm:$0xff]  ;;  %v349_v48 = vld [vmem:[%s10057_s18 + $0x310] sm:$0xff]  ;;  %v355_v49 = vld [vmem:[%s10057_s18 + $0x340] sm:$0xff]  ;;  %v889_v53 = vadd.f32 %v888_v41, %v353_v44  ;;  %v875_v56 = vadd.f32 %v874_v43, %v342_v40 }
  0xa7   : > { %841 = vadd.xlane.f32.xlu1 %v840_v59  ;;  %v356_v50 = vld [vmem:[%s10057_s18 + $0x348] sm:$0xff]  ;;  %v354_v52 = vld [vmem:[%s10057_s18 + $0x338] sm:$0xff]  ;;  %v898_v55 = vadd.f32 %v360_v47, %v359_v46  ;;  %v884_v57 = vadd.f32 %v883_v45, %v349_v48  ;;  %v361_v58 = vld [vmem:[%s10057_s18 + $0x370] sm:$0xff] }
  0xa8   : > { %836 = vadd.xlane.f32.xlu0 %v835_v0  ;;  %v350_v54 = vld [vmem:[%s10057_s18 + $0x318] sm:$0xff]  ;;  %v893_v59 = vadd.f32 %v356_v50, %v355_v49  ;;  %v367_v60 = vld [vmem:[%s10057_s18 + $0x3a0] sm:$0xff]  ;;  %v368_v61 = vld [vmem:[%s10057_s18 + $0x3a8] sm:$0xff]  ;;  %v890_v1 = vadd.f32 %v889_v53, %v354_v52 }
  0xa9   : > { %v357_v62 = vld [vmem:[%s10057_s18 + $0x350] sm:$0xff]  ;;  %v363_v63 = vld [vmem:[%s10057_s18 + $0x380] sm:$0xff]  ;;  %v364_v0 = vld [vmem:[%s10057_s18 + $0x388] sm:$0xff]  ;;  %v899_v3 = vadd.f32 %v898_v55, %v361_v58  ;;  %v908_v5 = vadd.f32 %v368_v61, %v367_v60  ;;  %v885_v6 = vadd.f32 %v884_v57, %v350_v54 }
  0xaa   : > { %v362_v2 = vld [vmem:[%s10057_s18 + $0x378] sm:$0xff]  ;;  %v894_v7 = vadd.f32 %v893_v59, %v357_v62  ;;  %v369_v8 = vld [vmem:[%s10057_s18 + $0x3b0] sm:$0xff]  ;;  %v375_v10 = vld [vmem:[%s10057_s18 + $0x3e0] sm:$0xff] }
  0xab   : > { %851 = vadd.xlane.f32.xlu1 %v850_v9  ;;  %v358_v4 = vld [vmem:[%s10057_s18 + $0x358] sm:$0xff]  ;;  %v903_v9 = vadd.f32 %v364_v0, %v363_v63  ;;  %v376_v11 = vld [vmem:[%s10057_s18 + $0x3e8] sm:$0xff]  ;;  %v365_v12 = vld [vmem:[%s10057_s18 + $0x390] sm:$0xff]  ;;  %v900_v15 = vadd.f32 %v899_v3, %v362_v2  ;;  %v909_v17 = vadd.f32 %v908_v5, %v369_v8 }
  0xac   : > { %846 = vadd.xlane.f32.xlu0 %v845_v14  ;;  %v371_v13 = vld [vmem:[%s10057_s18 + $0x3c0] sm:$0xff]  ;;  %v372_v14 = vld [vmem:[%s10057_s18 + $0x3c8] sm:$0xff]  ;;  %v370_v16 = vld [vmem:[%s10057_s18 + $0x3b8] sm:$0xff]  ;;  %v918_v19 = vadd.f32 %v376_v11, %v375_v10  ;;  %v895_v20 = vadd.f32 %v894_v7, %v358_v4 }
  0xad   : > { %v366_v18 = vld [vmem:[%s10057_s18 + $0x398] sm:$0xff]  ;;  %v904_v21 = vadd.f32 %v903_v9, %v365_v12  ;;  %v377_v22 = vld [vmem:[%s10057_s18 + $0x3f0] sm:$0xff]  ;;  %v383_v24 = vld [vmem:[%s10057_s18 + $0x420] sm:$0xff]  ;;  %v910_v29 = vadd.f32 %v909_v17, %v370_v16 }
  0xae   : > { %v384_v25 = vld [vmem:[%s10057_s18 + $0x428] sm:$0xff]  ;;  %v373_v26 = vld [vmem:[%s10057_s18 + $0x3d0] sm:$0xff]  ;;  %v379_v27 = vld [vmem:[%s10057_s18 + $0x400] sm:$0xff]  ;;  %v919_v31 = vadd.f32 %v918_v19, %v377_v22 }
  0xaf   : > { %861 = vadd.xlane.f32.xlu1 %v860_v23  ;;  %v913_v23 = vadd.f32 %v372_v14, %v371_v13  ;;  %v378_v30 = vld [vmem:[%s10057_s18 + $0x3f8] sm:$0xff]  ;;  %v928_v33 = vadd.f32 %v384_v25, %v383_v24  ;;  %v905_v34 = vadd.f32 %v904_v21, %v366_v18  ;;  %v385_v36 = vld [vmem:[%s10057_s18 + $0x430] sm:$0xff]  ;;  %v391_v38 = vld [vmem:[%s10057_s18 + $0x460] sm:$0xff] }
  0xb0   : > { %856 = vadd.xlane.f32.xlu0 %v855_v28  ;;  %v380_v28 = vld [vmem:[%s10057_s18 + $0x408] sm:$0xff]  ;;  %v374_v32 = vld [vmem:[%s10057_s18 + $0x3d8] sm:$0xff]  ;;  %v381_v40 = vld [vmem:[%s10057_s18 + $0x410] sm:$0xff]  ;;  %v920_v43 = vadd.f32 %v919_v31, %v378_v30 }
  0xb1   : > { %v914_v35 = vadd.f32 %v913_v23, %v373_v26  ;;  %v392_v39 = vld [vmem:[%s10057_s18 + $0x468] sm:$0xff]  ;;  %v387_v41 = vld [vmem:[%s10057_s18 + $0x440] sm:$0xff]  ;;  %v386_v44 = vld [vmem:[%s10057_s18 + $0x438] sm:$0xff]  ;;  %v929_v45 = vadd.f32 %v928_v33, %v385_v36 }
  0xb2   : > { %v382_v46 = vld [vmem:[%s10057_s18 + $0x418] sm:$0xff]  ;;  %v938_v47 = vadd.f32 %v392_v39, %v391_v38  ;;  %v393_v50 = vld [vmem:[%s10057_s18 + $0x470] sm:$0xff]  ;;  %v399_v52 = vld [vmem:[%s10057_s18 + $0x4a0] sm:$0xff] }
  0xb3   : > { %871 = vadd.xlane.f32.xlu1 %v870_v37  ;;  %v923_v37 = vadd.f32 %v380_v28, %v379_v27  ;;  %v915_v48 = vadd.f32 %v914_v35, %v374_v32  ;;  %v400_v53 = vld [vmem:[%s10057_s18 + $0x4a8] sm:$0xff]  ;;  %v389_v54 = vld [vmem:[%s10057_s18 + $0x450] sm:$0xff]  ;;  %v395_v55 = vld [vmem:[%s10057_s18 + $0x480] sm:$0xff]  ;;  %v930_v57 = vadd.f32 %v929_v45, %v386_v44 }
  0xb4   : > { %866 = vadd.xlane.f32.xlu0 %v865_v42  ;;  %v388_v42 = vld [vmem:[%s10057_s18 + $0x448] sm:$0xff]  ;;  %v394_v58 = vld [vmem:[%s10057_s18 + $0x478] sm:$0xff]  ;;  %v939_v59 = vadd.f32 %v938_v47, %v393_v50  ;;  %v948_v61 = vadd.f32 %v400_v53, %v399_v52  ;;  %v401_v0 = vld [vmem:[%s10057_s18 + $0x4b0] sm:$0xff] }
  0xb5   : > { %v924_v49 = vadd.f32 %v923_v37, %v381_v40  ;;  %v390_v60 = vld [vmem:[%s10057_s18 + $0x458] sm:$0xff]  ;;  %v407_v2 = vld [vmem:[%s10057_s18 + $0x4e0] sm:$0xff]  ;;  %v408_v3 = vld [vmem:[%s10057_s18 + $0x4e8] sm:$0xff] }
  0xb6   : > { %v397_v4 = vld [vmem:[%s10057_s18 + $0x490] sm:$0xff]  ;;  %v403_v5 = vld [vmem:[%s10057_s18 + $0x4c0] sm:$0xff]  ;;  %v940_v7 = vadd.f32 %v939_v59, %v394_v58  ;;  %v402_v8 = vld [vmem:[%s10057_s18 + $0x4b8] sm:$0xff]  ;;  %v949_v9 = vadd.f32 %v948_v61, %v401_v0  ;;  %v958_v11 = vadd.f32 %v408_v3, %v407_v2 }
  0xb7   : > { %881 = vadd.xlane.f32.xlu1 %v880_v51  ;;  %v933_v51 = vadd.f32 %v388_v42, %v387_v41  ;;  %v925_v62 = vadd.f32 %v924_v49, %v382_v46  ;;  %v398_v10 = vld [vmem:[%s10057_s18 + $0x498] sm:$0xff]  ;;  %v409_v14 = vld [vmem:[%s10057_s18 + $0x4f0] sm:$0xff]  ;;  %v415_v16 = vld [vmem:[%s10057_s18 + $0x520] sm:$0xff] }
  0xb8   : > { %876 = vadd.xlane.f32.xlu0 %v875_v56  ;;  %v396_v56 = vld [vmem:[%s10057_s18 + $0x488] sm:$0xff]  ;;  %v405_v18 = vld [vmem:[%s10057_s18 + $0x4d0] sm:$0xff]  ;;  %v411_v19 = vld [vmem:[%s10057_s18 + $0x500] sm:$0xff]  ;;  %v950_v21 = vadd.f32 %v949_v9, %v402_v8  ;;  %v959_v23 = vadd.f32 %v958_v11, %v409_v14 }
  0xb9   : > { %v934_v63 = vadd.f32 %v933_v51, %v389_v54  ;;  %v416_v17 = vld [vmem:[%s10057_s18 + $0x528] sm:$0xff]  ;;  %v410_v22 = vld [vmem:[%s10057_s18 + $0x4f8] sm:$0xff]  ;;  %v417_v28 = vld [vmem:[%s10057_s18 + $0x530] sm:$0xff] }
  0xba   : > { %v406_v24 = vld [vmem:[%s10057_s18 + $0x4d8] sm:$0xff]  ;;  %v968_v25 = vadd.f32 %v416_v17, %v415_v16  ;;  %v423_v30 = vld [vmem:[%s10057_s18 + $0x560] sm:$0xff]  ;;  %v424_v31 = vld [vmem:[%s10057_s18 + $0x568] sm:$0xff]  ;;  %v960_v35 = vadd.f32 %v959_v23, %v410_v22 }
  0xbb   : > { %891 = vadd.xlane.f32.xlu1 %v890_v1  ;;  %v943_v1 = vadd.f32 %v396_v56, %v395_v55  ;;  %v935_v12 = vadd.f32 %v934_v63, %v390_v60  ;;  %v413_v32 = vld [vmem:[%s10057_s18 + $0x510] sm:$0xff]  ;;  %v419_v33 = vld [vmem:[%s10057_s18 + $0x540] sm:$0xff]  ;;  %v418_v36 = vld [vmem:[%s10057_s18 + $0x538] sm:$0xff]  ;;  %v978_v39 = vadd.f32 %v424_v31, %v423_v30 }
  0xbc   : > { %886 = vadd.xlane.f32.xlu0 %v885_v6  ;;  %v404_v6 = vld [vmem:[%s10057_s18 + $0x4c8] sm:$0xff]  ;;  %v969_v37 = vadd.f32 %v968_v25, %v417_v28  ;;  %v414_v38 = vld [vmem:[%s10057_s18 + $0x518] sm:$0xff]  ;;  %v425_v42 = vld [vmem:[%s10057_s18 + $0x570] sm:$0xff] }
  0xbd   : > { %v944_v13 = vadd.f32 %v943_v1, %v397_v4  ;;  %v431_v44 = vld [vmem:[%s10057_s18 + $0x5a0] sm:$0xff]  ;;  %v432_v45 = vld [vmem:[%s10057_s18 + $0x5a8] sm:$0xff]  ;;  %v421_v46 = vld [vmem:[%s10057_s18 + $0x550] sm:$0xff]  ;;  %v979_v51 = vadd.f32 %v978_v39, %v425_v42 }
  0xbe   : > { %v427_v47 = vld [vmem:[%s10057_s18 + $0x580] sm:$0xff]  ;;  %v970_v49 = vadd.f32 %v969_v37, %v418_v36  ;;  %v426_v50 = vld [vmem:[%s10057_s18 + $0x578] sm:$0xff]  ;;  %v988_v53 = vadd.f32 %v432_v45, %v431_v44  ;;  %v433_v56 = vld [vmem:[%s10057_s18 + $0x5b0] sm:$0xff] }
  0xbf   : > { %901 = vadd.xlane.f32.xlu1 %v900_v15  ;;  %v953_v15 = vadd.f32 %v404_v6, %v403_v5  ;;  %v945_v26 = vadd.f32 %v944_v13, %v398_v10  ;;  %v422_v52 = vld [vmem:[%s10057_s18 + $0x558] sm:$0xff]  ;;  %v439_v58 = vld [vmem:[%s10057_s18 + $0x5e0] sm:$0xff]  ;;  %v440_v59 = vld [vmem:[%s10057_s18 + $0x5e8] sm:$0xff]  ;;  %v980_v63 = vadd.f32 %v979_v51, %v426_v50 }
  0xc0   : > { %896 = vadd.xlane.f32.xlu0 %v895_v20  ;;  %v412_v20 = vld [vmem:[%s10057_s18 + $0x508] sm:$0xff]  ;;  %v429_v60 = vld [vmem:[%s10057_s18 + $0x590] sm:$0xff]  ;;  %v435_v61 = vld [vmem:[%s10057_s18 + $0x5c0] sm:$0xff]  ;;  %v989_v1 = vadd.f32 %v988_v53, %v433_v56  ;;  %v998_v3 = vadd.f32 %v440_v59, %v439_v58 }
  0xc1   : > { %v954_v27 = vadd.f32 %v953_v15, %v405_v18  ;;  %v434_v0 = vld [vmem:[%s10057_s18 + $0x5b8] sm:$0xff]  ;;  %v441_v6 = vld [vmem:[%s10057_s18 + $0x5f0] sm:$0xff]  ;;  %v447_v8 = vld [vmem:[%s10057_s18 + $0x620] sm:$0xff] }
  0xc2   : > { %v430_v2 = vld [vmem:[%s10057_s18 + $0x598] sm:$0xff]  ;;  %v448_v9 = vld [vmem:[%s10057_s18 + $0x628] sm:$0xff]  ;;  %v437_v10 = vld [vmem:[%s10057_s18 + $0x5d0] sm:$0xff]  ;;  %v990_v13 = vadd.f32 %v989_v1, %v434_v0  ;;  %v999_v15 = vadd.f32 %v998_v3, %v441_v6 }
  0xc3   : > { %911 = vadd.xlane.f32.xlu1 %v910_v29  ;;  %v963_v29 = vadd.f32 %v412_v20, %v411_v19  ;;  %v955_v40 = vadd.f32 %v954_v27, %v406_v24  ;;  %v443_v11 = vld [vmem:[%s10057_s18 + $0x600] sm:$0xff]  ;;  %v442_v14 = vld [vmem:[%s10057_s18 + $0x5f8] sm:$0xff]  ;;  %v1008_v17 = vadd.f32 %v448_v9, %v447_v8  ;;  %v449_v20 = vld [vmem:[%s10057_s18 + $0x630] sm:$0xff] }
  0xc4   : > { %906 = vadd.xlane.f32.xlu0 %v905_v34  ;;  %v420_v34 = vld [vmem:[%s10057_s18 + $0x548] sm:$0xff]  ;;  %v438_v16 = vld [vmem:[%s10057_s18 + $0x5d8] sm:$0xff]  ;;  %v455_v22 = vld [vmem:[%s10057_s18 + $0x660] sm:$0xff]  ;;  %v1000_v27 = vadd.f32 %v999_v15, %v442_v14 }
  0xc5   : > { %v964_v41 = vadd.f32 %v963_v29, %v413_v32  ;;  %v456_v23 = vld [vmem:[%s10057_s18 + $0x668] sm:$0xff]  ;;  %v445_v24 = vld [vmem:[%s10057_s18 + $0x610] sm:$0xff]  ;;  %v451_v25 = vld [vmem:[%s10057_s18 + $0x640] sm:$0xff]  ;;  %v1009_v29 = vadd.f32 %v1008_v17, %v449_v20 }
  0xc6   : > { %v450_v28 = vld [vmem:[%s10057_s18 + $0x638] sm:$0xff]  ;;  %v1018_v31 = vadd.f32 %v456_v23, %v455_v22  ;;  %v463_v36 = vld [vmem:[%s10057_s18 + $0x6a0] sm:$0xff]  ;;  %v464_v37 = vld [vmem:[%s10057_s18 + $0x6a8] sm:$0xff] }
  0xc7   : > { %921 = vadd.xlane.f32.xlu1 %v920_v43  ;;  %v973_v43 = vadd.f32 %v420_v34, %v419_v33  ;;  %v965_v54 = vadd.f32 %v964_v41, %v414_v38  ;;  %v446_v30 = vld [vmem:[%s10057_s18 + $0x618] sm:$0xff]  ;;  %v457_v34 = vld [vmem:[%s10057_s18 + $0x670] sm:$0xff]  ;;  %v459_v39 = vld [vmem:[%s10057_s18 + $0x680] sm:$0xff]  ;;  %v1010_v41 = vadd.f32 %v1009_v29, %v450_v28  ;;  %v1028_v45 = vadd.f32 %v464_v37, %v463_v36 }
  0xc8   : > { %916 = vadd.xlane.f32.xlu0 %v915_v48  ;;  %v428_v48 = vld [vmem:[%s10057_s18 + $0x588] sm:$0xff]  ;;  %v453_v38 = vld [vmem:[%s10057_s18 + $0x650] sm:$0xff]  ;;  %v458_v42 = vld [vmem:[%s10057_s18 + $0x678] sm:$0xff] }
  0xc9   : > { %v974_v55 = vadd.f32 %v973_v43, %v421_v46  ;;  %v1019_v43 = vadd.f32 %v1018_v31, %v457_v34  ;;  %v454_v44 = vld [vmem:[%s10057_s18 + $0x658] sm:$0xff]  ;;  %v471_v50 = vld [vmem:[%s10057_s18 + $0x6e0] sm:$0xff]  ;;  %v472_v51 = vld [vmem:[%s10057_s18 + $0x6e8] sm:$0xff] }
  0xca   : > { %v467_v53 = vld [vmem:[%s10057_s18 + $0x6c0] sm:$0xff]  ;;  %v466_v56 = vld [vmem:[%s10057_s18 + $0x6b8] sm:$0xff]  ;;  %v1038_v59 = vadd.f32 %v472_v51, %v471_v50  ;;  %v480_v1 = vld [vmem:[%s10057_s18 + $0x728] sm:$0xff] }
  0xcb   : > { %931 = vadd.xlane.f32.xlu1 %v930_v57  ;;  %v983_v57 = vadd.f32 %v428_v48, %v427_v47  ;;  %v975_v4 = vadd.f32 %v974_v55, %v422_v52  ;;  %v465_v48 = vld [vmem:[%s10057_s18 + $0x6b0] sm:$0xff]  ;;  %v1020_v55 = vadd.f32 %v1019_v43, %v458_v42  ;;  %v462_v58 = vld [vmem:[%s10057_s18 + $0x698] sm:$0xff]  ;;  %v479_v0 = vld [vmem:[%s10057_s18 + $0x720] sm:$0xff] }
  0xcc   : > { %926 = vadd.xlane.f32.xlu0 %v925_v62  ;;  %v436_v62 = vld [vmem:[%s10057_s18 + $0x5c8] sm:$0xff]  ;;  %v461_v52 = vld [vmem:[%s10057_s18 + $0x690] sm:$0xff]  ;;  %v475_v3 = vld [vmem:[%s10057_s18 + $0x700] sm:$0xff]  ;;  %v1048_v9 = vadd.f32 %v480_v1, %v479_v0 }
  0xcd   : > { %v984_v5 = vadd.f32 %v983_v57, %v429_v60  ;;  %v1029_v57 = vadd.f32 %v1028_v45, %v465_v48  ;;  %v474_v6 = vld [vmem:[%s10057_s18 + $0x6f8] sm:$0xff]  ;;  %v487_v14 = vld [vmem:[%s10057_s18 + $0x760] sm:$0xff]  ;;  %v488_v15 = vld [vmem:[%s10057_s18 + $0x768] sm:$0xff] }
  0xce   : > { %v470_v8 = vld [vmem:[%s10057_s18 + $0x6d8] sm:$0xff]  ;;  %v483_v17 = vld [vmem:[%s10057_s18 + $0x740] sm:$0xff]  ;;  %v1058_v23 = vadd.f32 %v488_v15, %v487_v14  ;;  %v496_v29 = vld [vmem:[%s10057_s18 + $0x7a8] sm:$0xff] }
  0xcf   : > { %941 = vadd.xlane.f32.xlu1 %v940_v7  ;;  %v993_v7 = vadd.f32 %v436_v62, %v435_v61  ;;  %v985_v18 = vadd.f32 %v984_v5, %v430_v2  ;;  %v473_v62 = vld [vmem:[%s10057_s18 + $0x6f0] sm:$0xff]  ;;  %v1030_v5 = vadd.f32 %v1029_v57, %v466_v56  ;;  %v482_v20 = vld [vmem:[%s10057_s18 + $0x738] sm:$0xff]  ;;  %v495_v28 = vld [vmem:[%s10057_s18 + $0x7a0] sm:$0xff] }
  0xd0   : > { %936 = vadd.xlane.f32.xlu0 %v935_v12  ;;  %v444_v12 = vld [vmem:[%s10057_s18 + $0x608] sm:$0xff]  ;;  %v469_v2 = vld [vmem:[%s10057_s18 + $0x6d0] sm:$0xff]  ;;  %v478_v22 = vld [vmem:[%s10057_s18 + $0x718] sm:$0xff]  ;;  %v1068_v37 = vadd.f32 %v496_v29, %v495_v28 }
  0xd1   : > { %v994_v19 = vadd.f32 %v993_v7, %v437_v10  ;;  %v1039_v7 = vadd.f32 %v1038_v59, %v473_v62  ;;  %v491_v31 = vld [vmem:[%s10057_s18 + $0x780] sm:$0xff]  ;;  %v490_v34 = vld [vmem:[%s10057_s18 + $0x778] sm:$0xff]  ;;  %v504_v43 = vld [vmem:[%s10057_s18 + $0x7e8] sm:$0xff] }
  0xd2   : > { %v486_v36 = vld [vmem:[%s10057_s18 + $0x758] sm:$0xff]  ;;  %v503_v42 = vld [vmem:[%s10057_s18 + $0x7e0] sm:$0xff]  ;;  %v512_v57 = vld [vmem:[%s10057_s18 + $0x828] sm:$0xff] }
  0xd3   : > { %951 = vadd.xlane.f32.xlu1 %v950_v21  ;;  %v1003_v21 = vadd.f32 %v444_v12, %v443_v11  ;;  %v995_v32 = vadd.f32 %v994_v19, %v438_v16  ;;  %v481_v12 = vld [vmem:[%s10057_s18 + $0x730] sm:$0xff]  ;;  %v1040_v19 = vadd.f32 %v1039_v7, %v474_v6  ;;  %v499_v45 = vld [vmem:[%s10057_s18 + $0x7c0] sm:$0xff]  ;;  %v498_v48 = vld [vmem:[%s10057_s18 + $0x7b8] sm:$0xff]  ;;  %v1078_v51 = vadd.f32 %v504_v43, %v503_v42 }
  0xd4   : > { %946 = vadd.xlane.f32.xlu0 %v945_v26  ;;  %v452_v26 = vld [vmem:[%s10057_s18 + $0x648] sm:$0xff]  ;;  %v477_v16 = vld [vmem:[%s10057_s18 + $0x710] sm:$0xff]  ;;  %v494_v50 = vld [vmem:[%s10057_s18 + $0x798] sm:$0xff] }
  0xd5   : > { %v1004_v33 = vadd.f32 %v1003_v21, %v445_v24  ;;  %v1049_v21 = vadd.f32 %v1048_v9, %v481_v12  ;;  %v511_v56 = vld [vmem:[%s10057_s18 + $0x820] sm:$0xff]  ;;  %v506_v62 = vld [vmem:[%s10057_s18 + $0x7f8] sm:$0xff]  ;;  %v520_v7 = vld [vmem:[%s10057_s18 + $0x868] sm:$0xff] }
  0xd6   : > { %v507_v59 = vld [vmem:[%s10057_s18 + $0x800] sm:$0xff]  ;;  %v502_v0 = vld [vmem:[%s10057_s18 + $0x7d8] sm:$0xff]  ;;  %v1088_v1 = vadd.f32 %v512_v57, %v511_v56 }
  0xd7   : > { %961 = vadd.xlane.f32.xlu1 %v960_v35  ;;  %v1013_v35 = vadd.f32 %v452_v26, %v451_v25  ;;  %v1005_v46 = vadd.f32 %v1004_v33, %v446_v30  ;;  %v489_v26 = vld [vmem:[%s10057_s18 + $0x770] sm:$0xff]  ;;  %v1050_v33 = vadd.f32 %v1049_v21, %v482_v20  ;;  %v519_v6 = vld [vmem:[%s10057_s18 + $0x860] sm:$0xff]  ;;  %v514_v12 = vld [vmem:[%s10057_s18 + $0x838] sm:$0xff] }
  0xd8   : > { %956 = vadd.xlane.f32.xlu0 %v955_v40  ;;  %v460_v40 = vld [vmem:[%s10057_s18 + $0x688] sm:$0xff]  ;;  %v485_v30 = vld [vmem:[%s10057_s18 + $0x750] sm:$0xff]  ;;  %v515_v9 = vld [vmem:[%s10057_s18 + $0x840] sm:$0xff]  ;;  %v1098_v15 = vadd.f32 %v520_v7, %v519_v6 }
  0xd9   : > { %v1014_v47 = vadd.f32 %v1013_v35, %v453_v38  ;;  %v1059_v35 = vadd.f32 %v1058_v23, %v489_v26  ;;  %v510_v14 = vld [vmem:[%s10057_s18 + $0x818] sm:$0xff]  ;;  %v527_v20 = vld [vmem:[%s10057_s18 + $0x8a0] sm:$0xff]  ;;  %v528_v21 = vld [vmem:[%s10057_s18 + $0x8a8] sm:$0xff] }
  0xda   : > { %v523_v23 = vld [vmem:[%s10057_s18 + $0x880] sm:$0xff]  ;;  %v522_v26 = vld [vmem:[%s10057_s18 + $0x878] sm:$0xff]  ;;  %v1108_v29 = vadd.f32 %v528_v21, %v527_v20 }
  0xdb   : > { %971 = vadd.xlane.f32.xlu1 %v970_v49  ;;  %v1023_v49 = vadd.f32 %v460_v40, %v459_v39  ;;  %v1015_v60 = vadd.f32 %v1014_v47, %v454_v44  ;;  %v497_v40 = vld [vmem:[%s10057_s18 + $0x7b0] sm:$0xff]  ;;  %v1060_v47 = vadd.f32 %v1059_v35, %v490_v34  ;;  %v518_v28 = vld [vmem:[%s10057_s18 + $0x858] sm:$0xff]  ;;  %v535_v34 = vld [vmem:[%s10057_s18 + $0x8e0] sm:$0xff] }
  0xdc   : > { %966 = vadd.xlane.f32.xlu0 %v965_v54  ;;  %v468_v54 = vld [vmem:[%s10057_s18 + $0x6c8] sm:$0xff]  ;;  %v493_v44 = vld [vmem:[%s10057_s18 + $0x790] sm:$0xff]  ;;  %v526_v42 = vld [vmem:[%s10057_s18 + $0x898] sm:$0xff] }
  0xdd   : > { %v1024_v61 = vadd.f32 %v1023_v49, %v461_v52  ;;  %v1069_v49 = vadd.f32 %v1068_v37, %v497_v40  ;;  %v536_v35 = vld [vmem:[%s10057_s18 + $0x8e8] sm:$0xff]  ;;  %v531_v37 = vld [vmem:[%s10057_s18 + $0x8c0] sm:$0xff]  ;;  %v530_v40 = vld [vmem:[%s10057_s18 + $0x8b8] sm:$0xff] }
  0xde   : > { %v1118_v43 = vadd.f32 %v536_v35, %v535_v34  ;;  %v534_v56 = vld [vmem:[%s10057_s18 + $0x8d8] sm:$0xff] }
  0xdf   : > { %981 = vadd.xlane.f32.xlu1 %v980_v63  ;;  %v1033_v63 = vadd.f32 %v468_v54, %v467_v53  ;;  %v1025_v10 = vadd.f32 %v1024_v61, %v462_v58  ;;  %v505_v54 = vld [vmem:[%s10057_s18 + $0x7f0] sm:$0xff]  ;;  %v1070_v61 = vadd.f32 %v1069_v49, %v498_v48  ;;  %v543_v48 = vld [vmem:[%s10057_s18 + $0x920] sm:$0xff]  ;;  %v544_v49 = vld [vmem:[%s10057_s18 + $0x928] sm:$0xff] }
  0xe0   : > { %976 = vadd.xlane.f32.xlu0 %v975_v4  ;;  %v476_v4 = vld [vmem:[%s10057_s18 + $0x708] sm:$0xff]  ;;  %v501_v58 = vld [vmem:[%s10057_s18 + $0x7d0] sm:$0xff]  ;;  %v1128_v57 = vadd.f32 %v544_v49, %v543_v48  ;;  %v542_v6 = vld [vmem:[%s10057_s18 + $0x918] sm:$0xff] }
  0xe1   : > { %v1034_v11 = vadd.f32 %v1033_v63, %v469_v2  ;;  %v1079_v63 = vadd.f32 %v1078_v51, %v505_v54  ;;  %v539_v51 = vld [vmem:[%s10057_s18 + $0x900] sm:$0xff]  ;;  %v538_v54 = vld [vmem:[%s10057_s18 + $0x8f8] sm:$0xff]  ;;  %v572_v49 = vld [vmem:[%s10057_s18 + $0xa08] sm:$0xff] }
  0xe2   : > { %v550_v20 = vld [vmem:[%s10057_s18 + $0x958] sm:$0xff]  ;;  %v571_v48 = vld [vmem:[%s10057_s18 + $0xa00] sm:$0xff] }
  0xe3   : > { %991 = vadd.xlane.f32.xlu1 %v990_v13  ;;  %v1043_v13 = vadd.f32 %v476_v4, %v475_v3  ;;  %v1035_v24 = vadd.f32 %v1034_v11, %v470_v8  ;;  %v513_v4 = vld [vmem:[%s10057_s18 + $0x830] sm:$0xff]  ;;  %v1080_v11 = vadd.f32 %v1079_v63, %v506_v62  ;;  %v551_v62 = vld [vmem:[%s10057_s18 + $0x960] sm:$0xff]  ;;  %v552_v63 = vld [vmem:[%s10057_s18 + $0x968] sm:$0xff] }
  0xe4   : > { %986 = vadd.xlane.f32.xlu0 %v985_v18  ;;  %v484_v18 = vld [vmem:[%s10057_s18 + $0x748] sm:$0xff]  ;;  %v509_v8 = vld [vmem:[%s10057_s18 + $0x810] sm:$0xff]  ;;  %v1138_v7 = vadd.f32 %v552_v63, %v551_v62  ;;  %v562_v35 = vld [vmem:[%s10057_s18 + $0x9b8] sm:$0xff] }
  0xe5   : > { %v1044_v25 = vadd.f32 %v1043_v13, %v477_v16  ;;  %v1089_v13 = vadd.f32 %v1088_v1, %v513_v4  ;;  %v547_v1 = vld [vmem:[%s10057_s18 + $0x940] sm:$0xff]  ;;  %v546_v4 = vld [vmem:[%s10057_s18 + $0x938] sm:$0xff]  ;;  %v573_v63 = vld [vmem:[%s10057_s18 + $0xa10] sm:$0xff] }
  0xe7   : > { %1001 = vadd.xlane.f32.xlu1 %v1000_v27  ;;  %v1053_v27 = vadd.f32 %v484_v18, %v483_v17  ;;  %v1045_v38 = vadd.f32 %v1044_v25, %v478_v22  ;;  %v521_v18 = vld [vmem:[%s10057_s18 + $0x870] sm:$0xff]  ;;  %v1090_v25 = vadd.f32 %v1089_v13, %v514_v12  ;;  %v559_v12 = vld [vmem:[%s10057_s18 + $0x9a0] sm:$0xff]  ;;  %v560_v13 = vld [vmem:[%s10057_s18 + $0x9a8] sm:$0xff] }
  0xe8   : > { %996 = vadd.xlane.f32.xlu0 %v995_v32  ;;  %v492_v32 = vld [vmem:[%s10057_s18 + $0x788] sm:$0xff]  ;;  %v517_v22 = vld [vmem:[%s10057_s18 + $0x850] sm:$0xff]  ;;  %v1148_v21 = vadd.f32 %v560_v13, %v559_v12  ;;  %v591_v12 = vld [vmem:[%s10057_s18 + $0xaa0] sm:$0xff] }
  0xe9   : > { %v1054_v39 = vadd.f32 %v1053_v27, %v485_v30  ;;  %v1099_v27 = vadd.f32 %v1098_v15, %v521_v18  ;;  %v555_v15 = vld [vmem:[%s10057_s18 + $0x980] sm:$0xff]  ;;  %v554_v18 = vld [vmem:[%s10057_s18 + $0x978] sm:$0xff]  ;;  %v592_v13 = vld [vmem:[%s10057_s18 + $0xaa8] sm:$0xff] }
  0xeb   : > { %1011 = vadd.xlane.f32.xlu1 %v1010_v41  ;;  %v1063_v41 = vadd.f32 %v492_v32, %v491_v31  ;;  %v1055_v52 = vadd.f32 %v1054_v39, %v486_v36  ;;  %v529_v32 = vld [vmem:[%s10057_s18 + $0x8b0] sm:$0xff]  ;;  %v1100_v39 = vadd.f32 %v1099_v27, %v522_v26  ;;  %v567_v27 = vld [vmem:[%s10057_s18 + $0x9e0] sm:$0xff] }
  0xec   : > { %1006 = vadd.xlane.f32.xlu0 %v1005_v46  ;;  %v500_v46 = vld [vmem:[%s10057_s18 + $0x7c8] sm:$0xff]  ;;  %v525_v36 = vld [vmem:[%s10057_s18 + $0x890] sm:$0xff] }
  0xed   : > { %v1064_v53 = vadd.f32 %v1063_v41, %v493_v44  ;;  %v1109_v41 = vadd.f32 %v1108_v29, %v529_v32  ;;  %v9849_v29 = vmov 0   ;;  %v563_v32 = vld [vmem:[%s10057_s18 + $0x9c0] sm:$0xff] }
  0xee   : > { %9597 = vset.pattern.permute.xlu1 %v9849_v29  ;;  %9596 = vset.pattern.permute.xlu0 %v9849_v29  ;;  %v599_v29 = vld [vmem:[%s10057_s18 + $0xae0] sm:$0xff] }
  0xef   : > { %1021 = vadd.xlane.f32.xlu1 %v1020_v55  ;;  %v1073_v55 = vadd.f32 %v500_v46, %v499_v45  ;;  %v1065_v2 = vadd.f32 %v1064_v53, %v494_v50  ;;  %v537_v46 = vld [vmem:[%s10057_s18 + $0x8f0] sm:$0xff]  ;;  %v1110_v53 = vadd.f32 %v1109_v41, %v530_v40 }
  0xf0   : > { %1016 = vadd.xlane.f32.xlu0 %v1015_v60  ;;  %v508_v60 = vld [vmem:[%s10057_s18 + $0x808] sm:$0xff]  ;;  %v533_v50 = vld [vmem:[%s10057_s18 + $0x8d0] sm:$0xff] }
  0xf1   : > { %v1074_v3 = vadd.f32 %v1073_v55, %v501_v58  ;;  %v1119_v55 = vadd.f32 %v1118_v43, %v537_v46 }
  0xf3   : > { %1031 = vadd.xlane.f32.xlu1 %v1030_v5  ;;  %v1083_v5 = vadd.f32 %v508_v60, %v507_v59  ;;  %v1075_v16 = vadd.f32 %v1074_v3, %v502_v0  ;;  %v545_v60 = vld [vmem:[%s10057_s18 + $0x930] sm:$0xff]  ;;  %v1120_v3 = vadd.f32 %v1119_v55, %v538_v54 }
  0xf4   : > { %1026 = vadd.xlane.f32.xlu0 %v1025_v10  ;;  %v516_v10 = vld [vmem:[%s10057_s18 + $0x848] sm:$0xff]  ;;  %v541_v0 = vld [vmem:[%s10057_s18 + $0x910] sm:$0xff] }
  0xf5   : > { %v1084_v17 = vadd.f32 %v1083_v5, %v509_v8  ;;  %v1129_v5 = vadd.f32 %v1128_v57, %v545_v60  ;;  %v583_v60 = vld [vmem:[%s10057_s18 + $0xa60] sm:$0xff] }
  0xf7   : > { %1041 = vadd.xlane.f32.xlu1 %v1040_v19  ;;  %v1093_v19 = vadd.f32 %v516_v10, %v515_v9  ;;  %v1085_v30 = vadd.f32 %v1084_v17, %v510_v14  ;;  %v553_v10 = vld [vmem:[%s10057_s18 + $0x970] sm:$0xff]  ;;  %v1130_v17 = vadd.f32 %v1129_v5, %v546_v4  ;;  %v574_v5 = vld [vmem:[%s10057_s18 + $0xa18] sm:$0xff] }
  0xf8   : > { %1036 = vadd.xlane.f32.xlu0 %v1035_v24  ;;  %v524_v24 = vld [vmem:[%s10057_s18 + $0x888] sm:$0xff]  ;;  %v549_v14 = vld [vmem:[%s10057_s18 + $0x950] sm:$0xff] }
  0xf9   : > { %v1094_v31 = vadd.f32 %v1093_v19, %v517_v22  ;;  %v1139_v19 = vadd.f32 %v1138_v7, %v553_v10  ;;  %v585_v10 = vld [vmem:[%s10057_s18 + $0xa70] sm:$0xff] }
  0xfb   : > { %1051 = vadd.xlane.f32.xlu1 %v1050_v33  ;;  %v1103_v33 = vadd.f32 %v524_v24, %v523_v23  ;;  %v1095_v44 = vadd.f32 %v1094_v31, %v518_v28  ;;  %v568_v28 = vld [vmem:[%s10057_s18 + $0x9e8] sm:$0xff]  ;;  %v557_v31 = vld [vmem:[%s10057_s18 + $0x990] sm:$0xff]  ;;  %v1140_v34 = vadd.f32 %v1139_v19, %v554_v18  ;;  %v586_v19 = vld [vmem:[%s10057_s18 + $0xa78] sm:$0xff] }
  0xfc   : > { %1046 = vadd.xlane.f32.xlu0 %v1045_v38  ;;  %v532_v38 = vld [vmem:[%s10057_s18 + $0x8c8] sm:$0xff] }
  0xfd   : > { %v1104_v45 = vadd.f32 %v1103_v33, %v525_v36  ;;  %v564_v33 = vld [vmem:[%s10057_s18 + $0x9c8] sm:$0xff] }
  0xfe   : > { %v1153_v43 = vadd.f32 %v564_v33, %v563_v32  ;;  %v589_v33 = vld [vmem:[%s10057_s18 + $0xa90] sm:$0xff] }
  0xff   : > { %1061 = vadd.xlane.f32.xlu1 %v1060_v47  ;;  %v1113_v47 = vadd.f32 %v532_v38, %v531_v37  ;;  %v1105_v58 = vadd.f32 %v1104_v45, %v526_v42  ;;  %v558_v37 = vld [vmem:[%s10057_s18 + $0x998] sm:$0xff]  ;;  %v1158_v38 = vadd.f32 %v568_v28, %v567_v27  ;;  %v569_v42 = vld [vmem:[%s10057_s18 + $0x9f0] sm:$0xff]  ;;  %v576_v45 = vld [vmem:[%s10057_s18 + $0xa28] sm:$0xff] }
 0x100   : > { %1056 = vadd.xlane.f32.xlu0 %v1055_v52  ;;  %v540_v52 = vld [vmem:[%s10057_s18 + $0x908] sm:$0xff]  ;;  %v593_v27 = vld [vmem:[%s10057_s18 + $0xab0] sm:$0xff] }
 0x101   : > { %v1114_v59 = vadd.f32 %v1113_v47, %v533_v50  ;;  %v565_v47 = vld [vmem:[%s10057_s18 + $0x9d0] sm:$0xff] }
 0x102   : > { %v1154_v57 = vadd.f32 %v1153_v43, %v565_v47 }
 0x103   : > { %1071 = vadd.xlane.f32.xlu1 %v1070_v61  ;;  %v1123_v61 = vadd.f32 %v540_v52, %v539_v51  ;;  %v1115_v8 = vadd.f32 %v1114_v59, %v534_v56  ;;  %v570_v51 = vld [vmem:[%s10057_s18 + $0x9f8] sm:$0xff]  ;;  %v1159_v52 = vadd.f32 %v1158_v38, %v569_v42  ;;  %v1163_v59 = vadd.f32 %v572_v49, %v571_v48  ;;  %v607_v48 = vld [vmem:[%s10057_s18 + $0xb20] sm:$0xff]  ;;  %v608_v49 = vld [vmem:[%s10057_s18 + $0xb28] sm:$0xff] }
 0x104   : > { %1066 = vadd.xlane.f32.xlu0 %v1065_v2  ;;  %v548_v2 = vld [vmem:[%s10057_s18 + $0x948] sm:$0xff] }
 0x105   : > { %v1124_v9 = vadd.f32 %v1123_v61, %v541_v0  ;;  %v584_v61 = vld [vmem:[%s10057_s18 + $0xa68] sm:$0xff]  ;;  %v579_v0 = vld [vmem:[%s10057_s18 + $0xa40] sm:$0xff] }
 0x107   : > { %1081 = vadd.xlane.f32.xlu1 %v1080_v11  ;;  %v1133_v11 = vadd.f32 %v548_v2, %v547_v1  ;;  %v1125_v23 = vadd.f32 %v1124_v9, %v542_v6  ;;  %v580_v1 = vld [vmem:[%s10057_s18 + $0xa48] sm:$0xff]  ;;  %v1160_v2 = vadd.f32 %v1159_v52, %v570_v51  ;;  %v1178_v6 = vadd.f32 %v584_v61, %v583_v60  ;;  %v597_v51 = vld [vmem:[%s10057_s18 + $0xad0] sm:$0xff]  ;;  %v603_v52 = vld [vmem:[%s10057_s18 + $0xb00] sm:$0xff] }
 0x108   : > { %1076 = vadd.xlane.f32.xlu0 %v1075_v16  ;;  %v556_v16 = vld [vmem:[%s10057_s18 + $0x988] sm:$0xff]  ;;  %v1164_v9 = vadd.f32 %v1163_v59, %v573_v63  ;;  %v13521_v59 = vlaneseq  ;;  %v1208_v63 = vadd.f32 %v608_v49, %v607_v48  ;;  %v614_v48 = vld [vmem:[%s10057_s18 + $0xb58] sm:$0xff]  ;;  %v625_v49 = vld [vmem:[%s10057_s18 + $0xbb0] sm:$0xff] }
 0x109   : > { %v1134_v24 = vadd.f32 %v1133_v11, %v549_v14  ;;  %v1143_v26 = vadd.f32 %v556_v16, %v555_v15  ;;  %v1173_v11 = vadd.f32 %v580_v1, %v579_v0  ;;  %v581_v15 = vld [vmem:[%s10057_s18 + $0xa50] sm:$0xff]  ;;  %v587_v16 = vld [vmem:[%s10057_s18 + $0xa80] sm:$0xff]  ;;  %v612_v1 = vld [vmem:[%s10057_s18 + $0xb48] sm:$0xff] }
 0x10a   : > { %v611_v0 = vld [vmem:[%s10057_s18 + $0xb40] sm:$0xff] }
 0x10b   : > { %1091 = vadd.xlane.f32.xlu1 %v1090_v25  ;;  %v561_v25 = vld [vmem:[%s10057_s18 + $0x9b0] sm:$0xff]  ;;  %v1135_v40 = vadd.f32 %v1134_v24, %v550_v20  ;;  %v1144_v41 = vadd.f32 %v1143_v26, %v557_v31  ;;  %v1179_v20 = vadd.f32 %v1178_v6, %v585_v10  ;;  %v1174_v26 = vadd.f32 %v1173_v11, %v581_v15  ;;  %v600_v31 = vld [vmem:[%s10057_s18 + $0xae8] sm:$0xff]  ;;  %v602_v6 = vld [vmem:[%s10057_s18 + $0xaf8] sm:$0xff] }
 0x10c   : > { %1086 = vadd.xlane.f32.xlu0 %v1085_v30  ;;  %v1149_v36 = vadd.f32 %v1148_v21, %v561_v25  ;;  %v582_v21 = vld [vmem:[%s10057_s18 + $0xa58] sm:$0xff]  ;;  %v1165_v25 = vadd.f32 %v1164_v9, %v574_v5  ;;  %v609_v9 = vld [vmem:[%s10057_s18 + $0xb30] sm:$0xff]  ;;  %v9852_v11 = vmov 1414812756  }
 0x10d   : > { %v1145_v56 = vadd.f32 %v1144_v41, %v558_v37  ;;  %v594_v37 = vld [vmem:[%s10057_s18 + $0xab8] sm:$0xff]  ;;  %v1198_v41 = vadd.f32 %v600_v31, %v599_v29  ;;  %v1175_v43 = vadd.f32 %v1174_v26, %v582_v21  ;;  %v623_v21 = vld [vmem:[%s10057_s18 + $0xba0] sm:$0xff]  ;;  %v1209_v26 = vadd.f32 %v1208_v63, %v609_v9  ;;  %v620_v29 = vld [vmem:[%s10057_s18 + $0xb88] sm:$0xff] }
 0x10e   : > { %v1150_v50 = vadd.f32 %v1149_v36, %v562_v35  ;;  %v596_v35 = vld [vmem:[%s10057_s18 + $0xac8] sm:$0xff]  ;;  %v1180_v36 = vadd.f32 %v1179_v20, %v586_v19  ;;  %v598_v15 = vld [vmem:[%s10057_s18 + $0xad8] sm:$0xff]  ;;  %v613_v19 = vld [vmem:[%s10057_s18 + $0xb50] sm:$0xff]  ;;  %v1213_v20 = vadd.f32 %v612_v1, %v611_v0  ;;  %v10471_v31 = vshrl.u32 %v13521_v59, 7 }
 0x10f   : > { %1101 = vadd.xlane.f32.xlu1 %v1100_v39  ;;  %v628_v63 = vld [vmem:[%s10057_s18 + $0xbc8] sm:$0xff]  ;;  %v639_v0 = vld [vmem:[%s10057_s18 + $0xc20] sm:$0xff]  ;;  %v649_v59 = vld [vmem:[%s10057_s18 + $0xc70] sm:$0xff] }
 0x110   : > { %1096 = vadd.xlane.f32.xlu0 %v1095_v44  ;;  %v575_v44 = vld [vmem:[%s10057_s18 + $0xa20] sm:$0xff]  ;;  %13611 = vst [vmem:[#allocation21_spill] sm:$0xff] %v10471_v31  ;;  %v640_v1 = vld [vmem:[%s10057_s18 + $0xc28] sm:$0xff] }
 0x111   : > { %v1168_v54 = vadd.f32 %v576_v45, %v575_v44  ;;  %v601_v45 = vld [vmem:[%s10057_s18 + $0xaf0] sm:$0xff]  ;;  %v643_v9 = vld [vmem:[%s10057_s18 + $0xc40] sm:$0xff] }
 0x112   : > { %v1199_v61 = vadd.f32 %v1198_v41, %v601_v45 }
 0x113   : > { %1111 = vadd.xlane.f32.xlu1 %v1110_v53  ;;  %v566_v53 = vld [vmem:[%s10057_s18 + $0x9d8] sm:$0xff] }
 0x114   : > { %1106 = vadd.xlane.f32.xlu0 %v1105_v58  ;;  %v577_v58 = vld [vmem:[%s10057_s18 + $0xa30] sm:$0xff] }
 0x115   : > { %v1169_v4 = vadd.f32 %v1168_v54, %v577_v58  ;;  %v9850_v54 = vmov 269488144   ;;  %v616_v58 = vld [vmem:[%s10057_s18 + $0xb68] sm:$0xff] }
 0x117   : > { %1121 = vadd.xlane.f32.xlu1 %v1120_v3  ;;  %v578_v3 = vld [vmem:[%s10057_s18 + $0xa38] sm:$0xff] }
 0x118   : > { %1116 = vadd.xlane.f32.xlu0 %v1115_v8  ;;  %v10377_v22 = vpop.xlane.xlu1 %776  ;;  %v1155_v8 = vadd.f32 %v1154_v57, %v566_v53  ;;  %v1170_v18 = vadd.f32 %v1169_v4, %v578_v3  ;;  %v604_v53 = vld [vmem:[%s10057_s18 + $0xb08] sm:$0xff]  ;;  %v615_v57 = vld [vmem:[%s10057_s18 + $0xb60] sm:$0xff] }
 0x119   : > { %v10382_v30 = vpop.xlane.xlu0 %766  ;;  %v1203_v10 = vadd.f32 %v604_v53, %v603_v52  ;;  %v631_v52 = vld [vmem:[%s10057_s18 + $0xbe0] sm:$0xff]  ;;  %v632_v53 = vld [vmem:[%s10057_s18 + $0xbe8] sm:$0xff] }
 0x11b   : > { %1131 = vadd.xlane.f32.xlu1 %v1130_v17  ;;  %v588_v17 = vld [vmem:[%s10057_s18 + $0xa88] sm:$0xff] }
 0x11c   : > { %1126 = vadd.xlane.f32.xlu0 %v1125_v23  ;;  %v10389_v39 = vpop.xlane.xlu1 %781  ;;  %v1188_v23 = vadd.f32 %v592_v13, %v591_v12  ;;  %v1183_v28 = vadd.f32 %v588_v17, %v587_v16  ;;  %v1546_v12 = vunpack.c.l.s4 %v9852_v11  ;;  %v605_v16 = vld [vmem:[%s10057_s18 + $0xb10] sm:$0xff]  ;;  %v1218_v17 = vadd.f32 %v616_v58, %v615_v57  ;;  %v655_v11 = vld [vmem:[%s10057_s18 + $0xca0] sm:$0xff] }
 0x11d   : > { %v10394_v46 = vpop.xlane.xlu0 %771  ;;  %v1214_v57 = vadd.f32 %v1213_v20, %v613_v19  ;;  %v651_v19 = vld [vmem:[%s10057_s18 + $0xc80] sm:$0xff]  ;;  %v652_v20 = vld [vmem:[%s10057_s18 + $0xc88] sm:$0xff] }
 0x11e   : > { %v1189_v38 = vadd.f32 %v1188_v23, %v593_v27  ;;  %v1184_v44 = vadd.f32 %v1183_v28, %v589_v33  ;;  %v624_v27 = vld [vmem:[%s10057_s18 + $0xba8] sm:$0xff]  ;;  %v619_v28 = vld [vmem:[%s10057_s18 + $0xb80] sm:$0xff]  ;;  %v1547_v41 = vunpack.c.0.s8 %v1546_v12 }
 0x11f   : > { %1141 = vadd.xlane.f32.xlu1 %v1140_v34  ;;  %v595_v34 = vld [vmem:[%s10057_s18 + $0xac0] sm:$0xff]  ;;  %v1228_v58 = vadd.f32 %v624_v27, %v623_v21  ;;  %v626_v27 = vld [vmem:[%s10057_s18 + $0xbb8] sm:$0xff] }
 0x120   : > { %1136 = vadd.xlane.f32.xlu0 %v1135_v40  ;;  %v10401_v55 = vpop.xlane.xlu1 %791  ;;  %v590_v40 = vld [vmem:[%s10057_s18 + $0xa98] sm:$0xff]  ;;  %v1193_v47 = vadd.f32 %v596_v35, %v595_v34  ;;  %v1190_v60 = vadd.f32 %v1189_v38, %v594_v37  ;;  %v1204_v38 = vadd.f32 %v1203_v10, %v605_v16  ;;  %v644_v10 = vld [vmem:[%s10057_s18 + $0xc48] sm:$0xff]  ;;  %v10513_v21 = vsub.s32 %v1547_v41, %v10471_v31 }
 0x121   : > { %v10406_v62 = vpop.xlane.xlu0 %786  ;;  %v1185_v5 = vadd.f32 %v1184_v44, %v590_v40  ;;  %v606_v37 = vld [vmem:[%s10057_s18 + $0xb18] sm:$0xff]  ;;  %v1229_v41 = vadd.f32 %v1228_v58, %v625_v49  ;;  %v668_v58 = vld [vmem:[%s10057_s18 + $0xd08] sm:$0xff] }
 0x122   : > { %v618_v40 = vld [vmem:[%s10057_s18 + $0xb78] sm:$0xff] }
 0x123   : > { %1151 = vadd.xlane.f32.xlu1 %v1150_v50 }
 0x124   : > { %1146 = vadd.xlane.f32.xlu0 %v1145_v56  ;;  %v10413_v7 = vpop.xlane.xlu1 %801  ;;  %v10447_v56 = vunpack.c.l.s4 %v9850_v54  ;;  %v9854_v54 = vmov 1983009808  }
 0x125   : > { %v10418_v14 = vpop.xlane.xlu0 %796 }
 0x126   : > { %v1533_v23 = vunpack.c.0.s8 %v10447_v56  ;;  %v10488_v56 = vunpack.c.l.s4 %v9854_v54  ;;  %v637_v54 = vld [vmem:[%s10057_s18 + $0xc10] sm:$0xff] }
 0x127   : > { %1161 = vadd.xlane.f32.xlu1 %v1160_v2  ;;  %v9851_v2 = vmov 842150450  }
 0x128   : > { %1156 = vadd.xlane.f32.xlu0 %v1155_v8  ;;  %v10425_v24 = vpop.xlane.xlu1 %811  ;;  %v10453_v3 = vunpack.c.l.s4 %v9851_v2  ;;  %v1194_v8 = vadd.f32 %v1193_v47, %v597_v51  ;;  %v621_v51 = vld [vmem:[%s10057_s18 + $0xb90] sm:$0xff]  ;;  %v635_v2 = vld [vmem:[%s10057_s18 + $0xc00] sm:$0xff]  ;;  %v10502_v12 = vsub.s32 %v1533_v23, %v10471_v31 }
 0x129   : > { %v10430_v32 = vpop.xlane.xlu0 %806 }
 0x12a   : > { %13606 = vst [vmem:[#allocation16_spill] sm:$0xff] %v10430_v32  ;;  %v1540_v33 = vunpack.c.0.s8 %v10453_v3  ;;  %v1195_v35 = vadd.f32 %v1194_v8, %v598_v15  ;;  %v636_v3 = vld [vmem:[%s10057_s18 + $0xc08] sm:$0xff]  ;;  %v689_v32 = vld [vmem:[%s10057_s18 + $0xdb0] sm:$0xff] }
 0x12b   : > { %1171 = vadd.xlane.f32.xlu1 %v1170_v18  ;;  %v617_v18 = vld [vmem:[%s10057_s18 + $0xb70] sm:$0xff]  ;;  %v1243_v49 = vadd.f32 %v636_v3, %v635_v2 }
 0x12c   : > { %1166 = vadd.xlane.f32.xlu0 %v1165_v25  ;;  %v10437_v42 = vpop.xlane.xlu1 %821  ;;  %v1200_v25 = vadd.f32 %v1199_v61, %v602_v6  ;;  %v1219_v47 = vadd.f32 %v1218_v17, %v617_v18  ;;  %v627_v61 = vld [vmem:[%s10057_s18 + $0xbc0] sm:$0xff]  ;;  %v648_v6 = vld [vmem:[%s10057_s18 + $0xc68] sm:$0xff]  ;;  %v10505_v15 = vsub.s32 %v1540_v33, %v10471_v31  ;;  %v1205_v17 = vadd.f32 %v1204_v38, %v606_v37  ;;  %v673_v2 = vld [vmem:[%s10057_s18 + $0xd30] sm:$0xff] }
 0x12d   : > { %13607 = vst [vmem:[#allocation17_spill] sm:$0xff] %v10437_v42  ;;  %v10442_v50 = vpop.xlane.xlu0 %816  ;;  %v656_v18 = vld [vmem:[%s10057_s18 + $0xca8] sm:$0xff]  ;;  %v663_v33 = vld [vmem:[%s10057_s18 + $0xce0] sm:$0xff]  ;;  %v5119_v37 = vunpack.c.0.s8 %v10488_v56  ;;  %v1215_v38 = vadd.f32 %v1214_v57, %v614_v48  ;;  %v1248_v48 = vadd.f32 %v640_v1, %v639_v0  ;;  %v661_v1 = vld [vmem:[%s10057_s18 + $0xcd0] sm:$0xff] }
 0x12e   : > { %13608 = vst [vmem:[#allocation18_spill] sm:$0xff] %v10442_v50  ;;  %v667_v57 = vld [vmem:[%s10057_s18 + $0xd00] sm:$0xff]  ;;  %v677_v42 = vld [vmem:[%s10057_s18 + $0xd50] sm:$0xff] }
 0x12f   : > { %1181 = vadd.xlane.f32.xlu1 %v1180_v36  ;;  %v610_v36 = vld [vmem:[%s10057_s18 + $0xb38] sm:$0xff] }
 0x130   : > { %1176 = vadd.xlane.f32.xlu0 %v1175_v43  ;;  %v10455_v4 = vpop.xlane.xlu1 %831  ;;  %v9853_v43 = vmov 1987475062   ;;  %v1210_v8 = vadd.f32 %v1209_v26, %v610_v36  ;;  %v1220_v26 = vadd.f32 %v1219_v47, %v618_v40  ;;  %v659_v36 = vld [vmem:[%s10057_s18 + $0xcc0] sm:$0xff]  ;;  %v629_v40 = vld [vmem:[%s10057_s18 + $0xbd0] sm:$0xff] }
 0x131   : > { %13609 = vst [vmem:[#allocation19_spill] sm:$0xff] %v10455_v4  ;;  %v10459_v13 = vpop.xlane.xlu0 %826  ;;  %v10479_v44 = vunpack.c.l.s4 %v9853_v43  ;;  %v641_v47 = vld [vmem:[%s10057_s18 + $0xc30] sm:$0xff]  ;;  %v650_v4 = vld [vmem:[%s10057_s18 + $0xc78] sm:$0xff] }
 0x132   : > { %13610 = vst [vmem:[#allocation20_spill] sm:$0xff] %v10459_v13  ;;  %v1253_v13 = vadd.f32 %v644_v10, %v643_v9  ;;  %v669_v10 = vld [vmem:[%s10057_s18 + $0xd10] sm:$0xff] }
 0x133   : > { %1191 = vadd.xlane.f32.xlu1 %v1190_v60  ;;  %v1223_v60 = vadd.f32 %v620_v29, %v619_v28  ;;  %v1554_v23 = vunpack.c.0.s8 %v10479_v44  ;;  %v622_v28 = vld [vmem:[%s10057_s18 + $0xb98] sm:$0xff]  ;;  %v633_v29 = vld [vmem:[%s10057_s18 + $0xbf0] sm:$0xff]  ;;  %v1238_v44 = vadd.f32 %v632_v53, %v631_v52 }
 0x134   : > { %1186 = vadd.xlane.f32.xlu0 %v1185_v5  ;;  %v10474_v34 = vpop.xlane.xlu1 %841  ;;  %v647_v5 = vld [vmem:[%s10057_s18 + $0xc60] sm:$0xff]  ;;  %v657_v52 = vld [vmem:[%s10057_s18 + $0xcb0] sm:$0xff] }
 0x135   : > { %13612 = vst [vmem:[#allocation22_spill] sm:$0xff] %v10474_v34  ;;  %v10481_v45 = vpop.xlane.xlu0 %836  ;;  %v1224_v43 = vadd.f32 %v1223_v60, %v621_v51  ;;  %v1233_v34 = vadd.f32 %v628_v63, %v627_v61  ;;  %v1258_v56 = vadd.f32 %v648_v6, %v647_v5  ;;  %v645_v51 = vld [vmem:[%s10057_s18 + $0xc50] sm:$0xff]  ;;  %v1263_v61 = vadd.f32 %v652_v20, %v651_v19  ;;  %v634_v6 = vld [vmem:[%s10057_s18 + $0xbf8] sm:$0xff] }
 0x136   : > { %13613 = vst [vmem:[#allocation23_spill] sm:$0xff] %v10481_v45  ;;  %v672_v45 = vld [vmem:[%s10057_s18 + $0xd28] sm:$0xff]  ;;  %v653_v53 = vld [vmem:[%s10057_s18 + $0xc90] sm:$0xff]  ;;  %v10543_v3 = vsub.s32 %v1554_v23, %v10471_v31  ;;  %v10552_v19 = vsub.s32 %v5119_v37, %v10471_v31  ;;  %v1230_v20 = vadd.f32 %v1229_v41, %v626_v27  ;;  %v1239_v23 = vadd.f32 %v1238_v44, %v633_v29  ;;  %v646_v29 = vld [vmem:[%s10057_s18 + $0xc58] sm:$0xff] }
 0x137   : > { %1201 = vadd.xlane.f32.xlu1 %v1200_v25  ;;  %v665_v63 = vld [vmem:[%s10057_s18 + $0xcf0] sm:$0xff]  ;;  %v1234_v37 = vadd.f32 %v1233_v34, %v629_v40  ;;  %v1249_v27 = vadd.f32 %v1248_v48, %v641_v47  ;;  %v1244_v41 = vadd.f32 %v1243_v49, %v637_v54  ;;  %v683_v44 = vld [vmem:[%s10057_s18 + $0xd80] sm:$0xff]  ;;  %v684_v31 = vld [vmem:[%s10057_s18 + $0xd88] sm:$0xff]  ;;  %v1264_v34 = vadd.f32 %v1263_v61, %v653_v53 }
 0x138   : > { %1196 = vadd.xlane.f32.xlu0 %v1195_v35  ;;  %v10507_v16 = vpop.xlane.xlu1 %851  ;;  %v664_v35 = vld [vmem:[%s10057_s18 + $0xce8] sm:$0xff]  ;;  %13618 = vst [vmem:[#allocation28_spill] sm:$0xff] %v10552_v19  ;;  %v658_v19 = vld [vmem:[%s10057_s18 + $0xcb8] sm:$0xff]  ;;  %v1303_v61 = vadd.f32 %v684_v31, %v683_v44  ;;  %v1558_v44 = vrot.slane %v10382_v30, %v10543_v3 }
 0x139   : > { %13614 = vst [vmem:[#allocation24_spill] sm:$0xff] %v10507_v16  ;;  %v10516_v25 = vpop.xlane.xlu0 %846  ;;  %v671_v16 = vld [vmem:[%s10057_s18 + $0xd20] sm:$0xff]  ;;  %v1278_v0 = vadd.f32 %v664_v35, %v663_v33  ;;  %v1225_v33 = vadd.f32 %v1224_v43, %v622_v28  ;;  %v630_v35 = vld [vmem:[%s10057_s18 + $0xbd8] sm:$0xff]  ;;  %v1259_v28 = vadd.f32 %v1258_v56, %v649_v59  ;;  %v688_v43 = vld [vmem:[%s10057_s18 + $0xda8] sm:$0xff] }
 0x13a   : > { %13615 = vst [vmem:[#allocation25_spill] sm:$0xff] %v10516_v25  ;;  %v660_v25 = vld [vmem:[%s10057_s18 + $0xcc8] sm:$0xff]  ;;  %v1288_v9 = vadd.f32 %v672_v45, %v671_v16  ;;  %v675_v45 = vld [vmem:[%s10057_s18 + $0xd40] sm:$0xff]  ;;  %v666_v40 = vld [vmem:[%s10057_s18 + $0xcf8] sm:$0xff] }
 0x13b   : > { %1211 = vadd.xlane.f32.xlu1 %v1210_v8  ;;  %v1268_v8 = vadd.f32 %v656_v18, %v655_v11  ;;  %v679_v11 = vld [vmem:[%s10057_s18 + $0xd60] sm:$0xff]  ;;  %v680_v18 = vld [vmem:[%s10057_s18 + $0xd68] sm:$0xff]  ;;  %v1279_v47 = vadd.f32 %v1278_v0, %v665_v63  ;;  %v662_v54 = vld [vmem:[%s10057_s18 + $0xcd8] sm:$0xff]  ;;  %v1235_v63 = vadd.f32 %v1234_v37, %v630_v35  ;;  %v1607_v37 = vrot.slane %v10377_v22, %v10513_v21 }
 0x13c   : > { %1206 = vadd.xlane.f32.xlu0 %v1205_v17  ;;  %v10537_v60 = vpop.xlane.xlu1 %861  ;;  %v1273_v17 = vadd.f32 %v660_v25, %v659_v36  ;;  %v1283_v25 = vadd.f32 %v668_v58, %v667_v57  ;;  %v676_v16 = vld [vmem:[%s10057_s18 + $0xd48] sm:$0xff]  ;;  %v687_v36 = vld [vmem:[%s10057_s18 + $0xda0] sm:$0xff]  ;;  %v1254_v58 = vadd.f32 %v1253_v13, %v645_v51  ;;  %v674_v49 = vld [vmem:[%s10057_s18 + $0xd38] sm:$0xff]  ;;  %v1289_v56 = vadd.f32 %v1288_v9, %v673_v2 }
 0x13d   : > { %13616 = vst [vmem:[#allocation26_spill] sm:$0xff] %v10537_v60  ;;  %v10545_v5 = vpop.xlane.xlu0 %856  ;;  %v638_v60 = vld [vmem:[%s10057_s18 + $0xc18] sm:$0xff]  ;;  %v1269_v50 = vadd.f32 %v1268_v8, %v657_v52  ;;  %v1293_v13 = vadd.f32 %v676_v16, %v675_v45  ;;  %v1240_v51 = vadd.f32 %v1239_v23, %v634_v6  ;;  %v681_v8 = vld [vmem:[%s10057_s18 + $0xd70] sm:$0xff]  ;;  %v1308_v53 = vadd.f32 %v688_v43, %v687_v36  ;;  %v696_v9 = vld [vmem:[%s10057_s18 + $0xde8] sm:$0xff] }
 0x13e   : > { %13617 = vst [vmem:[#allocation27_spill] sm:$0xff] %v10545_v5  ;;  %v642_v5 = vld [vmem:[%s10057_s18 + $0xc38] sm:$0xff]  ;;  %v1274_v48 = vadd.f32 %v1273_v17, %v661_v1  ;;  %v1284_v52 = vadd.f32 %v1283_v25, %v669_v10  ;;  %v10578_v1 = vadd.f32 %v1259_v28, %v650_v4  ;;  %v685_v2 = vld [vmem:[%s10057_s18 + $0xd90] sm:$0xff]  ;;  %v695_v17 = vld [vmem:[%s10057_s18 + $0xde0] sm:$0xff]  ;;  %v10585_v6 = vadd.f32 %v1254_v58, %v646_v29 }
 0x13f   : > { %1221 = vadd.xlane.f32.xlu1 %v1220_v26  ;;  %v654_v26 = vld [vmem:[%s10057_s18 + $0xc98] sm:$0xff]  ;;  %v1250_v0 = vadd.f32 %v1249_v27, %v642_v5  ;;  %v10587_v10 = vadd.f32 %v1269_v50, %v658_v19  ;;  %v10591_v31 = vadd.f32 %v1279_v47, %v666_v40  ;;  %v1309_v19 = vadd.f32 %v1308_v53, %v689_v32  ;;  %v697_v27 = vld [vmem:[%s10057_s18 + $0xdf0] sm:$0xff]  ;;  %v692_v32 = vld [vmem:[%s10057_s18 + $0xdc8] sm:$0xff] }
 0x140   : > { %1216 = vadd.xlane.f32.xlu0 %v1215_v38  ;;  %v10565_v57 = vpop.xlane.xlu1 %871  ;;  %v670_v38 = vld [vmem:[%s10057_s18 + $0xd18] sm:$0xff]  ;;  %v10595_v4 = vadd.f32 %v1274_v48, %v662_v54  ;;  %v1304_v25 = vadd.f32 %v1303_v61, %v685_v2  ;;  %v1318_v45 = vadd.f32 %v696_v9, %v695_v17  ;;  %v1593_v16 = vrot.slane %v10377_v22, %v10502_v12  ;;  %v699_v2 = vld [vmem:[%s10057_s18 + $0xe00] sm:$0xff]  ;;  %v700_v17 = vld [vmem:[%s10057_s18 + $0xe08] sm:$0xff] }
 0x141   : > { %13619 = vst [vmem:[#allocation29_spill] sm:$0xff] %v10565_v57  ;;  %v10570_v59 = vpop.xlane.xlu0 %866  ;;  %v1298_v57 = vadd.f32 %v680_v18, %v679_v11  ;;  %v10589_v18 = vadd.f32 %v1264_v34, %v654_v26  ;;  %v10599_v23 = vadd.f32 %v1284_v52, %v670_v38  ;;  %v682_v35 = vld [vmem:[%s10057_s18 + $0xd78] sm:$0xff]  ;;  %v1600_v36 = vrot.slane %v10377_v22, %v10505_v15 }
 0x142   : > { %13620 = vst [vmem:[#allocation30_spill] sm:$0xff] %v10570_v59  ;;  %v1245_v59 = vadd.f32 %v1244_v41, %v638_v60  ;;  %v10597_v60 = vadd.f32 %v1289_v56, %v674_v49  ;;  %v678_v50 = vld [vmem:[%s10057_s18 + $0xd58] sm:$0xff]  ;;  %v691_v41 = vld [vmem:[%s10057_s18 + $0xdc0] sm:$0xff]  ;;  %v1537_v28 = vrot.slane %v10382_v30, %v10502_v12  ;;  %v1544_v29 = vrot.slane %v10382_v30, %v10505_v15 }
 0x143   : > { %1231 = vadd.xlane.f32.xlu1 %v1230_v20  ;;  %v1299_v20 = vadd.f32 %v1298_v57, %v681_v8  ;;  %v1551_v43 = vrot.slane %v10382_v30, %v10513_v21  ;;  %v690_v57 = vld [vmem:[%s10057_s18 + $0xdb8] sm:$0xff]  ;;  %v1621_v26 = vrot.slane %v10389_v39, %v10502_v12  ;;  %v1628_v34 = vrot.slane %v10389_v39, %v10505_v15 }
 0x144   : > { %1226 = vadd.xlane.f32.xlu0 %v1225_v33  ;;  %v10583_v11 = vpop.xlane.xlu1 %881  ;;  %v1294_v33 = vadd.f32 %v1293_v13, %v677_v42  ;;  %v1614_v42 = vrot.slane %v10377_v22, %v10543_v3  ;;  %v686_v58 = vld [vmem:[%s10057_s18 + $0xd98] sm:$0xff]  ;;  %v1635_v54 = vrot.slane %v10389_v39, %v10513_v21  ;;  %v1642_v48 = vrot.slane %v10389_v39, %v10543_v3  ;;  %v703_v13 = vld [vmem:[%s10057_s18 + $0xe20] sm:$0xff] }
 0x145   : > { %v10593_v5 = vpop.xlane.xlu0 %876  ;;  %v10632_v47 = vadd.f32 %v1299_v20, %v682_v35  ;;  %v698_v49 = vld [vmem:[%s10057_s18 + $0xdf8] sm:$0xff]  ;;  %v1319_v56 = vadd.f32 %v1318_v45, %v697_v27  ;;  %v1313_v38 = vadd.f32 %v692_v32, %v691_v41  ;;  %v10643_v52 = vcombine.low %v1593_v16, %v1600_v36 }
 0x146   : > { %v10634_v30 = vadd.f32 %v1294_v33, %v678_v50  ;;  %v10645_v8 = vcombine.low %v1607_v37, %v1614_v42  ;;  %v10647_v53 = vadd.f32 %v1309_v19, %v690_v57  ;;  %v10649_v61 = vadd.f32 %v1304_v25, %v686_v58  ;;  %v705_v37 = vld [vmem:[%s10057_s18 + $0xe30] sm:$0xff] }
 0x147   : > { %1241 = vadd.xlane.f32.xlu1 %v1240_v51  ;;  %v704_v51 = vld [vmem:[%s10057_s18 + $0xe28] sm:$0xff]  ;;  %v10654_v9 = vcombine.low %v1537_v28, %v1544_v29  ;;  %v10656_v39 = vcombine.low %v1551_v43, %v1558_v44  ;;  %v1565_v20 = vrot.slane %v10394_v46, %v10502_v12  ;;  %v1572_v33 = vrot.slane %v10394_v46, %v10505_v15  ;;  %v701_v28 = vld [vmem:[%s10057_s18 + $0xe10] sm:$0xff]  ;;  %v711_v29 = vld [vmem:[%s10057_s18 + $0xe60] sm:$0xff] }
 0x148   : > { %1236 = vadd.xlane.f32.xlu0 %v1235_v63  ;;  %v10622_v22 = vpop.xlane.xlu1 %891  ;;  %v693_v63 = vld [vmem:[%s10057_s18 + $0xdd0] sm:$0xff]  ;;  %v10664_v35 = vcombine.low %v1621_v26, %v1628_v34  ;;  %v1579_v50 = vrot.slane %v10394_v46, %v10513_v21  ;;  %v1586_v19 = vrot.slane %v10394_v46, %v10543_v3  ;;  %v1328_v45 = vadd.f32 %v704_v51, %v703_v13  ;;  %v712_v43 = vld [vmem:[%s10057_s18 + $0xe68] sm:$0xff]  ;;  %v707_v51 = vld [vmem:[%s10057_s18 + $0xe40] sm:$0xff] }
 0x149   : > { %v10630_v40 = vpop.xlane.xlu0 %886  ;;  %v10672_v16 = vcombine.low %v1635_v54, %v1642_v48  ;;  %v10674_v36 = vadd.f32 %v1319_v56, %v698_v49  ;;  %v1323_v42 = vadd.f32 %v700_v17, %v699_v2  ;;  %v1677_v27 = vrot.slane %v10401_v55, %v10502_v12 }
 0x14a   : > { %13621 = vst [vmem:[#allocation31_spill] sm:$0xff] %v10664_v35  ;;  %v1684_v41 = vrot.slane %v10401_v55, %v10505_v15  ;;  %v1691_v46 = vrot.slane %v10401_v55, %v10513_v21  ;;  %v1698_v32 = vrot.slane %v10401_v55, %v10543_v3  ;;  %v1649_v44 = vrot.slane %v10406_v62, %v10502_v12 }
 0x14b   : > { %1251 = vadd.xlane.f32.xlu1 %v1250_v0  ;;  %13622 = vst [vmem:[#allocation32_spill] sm:$0xff] %v10672_v16  ;;  %v1656_v57 = vrot.slane %v10406_v62, %v10505_v15  ;;  %v1663_v58 = vrot.slane %v10406_v62, %v10513_v21  ;;  %v1670_v26 = vrot.slane %v10406_v62, %v10543_v3  ;;  %v713_v16 = vld [vmem:[%s10057_s18 + $0xe70] sm:$0xff] }
 0x14c   : > { %1246 = vadd.xlane.f32.xlu0 %v1245_v59  ;;  %v10662_v0 = vpop.xlane.xlu1 %901  ;;  %v1314_v59 = vadd.f32 %v1313_v38, %v693_v63  ;;  %v10701_v34 = vcombine.low %v1565_v20, %v1572_v33  ;;  %v1733_v54 = vrot.slane %v10413_v7, %v10502_v12  ;;  %v1740_v48 = vrot.slane %v10413_v7, %v10505_v15  ;;  %v708_v63 = vld [vmem:[%s10057_s18 + $0xe48] sm:$0xff] }
 0x14d   : > { %v10670_v25 = vpop.xlane.xlu0 %896  ;;  %v1329_v56 = vadd.f32 %v1328_v45, %v705_v37  ;;  %v1747_v62 = vrot.slane %v10413_v7, %v10513_v21  ;;  %v1324_v38 = vadd.f32 %v1323_v42, %v701_v28  ;;  %v1338_v13 = vadd.f32 %v712_v43, %v711_v29  ;;  %v706_v45 = vld [vmem:[%s10057_s18 + $0xe38] sm:$0xff]  ;;  %v709_v43 = vld [vmem:[%s10057_s18 + $0xe50] sm:$0xff] }
 0x14e   : > { %v10715_v2 = vcombine.low %v1677_v27, %v1684_v41  ;;  %v10717_v17 = vcombine.low %v1691_v46, %v1698_v32  ;;  %v10719_v20 = vcombine.low %v1579_v50, %v1586_v19  ;;  %v702_v37 = vld [vmem:[%s10057_s18 + $0xe18] sm:$0xff]  ;;  %v10727_v35 = vcombine.low %v1649_v44, %v1656_v57  ;;  %v719_v44 = vld [vmem:[%s10057_s18 + $0xea0] sm:$0xff] }
 0x14f   : > { %1261 = vadd.xlane.f32.xlu1 %v10578_v1  ;;  %v694_v1 = vld [vmem:[%s10057_s18 + $0xdd8] sm:$0xff]  ;;  %v1705_v42 = vrot.slane %v10418_v14, %v10502_v12  ;;  %v1712_v50 = vrot.slane %v10418_v14, %v10505_v15  ;;  %v10738_v19 = vcombine.low %v1733_v54, %v1740_v48  ;;  %v1726_v27 = vrot.slane %v10418_v14, %v10543_v3  ;;  %v715_v54 = vld [vmem:[%s10057_s18 + $0xe80] sm:$0xff] }
 0x150   : > { %1256 = vadd.xlane.f32.xlu0 %v10585_v6  ;;  %v10698_v55 = vpop.xlane.xlu1 %911  ;;  %v1754_v6 = vrot.slane %v10413_v7, %v10543_v3  ;;  %13623 = vst [vmem:[#allocation33_spill] sm:$0xff] %v10715_v2  ;;  %13624 = vst [vmem:[#allocation34_spill] sm:$0xff] %v10717_v17  ;;  %v10722_v33 = vadd.f32 %v1314_v59, %v694_v1  ;;  %v10729_v7 = vcombine.low %v1663_v58, %v1670_v26  ;;  %v720_v1 = vld [vmem:[%s10057_s18 + $0xea8] sm:$0xff]  ;;  %v13629_v48 = vld [vmem:[#allocation16_spill] sm:$0xff] }
 0x151   : > { %v10707_v49 = vpop.xlane.xlu0 %906  ;;  %13625 = vst [vmem:[#allocation35_spill] sm:$0xff] %v10727_v35  ;;  %13627 = vst [vmem:[#allocation37_spill] sm:$0xff] %v10738_v19  ;;  %v1719_v59 = vrot.slane %v10418_v14, %v10513_v21  ;;  %v1333_v46 = vadd.f32 %v708_v63, %v707_v51  ;;  %v10748_v28 = vadd.f32 %v1329_v56, %v706_v45  ;;  %v13632_v51 = vld [vmem:[#allocation17_spill] sm:$0xff] }
 0x152   : > { %13626 = vst [vmem:[#allocation36_spill] sm:$0xff] %v10729_v7  ;;  %v10746_v32 = vcombine.low %v1747_v62, %v1754_v6  ;;  %v1339_v29 = vadd.f32 %v1338_v13, %v713_v16  ;;  %v1789_v57 = vrot.slane %v10425_v24, %v10502_v12  ;;  %v1796_v14 = vrot.slane %v10425_v24, %v10505_v15  ;;  %v716_v16 = vld [vmem:[%s10057_s18 + $0xe88] sm:$0xff]  ;;  %v727_v19 = vld [vmem:[%s10057_s18 + $0xee0] sm:$0xff] }
 0x153   : > { %1271 = vadd.xlane.f32.xlu1 %v10587_v10  ;;  %v1803_v58 = vrot.slane %v10425_v24, %v10513_v21  ;;  %v1810_v26 = vrot.slane %v10425_v24, %v10543_v3  ;;  %v1761_v56 = vrot.slane %v13629_v48, %v10502_v12  ;;  %v1768_v62 = vrot.slane %v13629_v48, %v10505_v15 }
 0x154   : > { %1266 = vadd.xlane.f32.xlu0 %v10589_v18  ;;  %v10736_v10 = vpop.xlane.xlu1 %921  ;;  %13628 = vst [vmem:[#allocation38_spill] sm:$0xff] %v10746_v32  ;;  %v10750_v18 = vadd.f32 %v1324_v38, %v702_v37  ;;  %v1775_v6 = vrot.slane %v13629_v48, %v10513_v21  ;;  %v1782_v38 = vrot.slane %v13629_v48, %v10543_v3 }
 0x155   : > { %v10744_v41 = vpop.xlane.xlu0 %916  ;;  %v10778_v13 = vcombine.low %v1705_v42, %v1712_v50  ;;  %v1845_v63 = vrot.slane %v13632_v51, %v10502_v12  ;;  %v1852_v45 = vrot.slane %v13632_v51, %v10505_v15  ;;  %v1334_v32 = vadd.f32 %v1333_v46, %v709_v43  ;;  %v710_v46 = vld [vmem:[%s10057_s18 + $0xe58] sm:$0xff]  ;;  %v721_v43 = vld [vmem:[%s10057_s18 + $0xeb0] sm:$0xff] }
 0x156   : > { %v1866_v48 = vrot.slane %v13632_v51, %v10543_v3  ;;  %v1348_v42 = vadd.f32 %v720_v1, %v719_v44  ;;  %v1343_v50 = vadd.f32 %v716_v16, %v715_v54  ;;  %v10792_v17 = vcombine.low %v1789_v57, %v1796_v14  ;;  %v13638_v57 = vld [vmem:[#allocation18_spill] sm:$0xff] }
 0x157   : > { %1281 = vadd.xlane.f32.xlu1 %v10591_v31  ;;  %v714_v31 = vld [vmem:[%s10057_s18 + $0xe78] sm:$0xff]  ;;  %13631 = vst [vmem:[#allocation39_spill] sm:$0xff] %v10778_v13  ;;  %v728_v13 = vld [vmem:[%s10057_s18 + $0xee8] sm:$0xff]  ;;  %v10794_v2 = vcombine.low %v1803_v58, %v1810_v26  ;;  %v10796_v7 = vcombine.low %v1719_v59, %v1726_v27  ;;  %v10806_v44 = vcombine.low %v1775_v6, %v1782_v38  ;;  %v723_v6 = vld [vmem:[%s10057_s18 + $0xec0] sm:$0xff] }
 0x158   : > { %1276 = vadd.xlane.f32.xlu0 %v10595_v4  ;;  %v10775_v24 = vpop.xlane.xlu1 %931  ;;  %v1859_v4 = vrot.slane %v13632_v51, %v10513_v21  ;;  %v10799_v35 = vadd.f32 %v1339_v29, %v714_v31  ;;  %v1817_v14 = vrot.slane %v13638_v57, %v10502_v12  ;;  %v1824_v59 = vrot.slane %v13638_v57, %v10505_v15  ;;  %v724_v38 = vld [vmem:[%s10057_s18 + $0xec8] sm:$0xff] }
 0x159   : > { %13630 = vst [vmem:[#allocation16_spill] sm:$0xff] %v10775_v24  ;;  %v10784_v37 = vpop.xlane.xlu0 %926  ;;  %13634 = vst [vmem:[#allocation40_spill] sm:$0xff] %v10794_v2  ;;  %v10804_v24 = vcombine.low %v1761_v56, %v1768_v62  ;;  %v10815_v27 = vcombine.low %v1845_v63, %v1852_v45  ;;  %v1831_v29 = vrot.slane %v13638_v57, %v10513_v21  ;;  %v729_v62 = vld [vmem:[%s10057_s18 + $0xef0] sm:$0xff] }
 0x15a   : > { %13633 = vst [vmem:[#allocation17_spill] sm:$0xff] %v10784_v37  ;;  %13635 = vst [vmem:[#allocation41_spill] sm:$0xff] %v10796_v7  ;;  %v717_v37 = vld [vmem:[%s10057_s18 + $0xe90] sm:$0xff]  ;;  %v1838_v58 = vrot.slane %v13638_v57, %v10543_v3  ;;  %v1358_v1 = vadd.f32 %v728_v13, %v727_v19  ;;  %v10823_v54 = vcombine.low %v1859_v4, %v1866_v48 }
 0x15b   : > { %1291 = vadd.xlane.f32.xlu1 %v10597_v60  ;;  %13636 = vst [vmem:[#allocation42_spill] sm:$0xff] %v10804_v24  ;;  %13637 = vst [vmem:[#allocation43_spill] sm:$0xff] %v10806_v44  ;;  %v10825_v16 = vadd.f32 %v1334_v32, %v710_v46  ;;  %v1349_v56 = vadd.f32 %v1348_v42, %v721_v43  ;;  %v13643_v31 = vld [vmem:[#allocation19_spill] sm:$0xff]  ;;  %v13644_v13 = vld [vmem:[#allocation20_spill] sm:$0xff]  ;;  %v10852_v46 = vcombine.low %v1817_v14, %v1824_v59 }
 0x15c   : > { %1286 = vadd.xlane.f32.xlu0 %v10599_v23  ;;  %v10813_v60 = vpop.xlane.xlu1 %941  ;;  %13640 = vst [vmem:[#allocation44_spill] sm:$0xff] %v10815_v27  ;;  %13642 = vst [vmem:[#allocation46_spill] sm:$0xff] %v10823_v54  ;;  %v1344_v23 = vadd.f32 %v1343_v50, %v717_v37  ;;  %v1901_v51 = vrot.slane %v13643_v31, %v10502_v12  ;;  %v1908_v63 = vrot.slane %v13643_v31, %v10505_v15  ;;  %v718_v50 = vld [vmem:[%s10057_s18 + $0xe98] sm:$0xff]  ;;  %v735_v24 = vld [vmem:[%s10057_s18 + $0xf20] sm:$0xff] }
 0x15d   : > { %13639 = vst [vmem:[#allocation18_spill] sm:$0xff] %v10813_v60  ;;  %v10821_v26 = vpop.xlane.xlu0 %936  ;;  %v1915_v19 = vrot.slane %v13643_v31, %v10513_v21  ;;  %v1922_v32 = vrot.slane %v13643_v31, %v10543_v3  ;;  %v1873_v45 = vrot.slane %v13644_v13, %v10502_v12  ;;  %v1880_v37 = vrot.slane %v13644_v13, %v10505_v15  ;;  %v736_v59 = vld [vmem:[%s10057_s18 + $0xf28] sm:$0xff] }
 0x15e   : > { %13641 = vst [vmem:[#allocation45_spill] sm:$0xff] %v10821_v26  ;;  %v1887_v4 = vrot.slane %v13644_v13, %v10513_v21  ;;  %v1894_v48 = vrot.slane %v13644_v13, %v10543_v3  ;;  %13646 = vst [vmem:[#allocation20_spill] sm:$0xff] %v10852_v46  ;;  %v10854_v43 = vcombine.low %v1831_v29, %v1838_v58  ;;  %v13649_v13 = vld [vmem:[#allocation22_spill] sm:$0xff]  ;;  %v725_v46 = vld [vmem:[%s10057_s18 + $0xed0] sm:$0xff] }
 0x15f   : > { %1301 = vadd.xlane.f32.xlu1 %v10632_v47  ;;  %v722_v47 = vld [vmem:[%s10057_s18 + $0xeb8] sm:$0xff]  ;;  %v1359_v31 = vadd.f32 %v1358_v1, %v729_v62  ;;  %v1353_v44 = vadd.f32 %v724_v38, %v723_v6  ;;  %v1957_v7 = vrot.slane %v13649_v13, %v10502_v12  ;;  %v1971_v54 = vrot.slane %v13649_v13, %v10513_v21  ;;  %v731_v29 = vld [vmem:[%s10057_s18 + $0xf00] sm:$0xff]  ;;  %v732_v58 = vld [vmem:[%s10057_s18 + $0xf08] sm:$0xff] }
 0x160   : > { %1296 = vadd.xlane.f32.xlu0 %v10634_v30  ;;  %v10848_v42 = vpop.xlane.xlu1 %951  ;;  %13647 = vst [vmem:[#allocation47_spill] sm:$0xff] %v10854_v43  ;;  %v1964_v30 = vrot.slane %v13649_v13, %v10505_v15  ;;  %v1978_v14 = vrot.slane %v13649_v13, %v10543_v3  ;;  %v10870_v43 = vcombine.low %v1901_v51, %v1908_v63  ;;  %v730_v38 = vld [vmem:[%s10057_s18 + $0xef8] sm:$0xff] }
 0x161   : > { %13645 = vst [vmem:[#allocation19_spill] sm:$0xff] %v10848_v42  ;;  %v10856_v57 = vpop.xlane.xlu0 %946  ;;  %v10872_v1 = vcombine.low %v1915_v19, %v1922_v32  ;;  %v10875_v62 = vadd.f32 %v1349_v56, %v722_v47  ;;  %v10877_v6 = vadd.f32 %v1344_v23, %v718_v50  ;;  %v10881_v27 = vcombine.low %v1873_v45, %v1880_v37  ;;  %v737_v47 = vld [vmem:[%s10057_s18 + $0xf30] sm:$0xff]  ;;  %v740_v42 = vld [vmem:[%s10057_s18 + $0xf48] sm:$0xff] }
 0x162   : > { %13648 = vst [vmem:[#allocation48_spill] sm:$0xff] %v10856_v57  ;;  %13650 = vst [vmem:[#allocation22_spill] sm:$0xff] %v10870_v43  ;;  %v10883_v13 = vcombine.low %v1887_v4, %v1894_v48  ;;  %v13654_v57 = vld [vmem:[#allocation23_spill] sm:$0xff]  ;;  %v1368_v32 = vadd.f32 %v736_v59, %v735_v24  ;;  %v1363_v45 = vadd.f32 %v732_v58, %v731_v29  ;;  %v743_v59 = vld [vmem:[%s10057_s18 + $0xf60] sm:$0xff] }
 0x163   : > { %13651 = vst [vmem:[#allocation49_spill] sm:$0xff] %v10872_v1  ;;  %1311 = vadd.xlane.f32.xlu1 %v10647_v53  ;;  %13652 = vst [vmem:[#allocation50_spill] sm:$0xff] %v10881_v27  ;;  %v1929_v51 = vrot.slane %v13654_v57, %v10502_v12  ;;  %v1936_v63 = vrot.slane %v13654_v57, %v10505_v15  ;;  %v1943_v56 = vrot.slane %v13654_v57, %v10513_v21  ;;  %v733_v50 = vld [vmem:[%s10057_s18 + $0xf10] sm:$0xff]  ;;  %v13662_v29 = vld [vmem:[#allocation26_spill] sm:$0xff] }
 0x164   : > { %13653 = vst [vmem:[#allocation51_spill] sm:$0xff] %v10883_v13  ;;  %1306 = vadd.xlane.f32.xlu0 %v10649_v61  ;;  %v10890_v53 = vpop.xlane.xlu1 %961  ;;  %v1950_v23 = vrot.slane %v13654_v57, %v10543_v3  ;;  %v10898_v37 = vcombine.low %v1957_v7, %v1964_v30  ;;  %v10900_v4 = vcombine.low %v1971_v54, %v1978_v14  ;;  %v13659_v13 = vld [vmem:[#allocation24_spill] sm:$0xff]  ;;  %v13660_v54 = vld [vmem:[#allocation25_spill] sm:$0xff]  ;;  %v13664_v43 = vld [vmem:[#allocation27_spill] sm:$0xff] }
 0x165   : > { %13655 = vst [vmem:[#allocation23_spill] sm:$0xff] %v10890_v53  ;;  %v10896_v19 = vpop.xlane.xlu0 %956  ;;  %v10902_v48 = vadd.f32 %v1359_v31, %v730_v38  ;;  %v1354_v61 = vadd.f32 %v1353_v44, %v725_v46  ;;  %v2013_v27 = vrot.slane %v13659_v13, %v10502_v12  ;;  %v2020_v57 = vrot.slane %v13659_v13, %v10505_v15  ;;  %v739_v53 = vld [vmem:[%s10057_s18 + $0xf40] sm:$0xff] }
 0x166   : > { %13656 = vst [vmem:[#allocation52_spill] sm:$0xff] %v10896_v19  ;;  %13657 = vst [vmem:[#allocation53_spill] sm:$0xff] %v10898_v37  ;;  %v2027_v7 = vrot.slane %v13659_v13, %v10513_v21  ;;  %v2034_v24 = vrot.slane %v13659_v13, %v10543_v3  ;;  %v1985_v44 = vrot.slane %v13660_v54, %v10502_v12 }
 0x167   : > { %13658 = vst [vmem:[#allocation54_spill] sm:$0xff] %v10900_v4  ;;  %1321 = vadd.xlane.f32.xlu1 %v10674_v36  ;;  %v1992_v46 = vrot.slane %v13660_v54, %v10505_v15  ;;  %v1999_v31 = vrot.slane %v13660_v54, %v10513_v21  ;;  %v2006_v30 = vrot.slane %v13660_v54, %v10543_v3  ;;  %v744_v36 = vld [vmem:[%s10057_s18 + $0xf68] sm:$0xff]  ;;  %v726_v4 = vld [vmem:[%s10057_s18 + $0xed8] sm:$0xff] }
 0x168   : > { %1316 = vadd.xlane.f32.xlu0 %v10722_v33  ;;  %v10924_v14 = vpop.xlane.xlu1 %971  ;;  %v2069_v58 = vrot.slane %v13662_v29, %v10502_v12  ;;  %v2076_v38 = vrot.slane %v13662_v29, %v10505_v15  ;;  %v1369_v37 = vadd.f32 %v1368_v32, %v737_v47  ;;  %v1364_v54 = vadd.f32 %v1363_v45, %v733_v50  ;;  %v738_v45 = vld [vmem:[%s10057_s18 + $0xf38] sm:$0xff] }
 0x169   : > { %13661 = vst [vmem:[#allocation24_spill] sm:$0xff] %v10924_v14  ;;  %v10932_v13 = vpop.xlane.xlu0 %966  ;;  %v2083_v33 = vrot.slane %v13662_v29, %v10513_v21  ;;  %v2090_v1 = vrot.slane %v13662_v29, %v10543_v3  ;;  %v2041_v14 = vrot.slane %v13664_v43, %v10502_v12  ;;  %v2048_v19 = vrot.slane %v13664_v43, %v10505_v15  ;;  %v734_v47 = vld [vmem:[%s10057_s18 + $0xf18] sm:$0xff] }
 0x16a   : > { %13663 = vst [vmem:[#allocation25_spill] sm:$0xff] %v10932_v13  ;;  %v10945_v26 = vcombine.low %v2013_v27, %v2020_v57  ;;  %v10947_v13 = vcombine.low %v1929_v51, %v1936_v63  ;;  %v10949_v32 = vcombine.low %v1943_v56, %v1950_v23  ;;  %v1378_v50 = vadd.f32 %v744_v36, %v743_v59  ;;  %v748_v59 = vld [vmem:[%s10057_s18 + $0xf88] sm:$0xff]  ;;  %v13673_v36 = vld [vmem:[#allocation29_spill] sm:$0xff] }
 0x16b   : > { %1331 = vadd.xlane.f32.xlu1 %v10748_v28  ;;  %v10954_v29 = vcombine.low %v2027_v7, %v2034_v24  ;;  %v10956_v60 = vcombine.low %v1985_v44, %v1992_v46  ;;  %v10958_v2 = vcombine.low %v1999_v31, %v2006_v30  ;;  %v10963_v51 = vadd.f32 %v1354_v61, %v726_v4  ;;  %v745_v28 = vld [vmem:[%s10057_s18 + $0xf70] sm:$0xff]  ;;  %v752_v31 = vld [vmem:[%s10057_s18 + $0xfa8] sm:$0xff]  ;;  %v747_v30 = vld [vmem:[%s10057_s18 + $0xf80] sm:$0xff] }
 0x16c   : > { %13665 = vst [vmem:[#allocation26_spill] sm:$0xff] %v10947_v13  ;;  %13666 = vst [vmem:[#allocation27_spill] sm:$0xff] %v10949_v32  ;;  %1326 = vadd.xlane.f32.xlu0 %v10750_v18  ;;  %v10961_v27 = vpop.xlane.xlu1 %981  ;;  %v10966_v63 = vcombine.low %v2069_v58, %v2076_v38  ;;  %v2055_v56 = vrot.slane %v13664_v43, %v10513_v21  ;;  %v2062_v23 = vrot.slane %v13664_v43, %v10543_v3  ;;  %v741_v7 = vld [vmem:[%s10057_s18 + $0xf50] sm:$0xff]  ;;  %v751_v18 = vld [vmem:[%s10057_s18 + $0xfa0] sm:$0xff] }
 0x16d   : > { %13667 = vst [vmem:[#allocation55_spill] sm:$0xff] %v10954_v29  ;;  %13668 = vst [vmem:[#allocation56_spill] sm:$0xff] %v10956_v60  ;;  %v10972_v57 = vpop.xlane.xlu0 %976  ;;  %v1373_v24 = vadd.f32 %v740_v42, %v739_v53  ;;  %v10976_v44 = vcombine.low %v2083_v33, %v2090_v1  ;;  %v10978_v46 = vcombine.low %v2041_v14, %v2048_v19  ;;  %v13674_v19 = vld [vmem:[#allocation30_spill] sm:$0xff] }
 0x16e   : > { %13669 = vst [vmem:[#allocation57_spill] sm:$0xff] %v10958_v2  ;;  %13670 = vst [vmem:[#allocation58_spill] sm:$0xff] %v10966_v63  ;;  %v10980_v4 = vadd.f32 %v1369_v37, %v738_v45  ;;  %v10982_v61 = vadd.f32 %v1364_v54, %v734_v47  ;;  %v2125_v43 = vrot.slane %v13673_v36, %v10502_v12  ;;  %v746_v45 = vld [vmem:[%s10057_s18 + $0xf78] sm:$0xff]  ;;  %v753_v63 = vld [vmem:[%s10057_s18 + $0xfb0] sm:$0xff] }
 0x16f   : > { %13671 = vst [vmem:[#allocation59_spill] sm:$0xff] %v10976_v44  ;;  %13672 = vst [vmem:[#allocation60_spill] sm:$0xff] %v10978_v46  ;;  %v2132_v58 = vrot.slane %v13673_v36, %v10505_v15  ;;  %v2139_v42 = vrot.slane %v13673_v36, %v10513_v21  ;;  %1341 = vadd.xlane.f32.xlu1 %v10799_v35  ;;  %v1379_v1 = vadd.f32 %v1378_v50, %v745_v28 }
 0x170   : > { %v2146_v53 = vrot.slane %v13673_v36, %v10543_v3  ;;  %v2097_v37 = vrot.slane %v13674_v19, %v10502_v12  ;;  %v2104_v14 = vrot.slane %v13674_v19, %v10505_v15  ;;  %v2111_v38 = vrot.slane %v13674_v19, %v10513_v21  ;;  %1336 = vadd.xlane.f32.xlu0 %v10825_v16  ;;  %v11003_v54 = vpop.xlane.xlu1 %991 }
 0x171   : > { %v2118_v35 = vrot.slane %v13674_v19, %v10543_v3  ;;  %v11007_v33 = vpop.xlane.xlu0 %986  ;;  %v1374_v47 = vadd.f32 %v1373_v24, %v741_v7  ;;  %v1388_v50 = vadd.f32 %v752_v31, %v751_v18  ;;  %v1383_v28 = vadd.f32 %v748_v59, %v747_v30  ;;  %v742_v31 = vld [vmem:[%s10057_s18 + $0xf58] sm:$0xff]  ;;  %v759_v30 = vld [vmem:[%s10057_s18 + $0xfe0] sm:$0xff] }
 0x172   : > { %v2181_v36 = vrot.slane %v10583_v11, %v10502_v12  ;;  %v2188_v16 = vrot.slane %v10583_v11, %v10505_v15  ;;  %v2195_v46 = vrot.slane %v10583_v11, %v10513_v21  ;;  %v2202_v19 = vrot.slane %v10583_v11, %v10543_v3  ;;  %v760_v11 = vld [vmem:[%s10057_s18 + $0xfe8] sm:$0xff] }
 0x173   : > { %v2153_v2 = vrot.slane %v10593_v5, %v10502_v12  ;;  %v2160_v7 = vrot.slane %v10593_v5, %v10505_v15  ;;  %v2167_v24 = vrot.slane %v10593_v5, %v10513_v21  ;;  %v2174_v18 = vrot.slane %v10593_v5, %v10543_v3  ;;  %1351 = vadd.xlane.f32.xlu1 %v10875_v62  ;;  %v749_v5 = vld [vmem:[%s10057_s18 + $0xf90] sm:$0xff] }
 0x174   : > { %v11030_v59 = vcombine.low %v2125_v43, %v2132_v58  ;;  %v11032_v60 = vcombine.low %v2139_v42, %v2146_v53  ;;  %v11034_v32 = vcombine.low %v2055_v56, %v2062_v23  ;;  %1346 = vadd.xlane.f32.xlu0 %v10877_v6  ;;  %v11037_v13 = vpop.xlane.xlu1 %1001  ;;  %v1380_v44 = vadd.f32 %v1379_v1, %v746_v45  ;;  %v755_v23 = vld [vmem:[%s10057_s18 + $0xfc0] sm:$0xff]  ;;  %v756_v6 = vld [vmem:[%s10057_s18 + $0xfc8] sm:$0xff] }
 0x175   : > { %v11041_v29 = vcombine.low %v2097_v37, %v2104_v14  ;;  %v11043_v62 = vcombine.low %v2111_v38, %v2118_v35  ;;  %v2237_v43 = vrot.slane %v10622_v22, %v10502_v12  ;;  %v2244_v58 = vrot.slane %v10622_v22, %v10505_v15  ;;  %v11049_v56 = vpop.xlane.xlu0 %996 }
 0x176   : > { %13675 = vst [vmem:[#allocation29_spill] sm:$0xff] %v11030_v59  ;;  %13676 = vst [vmem:[#allocation30_spill] sm:$0xff] %v11032_v60  ;;  %v11053_v42 = vcombine.low %v2181_v36, %v2188_v16  ;;  %v11055_v1 = vcombine.low %v2195_v46, %v2202_v19  ;;  %v1375_v53 = vadd.f32 %v1374_v47, %v742_v31 }
 0x177   : > { %13677 = vst [vmem:[#allocation61_spill] sm:$0xff] %v11034_v32  ;;  %13678 = vst [vmem:[#allocation62_spill] sm:$0xff] %v11041_v29  ;;  %v1398_v37 = vadd.f32 %v760_v11, %v759_v30  ;;  %v11057_v14 = vcombine.low %v2153_v2, %v2160_v7  ;;  %v11059_v38 = vcombine.low %v2167_v24, %v2174_v18  ;;  %1361 = vadd.xlane.f32.xlu1 %v10902_v48 }
 0x178   : > { %13679 = vst [vmem:[#allocation63_spill] sm:$0xff] %v11043_v62  ;;  %13680 = vst [vmem:[#allocation64_spill] sm:$0xff] %v11053_v42  ;;  %v1389_v35 = vadd.f32 %v1388_v50, %v753_v63  ;;  %v1384_v45 = vadd.f32 %v1383_v28, %v749_v5  ;;  %v761_v62 = vld [vmem:[%s10057_s18 + $0xff0] sm:$0xff]  ;;  %v2251_v29 = vrot.slane %v10622_v22, %v10513_v21  ;;  %1356 = vadd.xlane.f32.xlu0 %v10963_v51  ;;  %v11070_v2 = vpop.xlane.xlu1 %1011  ;;  %v758_v42 = vld [vmem:[%s10057_s18 + $0xfd8] sm:$0xff] }
 0x179   : > { %13681 = vst [vmem:[#allocation65_spill] sm:$0xff] %v11055_v1  ;;  %13682 = vst [vmem:[#allocation66_spill] sm:$0xff] %v11057_v14  ;;  %v2258_v36 = vrot.slane %v10622_v22, %v10543_v3  ;;  %v2209_v46 = vrot.slane %v10630_v40, %v10502_v12  ;;  %v1393_v47 = vadd.f32 %v756_v6, %v755_v23  ;;  %v11080_v50 = vpop.xlane.xlu0 %1006  ;;  %v757_v28 = vld [vmem:[%s10057_s18 + $0xfd0] sm:$0xff] }
 0x17a   : > { %13683 = vst [vmem:[#allocation67_spill] sm:$0xff] %v11059_v38  ;;  %13684 = vst [vmem:[#allocation68_spill] sm:$0xff] %v11070_v2  ;;  %v11072_v16 = vcombine.low %v2237_v43, %v2244_v58  ;;  %v2216_v48 = vrot.slane %v10630_v40, %v10505_v15  ;;  %v2223_v63 = vrot.slane %v10630_v40, %v10513_v21  ;;  %v13688_v58 = vld [vmem:[#allocation28_spill] sm:$0xff] }
 0x17b   : > { %v2230_v22 = vrot.slane %v10630_v40, %v10543_v3  ;;  %13686 = vst [vmem:[#allocation70_spill] sm:$0xff] %v11080_v50  ;;  %v2293_v51 = vrot.slane %v10662_v0, %v10502_v12  ;;  %v2300_v19 = vrot.slane %v10662_v0, %v10505_v15  ;;  %v2307_v7 = vrot.slane %v10662_v0, %v10513_v21 }
 0x17c   : > { %13685 = vst [vmem:[#allocation69_spill] sm:$0xff] %v11072_v16  ;;  %v1399_v24 = vadd.f32 %v1398_v37, %v761_v62  ;;  %v2314_v18 = vrot.slane %v10662_v0, %v10543_v3  ;;  %v2265_v40 = vrot.slane %v10670_v25, %v10502_v12  ;;  %v2272_v31 = vrot.slane %v10670_v25, %v10505_v15  ;;  %v11101_v5 = vpop.xlane.xlu1 %1021  ;;  %v754_v0 = vld [vmem:[%s10057_s18 + $0xfb8] sm:$0xff] }
 0x17d   : > { %v2279_v30 = vrot.slane %v10670_v25, %v10513_v21  ;;  %1371 = vadd.xlane.f32.xlu1 %v10980_v4  ;;  %v2286_v11 = vrot.slane %v10670_v25, %v10543_v3  ;;  %1366 = vadd.xlane.f32.xlu0 %v10982_v61  ;;  %13687 = vst [vmem:[#allocation71_spill] sm:$0xff] %v11101_v5  ;;  %v750_v62 = vld [vmem:[%s10057_s18 + $0xf98] sm:$0xff] }
 0x17e   : > { %v1394_v43 = vadd.f32 %v1393_v47, %v757_v28  ;;  %v5140_v23 = vrot.slane %v10701_v34, %v13688_v58  ;;  %v5147_v6 = vrot.slane %v10719_v20, %v13688_v58  ;;  %v2349_v4 = vrot.slane %v10698_v55, %v10502_v12  ;;  %v11117_v47 = vpop.xlane.xlu0 %1016  ;;  %v762_v28 = vld [vmem:[%s10057_s18 + $0xff8] sm:$0xff] }
 0x17f   : > { %v2356_v25 = vrot.slane %v10698_v55, %v10505_v15  ;;  %v2363_v61 = vrot.slane %v10698_v55, %v10513_v21  ;;  %v2370_v37 = vrot.slane %v10698_v55, %v10543_v3  ;;  %13689 = vst [vmem:[#allocation72_spill] sm:$0xff] %v11117_v47  ;;  %v2321_v34 = vrot.slane %v10707_v49, %v10502_v12 }
 0x180   : > { %v2328_v20 = vrot.slane %v10707_v49, %v10505_v15  ;;  %v2335_v38 = vrot.slane %v10707_v49, %v10513_v21  ;;  %v2342_v14 = vrot.slane %v10707_v49, %v10543_v3  ;;  %v11128_v32 = vcombine.low %v2251_v29, %v2258_v36  ;;  %v11139_v5 = vpop.xlane.xlu1 %1031 }
 0x181   : > { %v11130_v16 = vcombine.low %v2209_v46, %v2216_v48  ;;  %1381 = vadd.xlane.f32.xlu1 %v1380_v44  ;;  %v1390_v55 = vadd.f32 %v1389_v35, %v754_v0  ;;  %v1385_v1 = vadd.f32 %v1384_v45, %v750_v62  ;;  %v11133_v60 = vcombine.low %v2293_v51, %v2300_v19 }
 0x182   : > { %v11135_v59 = vcombine.low %v2307_v7, %v2314_v18  ;;  %v11137_v47 = vcombine.low %v2223_v63, %v2230_v22  ;;  %1376 = vadd.xlane.f32.xlu0 %v1375_v53  ;;  %v1400_v50 = vadd.f32 %v1399_v24, %v762_v28  ;;  %v11141_v2 = vcombine.low %v2349_v4, %v2356_v25  ;;  %v11149_v35 = vpop.xlane.xlu0 %1026  ;;  %v13702_v4 = vld [vmem:[#allocation32_spill] sm:$0xff] }
 0x183   : > { %13690 = vst [vmem:[#allocation73_spill] sm:$0xff] %v11130_v16  ;;  %v11143_v49 = vcombine.low %v2363_v61, %v2370_v37  ;;  %v11145_v29 = vcombine.low %v2265_v40, %v2272_v31  ;;  %v11147_v44 = vcombine.low %v2279_v30, %v2286_v11  ;;  %v11151_v45 = vcombine.low %v2321_v34, %v2328_v20  ;;  %v13699_v40 = vld [vmem:[#allocation16_spill] sm:$0xff]  ;;  %v13700_v11 = vld [vmem:[#allocation31_spill] sm:$0xff]  ;;  %v13704_v34 = vld [vmem:[#allocation18_spill] sm:$0xff] }
 0x184   : > { %13691 = vst [vmem:[#allocation74_spill] sm:$0xff] %v11135_v59  ;;  %13692 = vst [vmem:[#allocation75_spill] sm:$0xff] %v11137_v47  ;;  %v11153_v36 = vcombine.low %v2335_v38, %v2342_v14  ;;  %v1395_v46 = vadd.f32 %v1394_v43, %v758_v42  ;;  %v11155_v48 = vcombine.low %v5140_v23, %v5147_v6  ;;  %v11173_v7 = vpop.xlane.xlu1 %1041  ;;  %v13703_v37 = vld [vmem:[#allocation40_spill] sm:$0xff] }
 0x185   : > { %13693 = vst [vmem:[#allocation76_spill] sm:$0xff] %v11141_v2  ;;  %13694 = vst [vmem:[#allocation77_spill] sm:$0xff] %v11143_v49  ;;  %v2405_v53 = vrot.slane %v10736_v10, %v10502_v12  ;;  %v2412_v63 = vrot.slane %v10736_v10, %v10505_v15  ;;  %1391 = vadd.xlane.f32.xlu1 %v1390_v55  ;;  %v5157_v22 = vrot.slane %v10643_v52, %v13688_v58 }
 0x186   : > { %13695 = vst [vmem:[#allocation78_spill] sm:$0xff] %v11145_v29  ;;  %13696 = vst [vmem:[#allocation79_spill] sm:$0xff] %v11147_v44  ;;  %v5164_v51 = vrot.slane %v10645_v8, %v13688_v58  ;;  %v2419_v14 = vrot.slane %v10736_v10, %v10513_v21  ;;  %v2426_v42 = vrot.slane %v10736_v10, %v10543_v3  ;;  %1386 = vadd.xlane.f32.xlu0 %v1385_v1  ;;  %v11179_v24 = vpop.xlane.xlu0 %1036 }
 0x187   : > { %13697 = vst [vmem:[#allocation80_spill] sm:$0xff] %v11151_v45  ;;  %13698 = vst [vmem:[#allocation81_spill] sm:$0xff] %v11153_v36  ;;  %v2377_v38 = vrot.slane %v10744_v41, %v10502_v12  ;;  %v2384_v19 = vrot.slane %v10744_v41, %v10505_v15  ;;  %v2391_v52 = vrot.slane %v10744_v41, %v10513_v21 }
 0x188   : > { %v2398_v8 = vrot.slane %v10744_v41, %v10543_v3  ;;  %v5123_v10 = vrot.slane %v10654_v9, %v13688_v58  ;;  %v5130_v18 = vrot.slane %v10656_v39, %v13688_v58  ;;  %v2461_v31 = vrot.slane %v13699_v40, %v10502_v12  ;;  %v13701_v9 = vld [vmem:[#allocation17_spill] sm:$0xff]  ;;  %v11203_v6 = vpop.xlane.xlu1 %1051 }
 0x189   : > { %v2468_v1 = vrot.slane %v13699_v40, %v10505_v15  ;;  %v2475_v30 = vrot.slane %v13699_v40, %v10513_v21  ;;  %v5174_v41 = vrot.slane %v13700_v11, %v13688_v58  ;;  %v2482_v0 = vrot.slane %v13699_v40, %v10543_v3  ;;  %1401 = vadd.xlane.f32.xlu1 %v1400_v50  ;;  %v13705_v11 = vld [vmem:[#allocation45_spill] sm:$0xff] }
 0x18a   : > { %v2433_v62 = vrot.slane %v13701_v9, %v10502_v12  ;;  %v2440_v39 = vrot.slane %v13701_v9, %v10505_v15  ;;  %v2447_v43 = vrot.slane %v13701_v9, %v10513_v21  ;;  %v2454_v23 = vrot.slane %v13701_v9, %v10543_v3  ;;  %1396 = vadd.xlane.f32.xlu0 %v1395_v46  ;;  %v11219_v40 = vpop.xlane.xlu0 %1046 }
 0x18b   : > { %v5181_v25 = vrot.slane %v13702_v4, %v13688_v58  ;;  %v5276_v61 = vrot.slane %v10792_v17, %v13688_v58  ;;  %v5283_v28 = vrot.slane %v13703_v37, %v13688_v58  ;;  %v2517_v20 = vrot.slane %v13704_v34, %v10502_v12 }
 0x18c   : > { %v2524_v50 = vrot.slane %v13704_v34, %v10505_v15  ;;  %v2531_v55 = vrot.slane %v13704_v34, %v10513_v21  ;;  %v2538_v46 = vrot.slane %v13704_v34, %v10543_v3  ;;  %v2489_v17 = vrot.slane %v13705_v11, %v10502_v12  ;;  %v11243_v49 = vpop.xlane.xlu1 %1061 }
 0x18d   : > { %v2496_v9 = vrot.slane %v13705_v11, %v10505_v15  ;;  %v2503_v4 = vrot.slane %v13705_v11, %v10513_v21  ;;  %v2510_v37 = vrot.slane %v13705_v11, %v10543_v3  ;;  %v11229_v36 = vcombine.low %v2405_v53, %v2412_v63  ;;  %v13721_v11 = vld [vmem:[#allocation23_spill] sm:$0xff] }
 0x18e   : > { %v11231_v45 = vcombine.low %v2419_v14, %v2426_v42  ;;  %v11233_v44 = vcombine.low %v2377_v38, %v2384_v19  ;;  %v11235_v34 = vcombine.low %v5157_v22, %v5164_v51  ;;  %v11237_v29 = vcombine.low %v2461_v31, %v2468_v1  ;;  %v11255_v22 = vpop.xlane.xlu0 %1056  ;;  %v13717_v1 = vld [vmem:[#allocation36_spill] sm:$0xff] }
 0x18f   : > { %v11239_v47 = vcombine.low %v2475_v30, %v2482_v0  ;;  %v11241_v16 = vcombine.low %v2391_v52, %v2398_v8  ;;  %v11245_v2 = vcombine.low %v5123_v10, %v5130_v18  ;;  %v11247_v59 = vcombine.low %v2517_v20, %v2524_v50  ;;  %v13715_v52 = vld [vmem:[#allocation19_spill] sm:$0xff]  ;;  %v13719_v20 = vld [vmem:[#allocation44_spill] sm:$0xff] }
 0x190   : > { %13706 = vst [vmem:[#allocation16_spill] sm:$0xff] %v11233_v44  ;;  %v11249_v53 = vcombine.low %v2531_v55, %v2538_v46  ;;  %v11251_v63 = vcombine.low %v2433_v62, %v2440_v39  ;;  %v11253_v14 = vcombine.low %v2447_v43, %v2454_v23  ;;  %v11257_v51 = vcombine.low %v2489_v17, %v2496_v9  ;;  %v13716_v18 = vld [vmem:[#allocation35_spill] sm:$0xff]  ;;  %v13718_v62 = vld [vmem:[#allocation48_spill] sm:$0xff]  ;;  %v11281_v23 = vpop.xlane.xlu1 %1071  ;;  %v13720_v55 = vld [vmem:[#allocation46_spill] sm:$0xff] }
 0x191   : > { %13707 = vst [vmem:[#allocation31_spill] sm:$0xff] %v11239_v47  ;;  %13708 = vst [vmem:[#allocation17_spill] sm:$0xff] %v11241_v16  ;;  %v11259_v42 = vcombine.low %v2503_v4, %v2510_v37  ;;  %v11261_v38 = vcombine.low %v5174_v41, %v5181_v25  ;;  %v11263_v19 = vcombine.low %v5276_v61, %v5283_v28 }
 0x192   : > { %13709 = vst [vmem:[#allocation32_spill] sm:$0xff] %v11247_v59  ;;  %13710 = vst [vmem:[#allocation40_spill] sm:$0xff] %v11249_v53  ;;  %v2573_v8 = vrot.slane %v13715_v52, %v10502_v12  ;;  %v2580_v10 = vrot.slane %v13715_v52, %v10505_v15  ;;  %v5191_v31 = vrot.slane %v13716_v18, %v13688_v58  ;;  %v11287_v28 = vpop.xlane.xlu0 %1066 }
 0x193   : > { %13711 = vst [vmem:[#allocation18_spill] sm:$0xff] %v11251_v63  ;;  %13712 = vst [vmem:[#allocation45_spill] sm:$0xff] %v11253_v14  ;;  %v5198_v30 = vrot.slane %v13717_v1, %v13688_v58  ;;  %v2587_v0 = vrot.slane %v13715_v52, %v10513_v21  ;;  %v2594_v41 = vrot.slane %v13715_v52, %v10543_v3  ;;  %v13722_v52 = vld [vmem:[#allocation52_spill] sm:$0xff] }
 0x194   : > { %13713 = vst [vmem:[#allocation82_spill] sm:$0xff] %v11257_v51  ;;  %13714 = vst [vmem:[#allocation83_spill] sm:$0xff] %v11259_v42  ;;  %v2545_v39 = vrot.slane %v13718_v62, %v10502_v12  ;;  %v2552_v43 = vrot.slane %v13718_v62, %v10505_v15  ;;  %v2559_v25 = vrot.slane %v13718_v62, %v10513_v21  ;;  %v11315_v14 = vpop.xlane.xlu1 %1081  ;;  %v13726_v63 = vld [vmem:[#allocation24_spill] sm:$0xff] }
 0x195   : > { %v2566_v61 = vrot.slane %v13718_v62, %v10543_v3  ;;  %v5310_v50 = vrot.slane %v13719_v20, %v13688_v58  ;;  %v5317_v46 = vrot.slane %v13720_v55, %v13688_v58  ;;  %v2629_v17 = vrot.slane %v13721_v11, %v10502_v12 }
 0x196   : > { %v2636_v9 = vrot.slane %v13721_v11, %v10505_v15  ;;  %v2643_v4 = vrot.slane %v13721_v11, %v10513_v21  ;;  %v2650_v37 = vrot.slane %v13721_v11, %v10543_v3  ;;  %v2601_v18 = vrot.slane %v13722_v52, %v10502_v12 }
 0x197   : > { %v2608_v1 = vrot.slane %v13722_v52, %v10505_v15  ;;  %v2615_v62 = vrot.slane %v13722_v52, %v10513_v21  ;;  %v2622_v20 = vrot.slane %v13722_v52, %v10543_v3  ;;  %v11309_v55 = vcombine.low %v2573_v8, %v2580_v10  ;;  %v11327_v10 = vpop.xlane.xlu0 %1076 }
 0x198   : > { %v11311_v42 = vcombine.low %v2587_v0, %v2594_v41  ;;  %v11313_v51 = vcombine.low %v2545_v39, %v2552_v43  ;;  %v11317_v11 = vcombine.low %v5191_v31, %v5198_v30  ;;  %v2685_v16 = vrot.slane %v13726_v63, %v10502_v12  ;;  %v13730_v30 = vld [vmem:[#allocation33_spill] sm:$0xff] }
 0x199   : > { %13723 = vst [vmem:[#allocation19_spill] sm:$0xff] %v11309_v55  ;;  %v2692_v44 = vrot.slane %v13726_v63, %v10505_v15  ;;  %v2699_v53 = vrot.slane %v13726_v63, %v10513_v21  ;;  %v2706_v8 = vrot.slane %v13726_v63, %v10543_v3  ;;  %v11329_v0 = vcombine.low %v2629_v17, %v2636_v9  ;;  %v13734_v55 = vld [vmem:[#allocation25_spill] sm:$0xff] }
 0x19a   : > { %13724 = vst [vmem:[#allocation35_spill] sm:$0xff] %v11311_v42  ;;  %13725 = vst [vmem:[#allocation36_spill] sm:$0xff] %v11313_v51  ;;  %v11331_v41 = vcombine.low %v2643_v4, %v2650_v37  ;;  %v11333_v31 = vcombine.low %v2559_v25, %v2566_v61  ;;  %v5208_v39 = vrot.slane %v13730_v30, %v13688_v58  ;;  %v13733_v42 = vld [vmem:[#allocation34_spill] sm:$0xff]  ;;  %v11349_v25 = vpop.xlane.xlu1 %1091  ;;  %7295 = vperm.xlu1 %9597, %v11155_v48   ;;  %v13736_v37 = vld [vmem:[#allocation49_spill] sm:$0xff] }
 0x19b   : > { %13727 = vst [vmem:[#allocation48_spill] sm:$0xff] %v11329_v0  ;;  %v11337_v43 = vcombine.low %v2601_v18, %v2608_v1  ;;  %v11339_v52 = vcombine.low %v2615_v62, %v2622_v20  ;;  %v11341_v51 = vcombine.low %v5310_v50, %v5317_v46  ;;  %v5215_v63 = vrot.slane %v13733_v42, %v13688_v58  ;;  %v13735_v61 = vld [vmem:[#allocation22_spill] sm:$0xff]  ;;  %v11364_v62 = vpop.xlane.xlu0 %1086  ;;  %v13739_v30 = vld [vmem:[#allocation39_spill] sm:$0xff] }
 0x19c   : > { %13728 = vst [vmem:[#allocation44_spill] sm:$0xff] %v11331_v41  ;;  %13729 = vst [vmem:[#allocation46_spill] sm:$0xff] %v11333_v31  ;;  %v2657_v17 = vrot.slane %v13734_v55, %v10502_v12  ;;  %v2664_v9 = vrot.slane %v13734_v55, %v10505_v15  ;;  %v5344_v4 = vrot.slane %v13735_v61, %v13688_v58 }
 0x19d   : > { %13731 = vst [vmem:[#allocation23_spill] sm:$0xff] %v11337_v43  ;;  %13732 = vst [vmem:[#allocation52_spill] sm:$0xff] %v11339_v52  ;;  %v5351_v50 = vrot.slane %v13736_v37, %v13688_v58  ;;  %v11356_v46 = vcombine.low %v2685_v16, %v2692_v44  ;;  %v11358_v18 = vcombine.low %v2699_v53, %v2706_v8  ;;  %v13740_v44 = vld [vmem:[#allocation41_spill] sm:$0xff] }
 0x19e   : > { %v2671_v42 = vrot.slane %v13734_v55, %v10513_v21  ;;  %v2678_v1 = vrot.slane %v13734_v55, %v10543_v3  ;;  %v2741_v48 = vrot.slane %v10961_v27, %v10502_v12  ;;  %v2748_v20 = vrot.slane %v10961_v27, %v10505_v15  ;;  %v11386_v43 = vpop.xlane.xlu1 %1101  ;;  %7298 = vperm.xlu1 %9597, %v11235_v34  }
 0x19f   : > { %13737 = vst [vmem:[#allocation24_spill] sm:$0xff] %v11356_v46  ;;  %13738 = vst [vmem:[#allocation33_spill] sm:$0xff] %v11358_v18  ;;  %v5225_v16 = vrot.slane %v13739_v30, %v13688_v58  ;;  %v5232_v53 = vrot.slane %v13740_v44, %v13688_v58  ;;  %v2755_v8 = vrot.slane %v10961_v27, %v10513_v21 }
 0x1a0   : > { %v2762_v55 = vrot.slane %v10961_v27, %v10543_v3  ;;  %v2713_v61 = vrot.slane %v10972_v57, %v10502_v12  ;;  %v2720_v37 = vrot.slane %v10972_v57, %v10505_v15  ;;  %v2727_v52 = vrot.slane %v10972_v57, %v10513_v21  ;;  %13741 = vst [vmem:[#allocation34_spill] sm:$0xff] %v11386_v43 }
 0x1a1   : > { %v2734_v30 = vrot.slane %v10972_v57, %v10543_v3  ;;  %v5216_v44 = vcombine.low %v5208_v39, %v5215_v63  ;;  %v11389_v31 = vcombine.low %v5344_v4, %v5351_v50  ;;  %v2797_v27 = vrot.slane %v11003_v54, %v10502_v12  ;;  %v11399_v57 = vpop.xlane.xlu0 %1096  ;;  %7292 = vperm.xlu0 %9596, %v11245_v2   ;;  %v13745_v39 = vld [vmem:[#allocation53_spill] sm:$0xff]  ;;  %v13746_v4 = vld [vmem:[#allocation54_spill] sm:$0xff] }
 0x1a2   : > { %v2804_v18 = vrot.slane %v11003_v54, %v10505_v15  ;;  %v2811_v46 = vrot.slane %v11003_v54, %v10513_v21  ;;  %v2818_v41 = vrot.slane %v11003_v54, %v10543_v3  ;;  %13742 = vst [vmem:[#allocation25_spill] sm:$0xff] %v11399_v57  ;;  %v11401_v0 = vcombine.low %v2657_v17, %v2664_v9 }
 0x1a3   : > { %v11403_v34 = vcombine.low %v2671_v42, %v2678_v1  ;;  %v5378_v63 = vrot.slane %v13745_v39, %v13688_v58  ;;  %v5385_v50 = vrot.slane %v13746_v4, %v13688_v58  ;;  %v11410_v59 = vcombine.low %v2741_v48, %v2748_v20  ;;  %v11424_v42 = vpop.xlane.xlu1 %1111  ;;  %7301 = vperm.xlu1 %9597, %v11261_v38   ;;  %v13752_v1 = vld [vmem:[#allocation37_spill] sm:$0xff]  ;;  %v13756_v38 = vld [vmem:[#allocation38_spill] sm:$0xff] }
 0x1a4   : > { %13743 = vst [vmem:[#allocation22_spill] sm:$0xff] %v11401_v0  ;;  %v11412_v43 = vcombine.low %v2755_v8, %v2762_v55  ;;  %v11414_v47 = vcombine.low %v2713_v61, %v2720_v37  ;;  %v11416_v54 = vcombine.low %v5225_v16, %v5232_v53  ;;  %v11418_v17 = vcombine.low %v2727_v52, %v2734_v30 }
 0x1a5   : > { %13744 = vst [vmem:[#allocation49_spill] sm:$0xff] %v11403_v34  ;;  %13747 = vst [vmem:[#allocation39_spill] sm:$0xff] %v11410_v59  ;;  %v2769_v9 = vrot.slane %v11007_v33, %v10502_v12  ;;  %v2776_v2 = vrot.slane %v11007_v33, %v10505_v15  ;;  %v5242_v48 = vrot.slane %v13752_v1, %v13688_v58  ;;  %v11437_v53 = vpop.xlane.xlu0 %1106  ;;  %7319 = vperm.xlu0 %9596, %v11263_v19   ;;  %v13762_v34 = vld [vmem:[#allocation42_spill] sm:$0xff] }
 0x1a6   : > { %13748 = vst [vmem:[#allocation41_spill] sm:$0xff] %v11412_v43  ;;  %13749 = vst [vmem:[#allocation53_spill] sm:$0xff] %v11414_v47  ;;  %v11429_v20 = vcombine.low %v2797_v27, %v2804_v18  ;;  %v11431_v8 = vcombine.low %v2811_v46, %v2818_v41  ;;  %v2783_v52 = vrot.slane %v11007_v33, %v10513_v21  ;;  %v13757_v41 = vld [vmem:[#allocation55_spill] sm:$0xff] }
 0x1a7   : > { %13750 = vst [vmem:[#allocation54_spill] sm:$0xff] %v11418_v17  ;;  %13751 = vst [vmem:[#allocation84_spill] sm:$0xff] %v11424_v42  ;;  %v2790_v16 = vrot.slane %v11007_v33, %v10543_v3  ;;  %v5386_v55 = vcombine.low %v5378_v63, %v5385_v50  ;;  %v5249_v61 = vrot.slane %v13756_v38, %v13688_v58  ;;  %v11462_v4 = vpop.xlane.xlu1 %1121  ;;  %7304 = vperm.xlu1 %9597, %v11317_v11   ;;  %v13759_v50 = vld [vmem:[#allocation68_spill] sm:$0xff] }
 0x1a8   : > { %13753 = vst [vmem:[#allocation37_spill] sm:$0xff] %v11429_v20  ;;  %13754 = vst [vmem:[#allocation85_spill] sm:$0xff] %v11431_v8  ;;  %v5412_v18 = vrot.slane %v10945_v26, %v13688_v58  ;;  %v5419_v46 = vrot.slane %v13757_v41, %v13688_v58  ;;  %v2853_v37 = vrot.slane %v11037_v13, %v10502_v12  ;;  %v13763_v8 = vld [vmem:[#allocation43_spill] sm:$0xff] }
 0x1a9   : > { %13755 = vst [vmem:[#allocation86_spill] sm:$0xff] %v11437_v53  ;;  %v2860_v33 = vrot.slane %v11037_v13, %v10505_v15  ;;  %v2867_v30 = vrot.slane %v11037_v13, %v10513_v21  ;;  %v2874_v19 = vrot.slane %v11037_v13, %v10543_v3  ;;  %v2825_v27 = vrot.slane %v11049_v56, %v10502_v12  ;;  %v11473_v17 = vpop.xlane.xlu0 %1116 }
 0x1aa   : > { %v2832_v26 = vrot.slane %v11049_v56, %v10505_v15  ;;  %v2839_v39 = vrot.slane %v11049_v56, %v10513_v21  ;;  %v2846_v63 = vrot.slane %v11049_v56, %v10543_v3  ;;  %13758 = vst [vmem:[#allocation38_spill] sm:$0xff] %v11462_v4  ;;  %v2909_v1 = vrot.slane %v13759_v50, %v10502_v12  ;;  %v13761_v56 = vld [vmem:[#allocation70_spill] sm:$0xff] }
 0x1ab   : > { %v2916_v13 = vrot.slane %v13759_v50, %v10505_v15  ;;  %v2923_v38 = vrot.slane %v13759_v50, %v10513_v21  ;;  %v2930_v41 = vrot.slane %v13759_v50, %v10543_v3  ;;  %13760 = vst [vmem:[#allocation55_spill] sm:$0xff] %v11473_v17  ;;  %v2881_v47 = vrot.slane %v13761_v56, %v10502_v12  ;;  %v11496_v42 = vpop.xlane.xlu1 %1131 }
 0x1ac   : > { %v2888_v11 = vrot.slane %v13761_v56, %v10505_v15  ;;  %7325 = vperm.xlu0 %9596, %v11341_v51   ;;  %v5259_v0 = vrot.slane %v13762_v34, %v13688_v58  ;;  %v5266_v20 = vrot.slane %v13763_v8, %v13688_v58  ;;  %v11484_v43 = vcombine.low %v2853_v37, %v2860_v33 }
 0x1ad   : > { %v11486_v59 = vcombine.low %v2867_v30, %v2874_v19  ;;  %v11488_v50 = vcombine.low %v2769_v9, %v2776_v2  ;;  %v11490_v17 = vcombine.low %v2783_v52, %v2790_v16  ;;  %v11492_v4 = vcombine.low %v2825_v27, %v2832_v26  ;;  %7307 = vperm.xlu1 %9597, %v5216_v44   ;;  %v11506_v2 = vpop.xlane.xlu0 %1126  ;;  %v13771_v44 = vld [vmem:[#allocation58_spill] sm:$0xff] }
 0x1ae   : > { %v11494_v53 = vcombine.low %v2839_v39, %v2846_v63  ;;  %v5250_v51 = vcombine.low %v5242_v48, %v5249_v61  ;;  %v5420_v34 = vcombine.low %v5412_v18, %v5419_v46  ;;  %v11498_v57 = vcombine.low %v2909_v1, %v2916_v13  ;;  %v13772_v61 = vld [vmem:[#allocation59_spill] sm:$0xff] }
 0x1af   : > { %13764 = vst [vmem:[#allocation68_spill] sm:$0xff] %v11488_v50  ;;  %13765 = vst [vmem:[#allocation70_spill] sm:$0xff] %v11490_v17  ;;  %v11500_v8 = vcombine.low %v2923_v38, %v2930_v41  ;;  %v2895_v37 = vrot.slane %v13761_v56, %v10513_v21  ;;  %v2902_v9 = vrot.slane %v13761_v56, %v10543_v3  ;;  %v13773_v46 = vld [vmem:[#allocation71_spill] sm:$0xff]  ;;  %v11531_v39 = vpop.xlane.xlu1 %1141  ;;  %v13775_v56 = vld [vmem:[#allocation20_spill] sm:$0xff] }
 0x1b0   : > { %13766 = vst [vmem:[#allocation42_spill] sm:$0xff] %v11492_v4  ;;  %13767 = vst [vmem:[#allocation43_spill] sm:$0xff] %v11494_v53  ;;  %v11508_v52 = vcombine.low %v2881_v47, %v2888_v11  ;;  %7331 = vperm.xlu0 %9596, %v11389_v31   ;;  %v5267_v16 = vcombine.low %v5259_v0, %v5266_v20  ;;  %v5446_v48 = vrot.slane %v13771_v44, %v13688_v58  ;;  %v13774_v0 = vld [vmem:[#allocation72_spill] sm:$0xff] }
 0x1b1   : > { %13768 = vst [vmem:[#allocation87_spill] sm:$0xff] %v11498_v57  ;;  %13769 = vst [vmem:[#allocation88_spill] sm:$0xff] %v11500_v8  ;;  %v5453_v18 = vrot.slane %v13772_v61, %v13688_v58  ;;  %v2965_v33 = vrot.slane %v13773_v46, %v10502_v12  ;;  %v2972_v30 = vrot.slane %v13773_v46, %v10505_v15  ;;  %7310 = vperm.xlu1 %9597, %v11416_v54   ;;  %v11542_v41 = vpop.xlane.xlu0 %1136  ;;  %v13776_v54 = vld [vmem:[#allocation47_spill] sm:$0xff]  ;;  %v13777_v61 = vld [vmem:[#allocation29_spill] sm:$0xff] }
 0x1b2   : > { %13770 = vst [vmem:[#allocation89_spill] sm:$0xff] %v11508_v52  ;;  %v2979_v19 = vrot.slane %v13773_v46, %v10513_v21  ;;  %v2986_v47 = vrot.slane %v13773_v46, %v10543_v3  ;;  %v2937_v31 = vrot.slane %v13774_v0, %v10502_v12  ;;  %v2944_v20 = vrot.slane %v13774_v0, %v10505_v15  ;;  %v13794_v8 = vld [vmem:[#allocation26_spill] sm:$0xff] }
 0x1b3   : > { %v2951_v27 = vrot.slane %v13774_v0, %v10513_v21  ;;  %v2958_v26 = vrot.slane %v13774_v0, %v10543_v3  ;;  %v3021_v63 = vrot.slane %v11139_v5, %v10502_v12  ;;  %v3028_v1 = vrot.slane %v11139_v5, %v10505_v15  ;;  %v13778_v0 = vld [vmem:[#allocation30_spill] sm:$0xff] }
 0x1b4   : > { %v3035_v13 = vrot.slane %v11139_v5, %v10513_v21  ;;  %v3042_v38 = vrot.slane %v11139_v5, %v10543_v3  ;;  %7337 = vperm.xlu0 %9596, %v5386_v55   ;;  %v5293_v11 = vrot.slane %v13775_v56, %v13688_v58  ;;  %v5300_v44 = vrot.slane %v13776_v54, %v13688_v58 }
 0x1b5   : > { %v5480_v46 = vrot.slane %v13777_v61, %v13688_v58  ;;  %v5487_v52 = vrot.slane %v13778_v0, %v13688_v58  ;;  %v11552_v53 = vcombine.low %v2965_v33, %v2972_v30  ;;  %v11554_v4 = vcombine.low %v2979_v19, %v2986_v47  ;;  %v11566_v61 = vpop.xlane.xlu1 %1151  ;;  %7313 = vperm.xlu1 %9597, %v5250_v51   ;;  %v13786_v47 = vld [vmem:[#allocation50_spill] sm:$0xff]  ;;  %v13787_v51 = vld [vmem:[#allocation51_spill] sm:$0xff] }
 0x1b6   : > { %v11556_v5 = vcombine.low %v2895_v37, %v2902_v9  ;;  %v5454_v17 = vcombine.low %v5446_v48, %v5453_v18  ;;  %v11558_v55 = vcombine.low %v2937_v31, %v2944_v20  ;;  %v11560_v50 = vcombine.low %v2951_v27, %v2958_v26  ;;  %v11576_v48 = vpop.xlane.xlu0 %1146 }
 0x1b7   : > { %13779 = vst [vmem:[#allocation58_spill] sm:$0xff] %v11552_v53  ;;  %13780 = vst [vmem:[#allocation59_spill] sm:$0xff] %v11554_v4  ;;  %v2993_v56 = vrot.slane %v11149_v35, %v10502_v12  ;;  %v3000_v54 = vrot.slane %v11149_v35, %v10505_v15  ;;  %v11568_v33 = vcombine.low %v3021_v63, %v3028_v1 }
 0x1b8   : > { %13781 = vst [vmem:[#allocation71_spill] sm:$0xff] %v11556_v5  ;;  %13782 = vst [vmem:[#allocation72_spill] sm:$0xff] %v11558_v55  ;;  %v11570_v30 = vcombine.low %v3035_v13, %v3042_v38  ;;  %v3007_v37 = vrot.slane %v11149_v35, %v10513_v21  ;;  %v3014_v9 = vrot.slane %v11149_v35, %v10543_v3  ;;  %7343 = vperm.xlu0 %9596, %v5420_v34  }
 0x1b9   : > { %13783 = vst [vmem:[#allocation20_spill] sm:$0xff] %v11560_v50  ;;  %13784 = vst [vmem:[#allocation47_spill] sm:$0xff] %v11568_v33  ;;  %v5301_v18 = vcombine.low %v5293_v11, %v5300_v44  ;;  %v5488_v19 = vcombine.low %v5480_v46, %v5487_v52  ;;  %v5327_v31 = vrot.slane %v13786_v47, %v13688_v58  ;;  %v11598_v38 = vpop.xlane.xlu1 %1161  ;;  %7316 = vperm.xlu1 %9597, %v5267_v16   ;;  %v13788_v46 = vld [vmem:[#allocation64_spill] sm:$0xff]  ;;  %v13789_v47 = vld [vmem:[#allocation65_spill] sm:$0xff] }
 0x1ba   : > { %13785 = vst [vmem:[#allocation29_spill] sm:$0xff] %v11570_v30  ;;  %v5334_v20 = vrot.slane %v13787_v51, %v13688_v58  ;;  %v3077_v27 = vrot.slane %v11173_v7, %v10502_v12  ;;  %v3084_v26 = vrot.slane %v11173_v7, %v10505_v15  ;;  %v3091_v35 = vrot.slane %v11173_v7, %v10513_v21  ;;  %v11604_v44 = vpop.xlane.xlu0 %1156 }
 0x1bb   : > { %v3098_v34 = vrot.slane %v11173_v7, %v10543_v3  ;;  %v3049_v52 = vrot.slane %v11179_v24, %v10502_v12  ;;  %v3056_v63 = vrot.slane %v11179_v24, %v10505_v15  ;;  %v3063_v1 = vrot.slane %v11179_v24, %v10513_v21 }
 0x1bc   : > { %v3070_v13 = vrot.slane %v11179_v24, %v10543_v3  ;;  %v3133_v11 = vrot.slane %v11203_v6, %v10502_v12  ;;  %v3140_v7 = vrot.slane %v11203_v6, %v10505_v15  ;;  %v5514_v0 = vrot.slane %v13788_v46, %v13688_v58  ;;  %7349 = vperm.xlu0 %9596, %v5454_v17  }
 0x1bd   : > { %v5521_v51 = vrot.slane %v13789_v47, %v13688_v58  ;;  %v3147_v24 = vrot.slane %v11203_v6, %v10513_v21  ;;  %v3154_v16 = vrot.slane %v11203_v6, %v10543_v3  ;;  %v3105_v50 = vrot.slane %v11219_v40, %v10502_v12  ;;  %v11630_v6 = vpop.xlane.xlu1 %1171  ;;  %7322 = vperm.xlu1 %9597, %v5301_v18  }
 0x1be   : > { %v3112_v55 = vrot.slane %v11219_v40, %v10505_v15  ;;  %v11618_v5 = vcombine.low %v3077_v27, %v3084_v26  ;;  %v11620_v30 = vcombine.low %v3091_v35, %v3098_v34  ;;  %v11622_v46 = vcombine.low %v2993_v56, %v3000_v54  ;;  %v11640_v54 = vpop.xlane.xlu0 %1166 }
 0x1bf   : > { %v11624_v47 = vcombine.low %v3007_v37, %v3014_v9  ;;  %v11626_v33 = vcombine.low %v3049_v52, %v3056_v63  ;;  %v11628_v4 = vcombine.low %v3063_v1, %v3070_v13  ;;  %v5335_v53 = vcombine.low %v5327_v31, %v5334_v20  ;;  %v13795_v37 = vld [vmem:[#allocation27_spill] sm:$0xff] }
 0x1c0   : > { %13790 = vst [vmem:[#allocation30_spill] sm:$0xff] %v11622_v46  ;;  %v5361_v57 = vrot.slane %v13794_v8, %v13688_v58  ;;  %v11634_v17 = vcombine.low %v3133_v11, %v3140_v7  ;;  %v3119_v27 = vrot.slane %v11219_v40, %v10513_v21  ;;  %v3126_v56 = vrot.slane %v11219_v40, %v10543_v3  ;;  %v13798_v8 = vld [vmem:[#allocation69_spill] sm:$0xff] }
 0x1c1   : > { %13791 = vst [vmem:[#allocation50_spill] sm:$0xff] %v11624_v47  ;;  %13792 = vst [vmem:[#allocation51_spill] sm:$0xff] %v11626_v33  ;;  %v5368_v9 = vrot.slane %v13795_v37, %v13688_v58  ;;  %v11644_v26 = vcombine.low %v3147_v24, %v3154_v16  ;;  %v11646_v18 = vcombine.low %v3105_v50, %v3112_v55  ;;  %7355 = vperm.xlu0 %9596, %v5488_v19   ;;  %v11666_v1 = vpop.xlane.xlu1 %1181 }
 0x1c2   : > { %13793 = vst [vmem:[#allocation64_spill] sm:$0xff] %v11628_v4  ;;  %v5522_v31 = vcombine.low %v5514_v0, %v5521_v51  ;;  %v5548_v20 = vrot.slane %v13798_v8, %v13688_v58  ;;  %v3189_v35 = vrot.slane %v11243_v49, %v10502_v12  ;;  %v3196_v40 = vrot.slane %v11243_v49, %v10505_v15  ;;  %v13800_v0 = vld [vmem:[#allocation57_spill] sm:$0xff] }
 0x1c3   : > { %13796 = vst [vmem:[#allocation65_spill] sm:$0xff] %v11644_v26  ;;  %13797 = vst [vmem:[#allocation26_spill] sm:$0xff] %v11646_v18  ;;  %v3203_v34 = vrot.slane %v11243_v49, %v10513_v21  ;;  %v5555_v52 = vrot.slane %v11128_v32, %v13688_v58  ;;  %v3210_v50 = vrot.slane %v11243_v49, %v10543_v3  ;;  %7328 = vperm.xlu1 %9597, %v5335_v53   ;;  %v11670_v32 = vpop.xlane.xlu0 %1176  ;;  %v13799_v49 = vld [vmem:[#allocation56_spill] sm:$0xff] }
 0x1c4   : > { %v3161_v55 = vrot.slane %v11255_v22, %v10502_v12  ;;  %v3168_v19 = vrot.slane %v11255_v22, %v10505_v15  ;;  %v3175_v63 = vrot.slane %v11255_v22, %v10513_v21  ;;  %v3182_v13 = vrot.slane %v11255_v22, %v10543_v3 }
 0x1c5   : > { %v5369_v11 = vcombine.low %v5361_v57, %v5368_v9  ;;  %v5395_v7 = vrot.slane %v13799_v49, %v13688_v58  ;;  %v5402_v51 = vrot.slane %v13800_v0, %v13688_v58  ;;  %v3245_v24 = vrot.slane %v11281_v23, %v10502_v12  ;;  %7361 = vperm.xlu0 %9596, %v5522_v31   ;;  %v11694_v0 = vpop.xlane.xlu1 %1191  ;;  %v13802_v31 = vld [vmem:[#allocation74_spill] sm:$0xff] }
 0x1c6   : > { %v3252_v16 = vrot.slane %v11281_v23, %v10505_v15  ;;  %v3259_v53 = vrot.slane %v11281_v23, %v10513_v21  ;;  %v3266_v22 = vrot.slane %v11281_v23, %v10543_v3  ;;  %v3217_v57 = vrot.slane %v11287_v28, %v10502_v12 }
 0x1c7   : > { %v3224_v37 = vrot.slane %v11287_v28, %v10505_v15  ;;  %v3231_v9 = vrot.slane %v11287_v28, %v10513_v21  ;;  %v3238_v8 = vrot.slane %v11287_v28, %v10543_v3  ;;  %v11692_v49 = vcombine.low %v3119_v27, %v3126_v56  ;;  %7334 = vperm.xlu1 %9597, %v5369_v11   ;;  %v11708_v28 = vpop.xlane.xlu0 %1186 }
 0x1c8   : > { %v5556_v18 = vcombine.low %v5548_v20, %v5555_v52  ;;  %v5582_v23 = vrot.slane %v11133_v60, %v13688_v58  ;;  %v5589_v4 = vrot.slane %v13802_v31, %v13688_v58  ;;  %v11700_v33 = vcombine.low %v3189_v35, %v3196_v40  ;;  %v13806_v20 = vld [vmem:[#allocation60_spill] sm:$0xff]  ;;  %v13807_v52 = vld [vmem:[#allocation61_spill] sm:$0xff] }
 0x1c9   : > { %13801 = vst [vmem:[#allocation27_spill] sm:$0xff] %v11692_v49  ;;  %v11702_v47 = vcombine.low %v3203_v34, %v3210_v50  ;;  %v11704_v46 = vcombine.low %v3161_v55, %v3168_v19  ;;  %v11706_v26 = vcombine.low %v3175_v63, %v3182_v13  ;;  %v11710_v27 = vcombine.low %v3245_v24, %v3252_v16  ;;  %v13811_v63 = vld [vmem:[#allocation76_spill] sm:$0xff] }
 0x1ca   : > { %7367 = vperm.xlu0 %9596, %v5556_v18   ;;  %v5403_v56 = vcombine.low %v5395_v7, %v5402_v51  ;;  %v5429_v60 = vrot.slane %v13806_v20, %v13688_v58  ;;  %v5436_v11 = vrot.slane %v13807_v52, %v13688_v58  ;;  %v11716_v35 = vcombine.low %v3259_v53, %v3266_v22  ;;  %v11726_v18 = vpop.xlane.xlu1 %1201  ;;  %v13812_v7 = vld [vmem:[#allocation77_spill] sm:$0xff] }
 0x1cb   : > { %13803 = vst [vmem:[#allocation69_spill] sm:$0xff] %v11704_v46  ;;  %13804 = vst [vmem:[#allocation56_spill] sm:$0xff] %v11706_v26  ;;  %v3301_v40 = vrot.slane %v11315_v14, %v10502_v12  ;;  %v11720_v34 = vcombine.low %v3217_v57, %v3224_v37  ;;  %v11722_v50 = vcombine.low %v3231_v9, %v3238_v8  ;;  %v11740_v57 = vpop.xlane.xlu0 %1196  ;;  %v13813_v9 = vld [vmem:[#allocation62_spill] sm:$0xff]  ;;  %v13836_v26 = vld [vmem:[#allocation84_spill] sm:$0xff] }
 0x1cc   : > { %13805 = vst [vmem:[#allocation57_spill] sm:$0xff] %v11710_v27  ;;  %13808 = vst [vmem:[#allocation74_spill] sm:$0xff] %v11716_v35  ;;  %v3308_v55 = vrot.slane %v11315_v14, %v10505_v15  ;;  %7340 = vperm.xlu1 %9597, %v5403_v56   ;;  %v5590_v19 = vcombine.low %v5582_v23, %v5589_v4  ;;  %v5616_v13 = vrot.slane %v13811_v63, %v13688_v58  ;;  %v13814_v23 = vld [vmem:[#allocation63_spill] sm:$0xff] }
 0x1cd   : > { %13809 = vst [vmem:[#allocation60_spill] sm:$0xff] %v11720_v34  ;;  %13810 = vst [vmem:[#allocation61_spill] sm:$0xff] %v11722_v50  ;;  %v5623_v51 = vrot.slane %v13812_v7, %v13688_v58  ;;  %v3315_v24 = vrot.slane %v11315_v14, %v10513_v21  ;;  %v3322_v16 = vrot.slane %v11315_v14, %v10543_v3 }
 0x1ce   : > { %v3273_v53 = vrot.slane %v11327_v10, %v10502_v12  ;;  %v3280_v22 = vrot.slane %v11327_v10, %v10505_v15  ;;  %v3287_v4 = vrot.slane %v11327_v10, %v10513_v21  ;;  %7373 = vperm.xlu0 %9596, %v5590_v19   ;;  %v5437_v37 = vcombine.low %v5429_v60, %v5436_v11  ;;  %v11758_v11 = vpop.xlane.xlu1 %1211 }
 0x1cf   : > { %v5463_v8 = vrot.slane %v13813_v9, %v13688_v58  ;;  %v5470_v31 = vrot.slane %v13814_v23, %v13688_v58  ;;  %v3357_v14 = vrot.slane %v11349_v25, %v10502_v12  ;;  %v3364_v56 = vrot.slane %v11349_v25, %v10505_v15  ;;  %v11772_v50 = vpop.xlane.xlu0 %1206 }
 0x1d0   : > { %v3371_v20 = vrot.slane %v11349_v25, %v10513_v21  ;;  %v3294_v52 = vrot.slane %v11327_v10, %v10543_v3  ;;  %v3378_v60 = vrot.slane %v11349_v25, %v10543_v3  ;;  %7346 = vperm.xlu1 %9597, %v5437_v37   ;;  %v5624_v19 = vcombine.low %v5616_v13, %v5623_v51 }
 0x1d1   : > { %v5650_v63 = vrot.slane %v11229_v36, %v13688_v58  ;;  %v5657_v7 = vrot.slane %v11231_v45, %v13688_v58  ;;  %v11764_v9 = vcombine.low %v3301_v40, %v3308_v55  ;;  %v11766_v23 = vcombine.low %v3315_v24, %v3322_v16  ;;  %13817 = vst [vmem:[#allocation62_spill] sm:$0xff] %v11772_v50  ;;  %v13819_v36 = vld [vmem:[#allocation66_spill] sm:$0xff]  ;;  %v13820_v45 = vld [vmem:[#allocation67_spill] sm:$0xff] }
 0x1d2   : > { %v3329_v10 = vrot.slane %v11364_v62, %v10502_v12  ;;  %v3336_v25 = vrot.slane %v11364_v62, %v10505_v15  ;;  %v11774_v37 = vcombine.low %v3273_v53, %v3280_v22  ;;  %7379 = vperm.xlu0 %9596, %v5624_v19   ;;  %v5471_v13 = vcombine.low %v5463_v8, %v5470_v31  ;;  %v11790_v22 = vpop.xlane.xlu1 %1221 }
 0x1d3   : > { %13815 = vst [vmem:[#allocation76_spill] sm:$0xff] %v11764_v9  ;;  %13816 = vst [vmem:[#allocation77_spill] sm:$0xff] %v11766_v23  ;;  %v5497_v51 = vrot.slane %v13819_v36, %v13688_v58  ;;  %v5504_v40 = vrot.slane %v13820_v45, %v13688_v58  ;;  %v11780_v55 = vcombine.low %v3357_v14, %v3364_v56  ;;  %v13825_v14 = vld [vmem:[#allocation31_spill] sm:$0xff] }
 0x1d4   : > { %13818 = vst [vmem:[#allocation63_spill] sm:$0xff] %v11774_v37  ;;  %v11782_v24 = vcombine.low %v3287_v4, %v3294_v52  ;;  %v3343_v16 = vrot.slane %v11364_v62, %v10513_v21  ;;  %v3350_v34 = vrot.slane %v11364_v62, %v10543_v3  ;;  %v11788_v53 = vcombine.low %v3371_v20, %v3378_v60  ;;  %v13826_v4 = vld [vmem:[#allocation34_spill] sm:$0xff]  ;;  %v11804_v60 = vpop.xlane.xlu0 %1216  ;;  %v13830_v36 = vld [vmem:[#allocation75_spill] sm:$0xff] }
 0x1d5   : > { %13821 = vst [vmem:[#allocation66_spill] sm:$0xff] %v11780_v55  ;;  %13824 = vst [vmem:[#allocation91_spill] sm:$0xff] %v11790_v22  ;;  %7352 = vperm.xlu1 %9597, %v5471_v13   ;;  %v5658_v8 = vcombine.low %v5650_v63, %v5657_v7  ;;  %v5684_v31 = vrot.slane %v11237_v29, %v13688_v58  ;;  %v5691_v56 = vrot.slane %v13825_v14, %v13688_v58  ;;  %v13829_v7 = vld [vmem:[#allocation73_spill] sm:$0xff] }
 0x1d6   : > { %13822 = vst [vmem:[#allocation67_spill] sm:$0xff] %v11782_v24  ;;  %13823 = vst [vmem:[#allocation90_spill] sm:$0xff] %v11788_v53  ;;  %v3413_v52 = vrot.slane %v13826_v4, %v10502_v12  ;;  %v3420_v19 = vrot.slane %v13826_v4, %v10505_v15  ;;  %v3427_v62 = vrot.slane %v13826_v4, %v10513_v21  ;;  %v13831_v14 = vld [vmem:[#allocation25_spill] sm:$0xff] }
 0x1d7   : > { %v11802_v20 = vcombine.low %v3329_v10, %v3336_v25  ;;  %13828 = vst [vmem:[#allocation34_spill] sm:$0xff] %v11804_v60  ;;  %v3434_v63 = vrot.slane %v13826_v4, %v10543_v3  ;;  %7385 = vperm.xlu0 %9596, %v5658_v8   ;;  %v5505_v29 = vcombine.low %v5497_v51, %v5504_v40  ;;  %v11822_v51 = vpop.xlane.xlu1 %1231 }
 0x1d8   : > { %v5531_v13 = vrot.slane %v13829_v7, %v13688_v58  ;;  %v5538_v45 = vrot.slane %v13830_v36, %v13688_v58  ;;  %v3385_v24 = vrot.slane %v13831_v14, %v10502_v12  ;;  %v3392_v10 = vrot.slane %v13831_v14, %v10505_v15  ;;  %13833 = vst [vmem:[#allocation75_spill] sm:$0xff] %v11822_v51  ;;  %v13834_v7 = vld [vmem:[#allocation32_spill] sm:$0xff] }
 0x1d9   : > { %13827 = vst [vmem:[#allocation31_spill] sm:$0xff] %v11802_v20  ;;  %v3399_v25 = vrot.slane %v13831_v14, %v10513_v21  ;;  %v3406_v4 = vrot.slane %v13831_v14, %v10543_v3  ;;  %v11820_v8 = vcombine.low %v3343_v16, %v3350_v34  ;;  %7358 = vperm.xlu1 %9597, %v5505_v29   ;;  %v13835_v20 = vld [vmem:[#allocation40_spill] sm:$0xff]  ;;  %v11836_v29 = vpop.xlane.xlu0 %1226 }
 0x1da   : > { %v5692_v40 = vcombine.low %v5684_v31, %v5691_v56  ;;  %v5718_v36 = vrot.slane %v13834_v7, %v13688_v58  ;;  %v5725_v37 = vrot.slane %v13835_v20, %v13688_v58  ;;  %v3469_v46 = vrot.slane %v13836_v26, %v10502_v12  ;;  %13837 = vst [vmem:[#allocation25_spill] sm:$0xff] %v11836_v29  ;;  %v13839_v20 = vld [vmem:[#allocation78_spill] sm:$0xff]  ;;  %v13840_v7 = vld [vmem:[#allocation79_spill] sm:$0xff] }
 0x1db   : > { %13832 = vst [vmem:[#allocation73_spill] sm:$0xff] %v11820_v8  ;;  %v3476_v49 = vrot.slane %v13836_v26, %v10505_v15  ;;  %v3483_v34 = vrot.slane %v13836_v26, %v10513_v21  ;;  %v3490_v16 = vrot.slane %v13836_v26, %v10543_v3  ;;  %v11838_v31 = vcombine.low %v3413_v52, %v3420_v19  ;;  %v13844_v26 = vld [vmem:[#allocation86_spill] sm:$0xff]  ;;  %v11854_v19 = vpop.xlane.xlu1 %1241 }
 0x1dc   : > { %7391 = vperm.xlu0 %9596, %v5692_v40   ;;  %v5539_v56 = vcombine.low %v5531_v13, %v5538_v45  ;;  %v5565_v14 = vrot.slane %v13839_v20, %v13688_v58  ;;  %v5572_v8 = vrot.slane %v13840_v7, %v13688_v58  ;;  %v11844_v53 = vcombine.low %v3427_v62, %v3434_v63  ;;  %v13846_v45 = vld [vmem:[#allocation19_spill] sm:$0xff]  ;;  %v13852_v7 = vld [vmem:[#allocation80_spill] sm:$0xff] }
 0x1dd   : > { %13838 = vst [vmem:[#allocation32_spill] sm:$0xff] %v11838_v31  ;;  %v11846_v55 = vcombine.low %v3385_v24, %v3392_v10  ;;  %v11848_v51 = vcombine.low %v3399_v25, %v3406_v4  ;;  %v3441_v60 = vrot.slane %v13844_v26, %v10502_v12  ;;  %v3448_v52 = vrot.slane %v13844_v26, %v10505_v15  ;;  %v13847_v62 = vld [vmem:[#allocation35_spill] sm:$0xff]  ;;  %v11868_v20 = vpop.xlane.xlu0 %1236 }
 0x1de   : > { %13841 = vst [vmem:[#allocation40_spill] sm:$0xff] %v11844_v53  ;;  %13845 = vst [vmem:[#allocation79_spill] sm:$0xff] %v11854_v19  ;;  %7364 = vperm.xlu1 %9597, %v5539_v56   ;;  %v5726_v13 = vcombine.low %v5718_v36, %v5725_v37  ;;  %v5752_v40 = vrot.slane %v13846_v45, %v13688_v58  ;;  %v5759_v63 = vrot.slane %v13847_v62, %v13688_v58  ;;  %v13851_v37 = vld [vmem:[#allocation38_spill] sm:$0xff]  ;;  %v13854_v62 = vld [vmem:[#allocation55_spill] sm:$0xff] }
 0x1df   : > { %13842 = vst [vmem:[#allocation84_spill] sm:$0xff] %v11846_v55  ;;  %13843 = vst [vmem:[#allocation78_spill] sm:$0xff] %v11848_v51  ;;  %v11860_v24 = vcombine.low %v3469_v46, %v3476_v49  ;;  %v11862_v10 = vcombine.low %v3483_v34, %v3490_v16  ;;  %v3455_v25 = vrot.slane %v13844_v26, %v10513_v21  ;;  %v13853_v46 = vld [vmem:[#allocation81_spill] sm:$0xff]  ;;  %v13857_v55 = vld [vmem:[#allocation44_spill] sm:$0xff] }
 0x1e0   : > { %v3462_v4 = vrot.slane %v13844_v26, %v10543_v3  ;;  %13850 = vst [vmem:[#allocation35_spill] sm:$0xff] %v11868_v20  ;;  %v3525_v36 = vrot.slane %v13851_v37, %v10502_v12  ;;  %7397 = vperm.xlu0 %9596, %v5726_v13   ;;  %v5573_v56 = vcombine.low %v5565_v14, %v5572_v8  ;;  %v11886_v14 = vpop.xlane.xlu1 %1251  ;;  %v13860_v53 = vld [vmem:[#allocation17_spill] sm:$0xff] }
 0x1e1   : > { %13848 = vst [vmem:[#allocation86_spill] sm:$0xff] %v11860_v24  ;;  %13849 = vst [vmem:[#allocation19_spill] sm:$0xff] %v11862_v10  ;;  %v5599_v45 = vrot.slane %v13852_v7, %v13688_v58  ;;  %v5606_v49 = vrot.slane %v13853_v46, %v13688_v58  ;;  %v3532_v34 = vrot.slane %v13851_v37, %v10505_v15  ;;  %v13856_v7 = vld [vmem:[#allocation48_spill] sm:$0xff] }
 0x1e2   : > { %v3539_v16 = vrot.slane %v13851_v37, %v10513_v21  ;;  %v3546_v26 = vrot.slane %v13851_v37, %v10543_v3  ;;  %v3497_v51 = vrot.slane %v13854_v62, %v10502_v12  ;;  %v3504_v8 = vrot.slane %v13854_v62, %v10505_v15  ;;  %13855 = vst [vmem:[#allocation38_spill] sm:$0xff] %v11886_v14 }
 0x1e3   : > { %7370 = vperm.xlu1 %9597, %v5573_v56   ;;  %v5760_v13 = vcombine.low %v5752_v40, %v5759_v63  ;;  %v5786_v46 = vrot.slane %v13856_v7, %v13688_v58  ;;  %v5793_v10 = vrot.slane %v13857_v55, %v13688_v58  ;;  %v3581_v24 = vrot.slane %v11496_v42, %v10502_v12  ;;  %v11900_v56 = vpop.xlane.xlu0 %1246  ;;  %v13859_v55 = vld [vmem:[#allocation16_spill] sm:$0xff] }
 0x1e4   : > { %v3588_v37 = vrot.slane %v11496_v42, %v10505_v15  ;;  %v3511_v20 = vrot.slane %v13854_v62, %v10513_v21  ;;  %v3518_v14 = vrot.slane %v13854_v62, %v10543_v3  ;;  %13858 = vst [vmem:[#allocation80_spill] sm:$0xff] %v11900_v56  ;;  %v3595_v40 = vrot.slane %v11496_v42, %v10513_v21 }
 0x1e5   : > { %7403 = vperm.xlu0 %9596, %v5760_v13   ;;  %v5607_v63 = vcombine.low %v5599_v45, %v5606_v49  ;;  %v5633_v7 = vrot.slane %v13859_v55, %v13688_v58  ;;  %v5640_v31 = vrot.slane %v13860_v53, %v13688_v58  ;;  %v3602_v19 = vrot.slane %v11496_v42, %v10543_v3  ;;  %v11918_v49 = vpop.xlane.xlu1 %1261  ;;  %v13861_v53 = vld [vmem:[#allocation24_spill] sm:$0xff]  ;;  %v13862_v42 = vld [vmem:[#allocation33_spill] sm:$0xff] }
 0x1e6   : > { %v3553_v29 = vrot.slane %v11506_v2, %v10502_v12  ;;  %v3560_v62 = vrot.slane %v11506_v2, %v10505_v15  ;;  %v3567_v56 = vrot.slane %v11506_v2, %v10513_v21  ;;  %v3574_v45 = vrot.slane %v11506_v2, %v10543_v3 }
 0x1e7   : > { %7376 = vperm.xlu1 %9597, %v5607_v63   ;;  %v5794_v13 = vcombine.low %v5786_v46, %v5793_v10  ;;  %v5820_v55 = vrot.slane %v13861_v53, %v13688_v58  ;;  %v5827_v23 = vrot.slane %v13862_v42, %v13688_v58  ;;  %v11924_v9 = vcombine.low %v3525_v36, %v3532_v34  ;;  %v11932_v50 = vpop.xlane.xlu0 %1256  ;;  %v13866_v46 = vld [vmem:[#allocation18_spill] sm:$0xff]  ;;  %v13867_v53 = vld [vmem:[#allocation45_spill] sm:$0xff] }
 0x1e8   : > { %v11926_v22 = vcombine.low %v3539_v16, %v3546_v26  ;;  %v11928_v35 = vcombine.low %v3441_v60, %v3448_v52  ;;  %v11930_v27 = vcombine.low %v3455_v25, %v3462_v4  ;;  %v11934_v2 = vcombine.low %v3497_v51, %v3504_v8  ;;  %v13871_v4 = vld [vmem:[#allocation39_spill] sm:$0xff]  ;;  %v13872_v26 = vld [vmem:[#allocation41_spill] sm:$0xff] }
 0x1e9   : > { %7409 = vperm.xlu0 %9596, %v5794_v13   ;;  %v5641_v10 = vcombine.low %v5633_v7, %v5640_v31  ;;  %v5667_v63 = vrot.slane %v13866_v46, %v13688_v58  ;;  %v5674_v42 = vrot.slane %v13867_v53, %v13688_v58  ;;  %v11940_v36 = vcombine.low %v3581_v24, %v3588_v37  ;;  %v11950_v51 = vpop.xlane.xlu1 %1271  ;;  %v13874_v7 = vld [vmem:[#allocation83_spill] sm:$0xff]  ;;  %v13875_v53 = vld [vmem:[#allocation37_spill] sm:$0xff] }
 0x1ea   : > { %13863 = vst [vmem:[#allocation81_spill] sm:$0xff] %v11928_v35  ;;  %13864 = vst [vmem:[#allocation55_spill] sm:$0xff] %v11930_v27  ;;  %v11942_v34 = vcombine.low %v3595_v40, %v3602_v19  ;;  %v11944_v60 = vcombine.low %v3511_v20, %v3518_v14  ;;  %v11946_v52 = vcombine.low %v3553_v29, %v3560_v62 }
 0x1eb   : > { %13865 = vst [vmem:[#allocation48_spill] sm:$0xff] %v11934_v2  ;;  %v11948_v25 = vcombine.low %v3567_v56, %v3574_v45  ;;  %7382 = vperm.xlu1 %9597, %v5641_v10   ;;  %v5828_v31 = vcombine.low %v5820_v55, %v5827_v23  ;;  %v5854_v16 = vrot.slane %v13871_v4, %v13688_v58  ;;  %v11964_v14 = vpop.xlane.xlu0 %1266  ;;  %v13873_v56 = vld [vmem:[#allocation82_spill] sm:$0xff] }
 0x1ec   : > { %13868 = vst [vmem:[#allocation44_spill] sm:$0xff] %v11944_v60  ;;  %13869 = vst [vmem:[#allocation16_spill] sm:$0xff] %v11946_v52  ;;  %v5861_v8 = vrot.slane %v13872_v26, %v13688_v58  ;;  %v3637_v19 = vrot.slane %v11531_v39, %v10502_v12  ;;  %v3644_v24 = vrot.slane %v11531_v39, %v10505_v15 }
 0x1ed   : > { %13870 = vst [vmem:[#allocation17_spill] sm:$0xff] %v11948_v25  ;;  %v3651_v29 = vrot.slane %v11531_v39, %v10513_v21  ;;  %v3658_v20 = vrot.slane %v11531_v39, %v10543_v3  ;;  %v3609_v23 = vrot.slane %v11542_v41, %v10502_v12  ;;  %7415 = vperm.xlu0 %9596, %v5828_v31   ;;  %v11982_v46 = vpop.xlane.xlu1 %1281  ;;  %v13876_v31 = vld [vmem:[#allocation85_spill] sm:$0xff]  ;;  %v13879_v25 = vld [vmem:[#allocation46_spill] sm:$0xff] }
 0x1ee   : > { %v5675_v37 = vcombine.low %v5667_v63, %v5674_v42  ;;  %v5701_v40 = vrot.slane %v13873_v56, %v13688_v58  ;;  %v5708_v62 = vrot.slane %v13874_v7, %v13688_v58  ;;  %v3693_v45 = vrot.slane %v11566_v61, %v10502_v12 }
 0x1ef   : > { %v3616_v13 = vrot.slane %v11542_v41, %v10505_v15  ;;  %v3623_v39 = vrot.slane %v11542_v41, %v10513_v21  ;;  %v3630_v55 = vrot.slane %v11542_v41, %v10543_v3  ;;  %v3700_v10 = vrot.slane %v11566_v61, %v10505_v15 }
 0x1f0   : > { %7388 = vperm.xlu1 %9597, %v5675_v37   ;;  %v5862_v63 = vcombine.low %v5854_v16, %v5861_v8  ;;  %v5888_v42 = vrot.slane %v13875_v53, %v13688_v58  ;;  %v5895_v4 = vrot.slane %v13876_v31, %v13688_v58  ;;  %v3707_v26 = vrot.slane %v11566_v61, %v10513_v21  ;;  %v11996_v37 = vpop.xlane.xlu0 %1276  ;;  %v13878_v53 = vld [vmem:[#allocation36_spill] sm:$0xff] }
 0x1f1   : > { %v3714_v56 = vrot.slane %v11566_v61, %v10543_v3  ;;  %v3665_v41 = vrot.slane %v11576_v48, %v10502_v12  ;;  %v3672_v7 = vrot.slane %v11576_v48, %v10505_v15  ;;  %13877 = vst [vmem:[#allocation24_spill] sm:$0xff] %v11996_v37  ;;  %v11998_v16 = vcombine.low %v3637_v19, %v3644_v24  ;;  %v12014_v24 = vpop.xlane.xlu1 %1291 }
 0x1f2   : > { %7421 = vperm.xlu0 %9596, %v5862_v63   ;;  %v5709_v8 = vcombine.low %v5701_v40, %v5708_v62  ;;  %v5735_v31 = vrot.slane %v13878_v53, %v13688_v58  ;;  %v5742_v52 = vrot.slane %v13879_v25, %v13688_v58  ;;  %v12004_v60 = vcombine.low %v3651_v29, %v3658_v20  ;;  %v13890_v53 = vld [vmem:[#allocation88_spill] sm:$0xff] }
 0x1f3   : > { %v12006_v61 = vcombine.low %v3609_v23, %v3616_v13  ;;  %v12008_v2 = vcombine.low %v3623_v39, %v3630_v55  ;;  %v3679_v27 = vrot.slane %v11576_v48, %v10513_v21  ;;  %v3686_v19 = vrot.slane %v11576_v48, %v10543_v3  ;;  %13882 = vst [vmem:[#allocation45_spill] sm:$0xff] %v12014_v24 }
 0x1f4   : > { %7394 = vperm.xlu1 %9597, %v5709_v8   ;;  %v5896_v40 = vcombine.low %v5888_v42, %v5895_v4  ;;  %v5922_v62 = vrot.slane %v11484_v43, %v13688_v58  ;;  %v5929_v25 = vrot.slane %v11486_v59, %v13688_v58  ;;  %v12020_v29 = vcombine.low %v3693_v45, %v3700_v10  ;;  %v12028_v48 = vpop.xlane.xlu0 %1286  ;;  %v13886_v43 = vld [vmem:[#allocation23_spill] sm:$0xff]  ;;  %v13887_v59 = vld [vmem:[#allocation52_spill] sm:$0xff] }
 0x1f5   : > { %13880 = vst [vmem:[#allocation33_spill] sm:$0xff] %v12006_v61  ;;  %13881 = vst [vmem:[#allocation18_spill] sm:$0xff] %v12008_v2  ;;  %v12022_v20 = vcombine.low %v3707_v26, %v3714_v56  ;;  %v3749_v23 = vrot.slane %v11598_v38, %v10502_v12  ;;  %v12026_v13 = vcombine.low %v3665_v41, %v3672_v7  ;;  %v12046_v56 = vpop.xlane.xlu1 %1301  ;;  %v13889_v7 = vld [vmem:[#allocation87_spill] sm:$0xff] }
 0x1f6   : > { %13885 = vst [vmem:[#allocation82_spill] sm:$0xff] %v12028_v48  ;;  %v3756_v39 = vrot.slane %v11598_v38, %v10505_v15  ;;  %7427 = vperm.xlu0 %9596, %v5896_v40   ;;  %v5743_v55 = vcombine.low %v5735_v31, %v5742_v52  ;;  %v5769_v63 = vrot.slane %v13886_v43, %v13688_v58  ;;  %13888 = vst [vmem:[#allocation83_spill] sm:$0xff] %v12046_v56 }
 0x1f7   : > { %13883 = vst [vmem:[#allocation39_spill] sm:$0xff] %v12022_v20  ;;  %13884 = vst [vmem:[#allocation41_spill] sm:$0xff] %v12026_v13  ;;  %v5776_v45 = vrot.slane %v13887_v59, %v13688_v58  ;;  %v3763_v10 = vrot.slane %v11598_v38, %v10513_v21  ;;  %v3770_v42 = vrot.slane %v11598_v38, %v10543_v3  ;;  %v13893_v13 = vld [vmem:[#allocation49_spill] sm:$0xff] }
 0x1f8   : > { %v3721_v4 = vrot.slane %v11604_v44, %v10502_v12  ;;  %v3728_v26 = vrot.slane %v11604_v44, %v10505_v15  ;;  %v3735_v52 = vrot.slane %v11604_v44, %v10513_v21  ;;  %7400 = vperm.xlu1 %9597, %v5743_v55   ;;  %v5930_v41 = vcombine.low %v5922_v62, %v5929_v25  ;;  %v12060_v55 = vpop.xlane.xlu0 %1296 }
 0x1f9   : > { %v5956_v8 = vrot.slane %v13889_v7, %v13688_v58  ;;  %v5963_v31 = vrot.slane %v13890_v53, %v13688_v58  ;;  %v3805_v38 = vrot.slane %v11630_v6, %v10502_v12  ;;  %v3812_v40 = vrot.slane %v11630_v6, %v10505_v15  ;;  %13891 = vst [vmem:[#allocation37_spill] sm:$0xff] %v12060_v55  ;;  %v13892_v7 = vld [vmem:[#allocation22_spill] sm:$0xff]  ;;  %v13896_v55 = vld [vmem:[#allocation59_spill] sm:$0xff] }
 0x1fa   : > { %v3819_v43 = vrot.slane %v11630_v6, %v10513_v21  ;;  %v3742_v59 = vrot.slane %v11604_v44, %v10543_v3  ;;  %v3826_v62 = vrot.slane %v11630_v6, %v10543_v3  ;;  %7433 = vperm.xlu0 %9596, %v5930_v41   ;;  %v5777_v25 = vcombine.low %v5769_v63, %v5776_v45  ;;  %v12078_v63 = vpop.xlane.xlu1 %1311 }
 0x1fb   : > { %v5803_v53 = vrot.slane %v13892_v7, %v13688_v58  ;;  %v5810_v2 = vrot.slane %v13893_v13, %v13688_v58  ;;  %v3777_v61 = vrot.slane %v11640_v54, %v10502_v12  ;;  %v3784_v56 = vrot.slane %v11640_v54, %v10505_v15  ;;  %13894 = vst [vmem:[#allocation85_spill] sm:$0xff] %v12078_v63  ;;  %v13895_v13 = vld [vmem:[#allocation58_spill] sm:$0xff] }
 0x1fc   : > { %v3791_v44 = vrot.slane %v11640_v54, %v10513_v21  ;;  %v3798_v6 = vrot.slane %v11640_v54, %v10543_v3  ;;  %v12076_v41 = vcombine.low %v3679_v27, %v3686_v19  ;;  %7406 = vperm.xlu1 %9597, %v5777_v25   ;;  %v5964_v45 = vcombine.low %v5956_v8, %v5963_v31  ;;  %v12092_v54 = vpop.xlane.xlu0 %1306  ;;  %v13900_v8 = vld [vmem:[#allocation53_spill] sm:$0xff]  ;;  %v13901_v25 = vld [vmem:[#allocation54_spill] sm:$0xff] }
 0x1fd   : > { %v5990_v7 = vrot.slane %v13895_v13, %v13688_v58  ;;  %v5997_v48 = vrot.slane %v13896_v55, %v13688_v58  ;;  %v12084_v24 = vcombine.low %v3749_v23, %v3756_v39  ;;  %v12086_v35 = vcombine.low %v3763_v10, %v3770_v42  ;;  %13899 = vst [vmem:[#allocation23_spill] sm:$0xff] %v12092_v54  ;;  %v13909_v13 = vld [vmem:[#allocation70_spill] sm:$0xff] }
 0x1fe   : > { %v12088_v37 = vcombine.low %v3721_v4, %v3728_v26  ;;  %v12090_v20 = vcombine.low %v3735_v52, %v3742_v59  ;;  %v12094_v27 = vcombine.low %v3805_v38, %v3812_v40  ;;  %7439 = vperm.xlu0 %9596, %v5964_v45   ;;  %v5811_v19 = vcombine.low %v5803_v53, %v5810_v2  ;;  %v12110_v26 = vpop.xlane.xlu1 %1321  ;;  %v13905_v52 = vld [vmem:[#allocation47_spill] sm:$0xff]  ;;  %v13906_v40 = vld [vmem:[#allocation29_spill] sm:$0xff] }
 0x1ff   : > { %v5837_v31 = vrot.slane %v13900_v8, %v13688_v58  ;;  %v5844_v55 = vrot.slane %v13901_v25, %v13688_v58  ;;  %v12100_v23 = vcombine.low %v3819_v43, %v3826_v62  ;;  %v3861_v39 = vrot.slane %v11666_v1, %v10502_v12  ;;  %13904 = vst [vmem:[#allocation88_spill] sm:$0xff] %v12110_v26  ;;  %v13911_v26 = vld [vmem:[#allocation43_spill] sm:$0xff] }
 0x200   : > { %13897 = vst [vmem:[#allocation36_spill] sm:$0xff] %v12088_v37  ;;  %13898 = vst [vmem:[#allocation46_spill] sm:$0xff] %v12090_v20  ;;  %v12104_v10 = vcombine.low %v3777_v61, %v3784_v56  ;;  %v12106_v42 = vcombine.low %v3791_v44, %v3798_v6  ;;  %v3868_v4 = vrot.slane %v11666_v1, %v10505_v15  ;;  %7412 = vperm.xlu1 %9597, %v5811_v19   ;;  %v12124_v53 = vpop.xlane.xlu0 %1316  ;;  %v13908_v6 = vld [vmem:[#allocation68_spill] sm:$0xff] }
 0x201   : > { %v5998_v2 = vcombine.low %v5990_v7, %v5997_v48  ;;  %v6024_v38 = vrot.slane %v13905_v52, %v13688_v58  ;;  %v6031_v43 = vrot.slane %v13906_v40, %v13688_v58  ;;  %v3875_v59 = vrot.slane %v11666_v1, %v10513_v21  ;;  %13907 = vst [vmem:[#allocation22_spill] sm:$0xff] %v12124_v53 }
 0x202   : > { %13902 = vst [vmem:[#allocation52_spill] sm:$0xff] %v12104_v10  ;;  %13903 = vst [vmem:[#allocation87_spill] sm:$0xff] %v12106_v42  ;;  %v3882_v61 = vrot.slane %v11666_v1, %v10543_v3  ;;  %v3833_v56 = vrot.slane %v11670_v32, %v10502_v12  ;;  %v3840_v62 = vrot.slane %v11670_v32, %v10505_v15 }
 0x203   : > { %v3847_v48 = vrot.slane %v11670_v32, %v10513_v21  ;;  %7445 = vperm.xlu0 %9596, %v5998_v2   ;;  %v5845_v44 = vcombine.low %v5837_v31, %v5844_v55  ;;  %v5871_v45 = vrot.slane %v13908_v6, %v13688_v58  ;;  %v5878_v7 = vrot.slane %v13909_v13, %v13688_v58  ;;  %v12142_v55 = vpop.xlane.xlu1 %1331 }
 0x204   : > { %v3917_v1 = vrot.slane %v11694_v0, %v10502_v12  ;;  %v3924_v19 = vrot.slane %v11694_v0, %v10505_v15  ;;  %v3931_v8 = vrot.slane %v11694_v0, %v10513_v21  ;;  %v3854_v25 = vrot.slane %v11670_v32, %v10543_v3 }
 0x205   : > { %v3938_v31 = vrot.slane %v11694_v0, %v10543_v3  ;;  %7418 = vperm.xlu1 %9597, %v5845_v44   ;;  %v6032_v2 = vcombine.low %v6024_v38, %v6031_v43  ;;  %v6058_v52 = vrot.slane %v11618_v5, %v13688_v58  ;;  %v6065_v40 = vrot.slane %v11620_v30, %v13688_v58  ;;  %v12156_v44 = vpop.xlane.xlu0 %1326  ;;  %v13910_v30 = vld [vmem:[#allocation42_spill] sm:$0xff] }
 0x206   : > { %v3889_v6 = vrot.slane %v11708_v28, %v10502_v12  ;;  %v3896_v13 = vrot.slane %v11708_v28, %v10505_v15  ;;  %v3903_v32 = vrot.slane %v11708_v28, %v10513_v21  ;;  %v3910_v0 = vrot.slane %v11708_v28, %v10543_v3 }
 0x207   : > { %v12158_v38 = vcombine.low %v3861_v39, %v3868_v4  ;;  %7451 = vperm.xlu0 %9596, %v6032_v2   ;;  %v5879_v5 = vcombine.low %v5871_v45, %v5878_v7  ;;  %v5905_v43 = vrot.slane %v13910_v30, %v13688_v58  ;;  %v5912_v53 = vrot.slane %v13911_v26, %v13688_v58  ;;  %v12174_v39 = vpop.xlane.xlu1 %1341  ;;  %v13914_v7 = vld [vmem:[#allocation65_spill] sm:$0xff] }
 0x208   : > { %v12164_v63 = vcombine.low %v3875_v59, %v3882_v61  ;;  %v12166_v54 = vcombine.low %v3917_v1, %v3924_v19  ;;  %v12168_v42 = vcombine.low %v3833_v56, %v3840_v62  ;;  %v12170_v10 = vcombine.low %v3847_v48, %v3854_v25  ;;  %v13917_v19 = vld [vmem:[#allocation89_spill] sm:$0xff]  ;;  %v13918_v25 = vld [vmem:[#allocation71_spill] sm:$0xff] }
 0x209   : > { %v12172_v28 = vcombine.low %v3931_v8, %v3938_v31  ;;  %7424 = vperm.xlu1 %9597, %v5879_v5   ;;  %v6066_v4 = vcombine.low %v6058_v52, %v6065_v40  ;;  %v6092_v45 = vrot.slane %v11634_v17, %v13688_v58  ;;  %v6099_v26 = vrot.slane %v13914_v7, %v13688_v58  ;;  %v12188_v48 = vpop.xlane.xlu0 %1336 }
 0x20a   : > { %13912 = vst [vmem:[#allocation49_spill] sm:$0xff] %v12168_v42  ;;  %13913 = vst [vmem:[#allocation58_spill] sm:$0xff] %v12170_v10  ;;  %v3973_v59 = vrot.slane %v11726_v18, %v10502_v12  ;;  %v3980_v61 = vrot.slane %v11726_v18, %v10505_v15  ;;  %v12184_v56 = vcombine.low %v3889_v6, %v3896_v13 }
 0x20b   : > { %v12186_v62 = vcombine.low %v3903_v32, %v3910_v0  ;;  %v3987_v1 = vrot.slane %v11726_v18, %v10513_v21  ;;  %7457 = vperm.xlu0 %9596, %v6066_v4   ;;  %v5913_v17 = vcombine.low %v5905_v43, %v5912_v53  ;;  %v5939_v8 = vrot.slane %v13917_v19, %v13688_v58  ;;  %v12206_v13 = vpop.xlane.xlu1 %1351 }
 0x20c   : > { %13915 = vst [vmem:[#allocation59_spill] sm:$0xff] %v12184_v56  ;;  %v5946_v31 = vrot.slane %v13918_v25, %v13688_v58  ;;  %v3994_v2 = vrot.slane %v11726_v18, %v10543_v3  ;;  %v3945_v52 = vrot.slane %v11740_v57, %v10502_v12  ;;  %v3952_v40 = vrot.slane %v11740_v57, %v10505_v15 }
 0x20d   : > { %13916 = vst [vmem:[#allocation53_spill] sm:$0xff] %v12186_v62  ;;  %v3959_v6 = vrot.slane %v11740_v57, %v10513_v21  ;;  %v3966_v53 = vrot.slane %v11740_v57, %v10543_v3  ;;  %13919 = vst [vmem:[#allocation54_spill] sm:$0xff] %v12206_v13  ;;  %7430 = vperm.xlu1 %9597, %v5913_v17   ;;  %v6100_v32 = vcombine.low %v6092_v45, %v6099_v26  ;;  %v12220_v4 = vpop.xlane.xlu0 %1346  ;;  %v13922_v26 = vld [vmem:[#allocation20_spill] sm:$0xff]  ;;  %v13927_v62 = vld [vmem:[#allocation74_spill] sm:$0xff] }
 0x20e   : > { %v6126_v0 = vrot.slane %v11700_v33, %v13688_v58  ;;  %v6133_v18 = vrot.slane %v11702_v47, %v13688_v58  ;;  %v12212_v5 = vcombine.low %v3973_v59, %v3980_v61  ;;  %v4029_v30 = vrot.slane %v11758_v11, %v10502_v12  ;;  %13920 = vst [vmem:[#allocation47_spill] sm:$0xff] %v12220_v4  ;;  %v13921_v47 = vld [vmem:[#allocation72_spill] sm:$0xff]  ;;  %v13923_v61 = vld [vmem:[#allocation62_spill] sm:$0xff] }
 0x20f   : > { %v4036_v43 = vrot.slane %v11758_v11, %v10505_v15  ;;  %v4043_v57 = vrot.slane %v11758_v11, %v10513_v21  ;;  %v4050_v45 = vrot.slane %v11758_v11, %v10543_v3  ;;  %7463 = vperm.xlu0 %9596, %v6100_v32   ;;  %v5947_v33 = vcombine.low %v5939_v8, %v5946_v31  ;;  %v12238_v8 = vpop.xlane.xlu1 %1361  ;;  %v13971_v13 = vld [vmem:[#allocation80_spill] sm:$0xff] }
 0x210   : > { %v5973_v7 = vrot.slane %v13921_v47, %v13688_v58  ;;  %v5980_v59 = vrot.slane %v13922_v26, %v13688_v58  ;;  %v4001_v17 = vrot.slane %v13923_v61, %v10502_v12  ;;  %v4008_v19 = vrot.slane %v13923_v61, %v10505_v15  ;;  %13925 = vst [vmem:[#allocation68_spill] sm:$0xff] %v12238_v8  ;;  %v13926_v47 = vld [vmem:[#allocation57_spill] sm:$0xff] }
 0x211   : > { %v4015_v25 = vrot.slane %v13923_v61, %v10513_v21  ;;  %v4022_v11 = vrot.slane %v13923_v61, %v10543_v3  ;;  %v12236_v32 = vcombine.low %v3987_v1, %v3994_v2  ;;  %7436 = vperm.xlu1 %9597, %v5947_v33   ;;  %v6134_v31 = vcombine.low %v6126_v0, %v6133_v18  ;;  %v13931_v61 = vld [vmem:[#allocation91_spill] sm:$0xff]  ;;  %v12252_v2 = vpop.xlane.xlu0 %1356  ;;  %v13933_v33 = vld [vmem:[#allocation30_spill] sm:$0xff] }
 0x212   : > { %v6160_v26 = vrot.slane %v13926_v47, %v13688_v58  ;;  %v6167_v56 = vrot.slane %v13927_v62, %v13688_v58  ;;  %v12244_v10 = vcombine.low %v4029_v30, %v4036_v43  ;;  %v12246_v42 = vcombine.low %v3945_v52, %v3952_v40  ;;  %13932 = vst [vmem:[#allocation65_spill] sm:$0xff] %v12252_v2  ;;  %v13934_v62 = vld [vmem:[#allocation50_spill] sm:$0xff] }
 0x213   : > { %13924 = vst [vmem:[#allocation29_spill] sm:$0xff] %v12236_v32  ;;  %v12248_v4 = vcombine.low %v3959_v6, %v3966_v53  ;;  %v4085_v1 = vrot.slane %v13931_v61, %v10502_v12  ;;  %v4092_v0 = vrot.slane %v13931_v61, %v10505_v15  ;;  %7469 = vperm.xlu0 %9596, %v6134_v31   ;;  %v12270_v31 = vpop.xlane.xlu1 %1371 }
 0x214   : > { %13928 = vst [vmem:[#allocation70_spill] sm:$0xff] %v12244_v10  ;;  %13929 = vst [vmem:[#allocation42_spill] sm:$0xff] %v12246_v42  ;;  %v5981_v18 = vcombine.low %v5973_v7, %v5980_v59  ;;  %v6007_v47 = vrot.slane %v13933_v33, %v13688_v58  ;;  %v6014_v30 = vrot.slane %v13934_v62, %v13688_v58  ;;  %v13939_v59 = vld [vmem:[#allocation76_spill] sm:$0xff]  ;;  %v13941_v62 = vld [vmem:[#allocation34_spill] sm:$0xff] }
 0x215   : > { %13930 = vst [vmem:[#allocation43_spill] sm:$0xff] %v12248_v4  ;;  %v12260_v52 = vcombine.low %v4043_v57, %v4050_v45  ;;  %v4099_v40 = vrot.slane %v13931_v61, %v10513_v21  ;;  %v12264_v6 = vcombine.low %v4001_v17, %v4008_v19  ;;  %v12266_v53 = vcombine.low %v4015_v25, %v4022_v11  ;;  %v13940_v57 = vld [vmem:[#allocation77_spill] sm:$0xff]  ;;  %v12284_v11 = vpop.xlane.xlu0 %1366 }
 0x216   : > { %v4106_v43 = vrot.slane %v13931_v61, %v10543_v3  ;;  %13938 = vst [vmem:[#allocation20_spill] sm:$0xff] %v12270_v31  ;;  %7442 = vperm.xlu1 %9597, %v5981_v18   ;;  %v6168_v7 = vcombine.low %v6160_v26, %v6167_v56  ;;  %v6194_v33 = vrot.slane %v13939_v59, %v13688_v58  ;;  %13942 = vst [vmem:[#allocation62_spill] sm:$0xff] %v12284_v11  ;;  %v13944_v61 = vld [vmem:[#allocation51_spill] sm:$0xff]  ;;  %v13945_v59 = vld [vmem:[#allocation64_spill] sm:$0xff] }
 0x217   : > { %13935 = vst [vmem:[#allocation89_spill] sm:$0xff] %v12260_v52  ;;  %13936 = vst [vmem:[#allocation71_spill] sm:$0xff] %v12264_v6  ;;  %v6201_v45 = vrot.slane %v13940_v57, %v13688_v58  ;;  %v4057_v4 = vrot.slane %v13941_v62, %v10502_v12  ;;  %v4064_v17 = vrot.slane %v13941_v62, %v10505_v15  ;;  %v13970_v52 = vld [vmem:[#allocation19_spill] sm:$0xff] }
 0x218   : > { %13937 = vst [vmem:[#allocation72_spill] sm:$0xff] %v12266_v53  ;;  %v4071_v19 = vrot.slane %v13941_v62, %v10513_v21  ;;  %v4078_v25 = vrot.slane %v13941_v62, %v10543_v3  ;;  %v12286_v56 = vcombine.low %v4085_v1, %v4092_v0  ;;  %7475 = vperm.xlu0 %9596, %v6168_v7   ;;  %v13946_v53 = vld [vmem:[#allocation75_spill] sm:$0xff]  ;;  %v13949_v7 = vld [vmem:[#allocation66_spill] sm:$0xff] }
 0x219   : > { %v6015_v26 = vcombine.low %v6007_v47, %v6014_v30  ;;  %v6041_v18 = vrot.slane %v13944_v61, %v13688_v58  ;;  %v6048_v57 = vrot.slane %v13945_v59, %v13688_v58  ;;  %v4141_v6 = vrot.slane %v13946_v53, %v10502_v12  ;;  %v12302_v47 = vpop.xlane.xlu1 %1381  ;;  %v13950_v59 = vld [vmem:[#allocation90_spill] sm:$0xff] }
 0x21a   : > { %13943 = vst [vmem:[#allocation57_spill] sm:$0xff] %v12286_v56  ;;  %v4148_v42 = vrot.slane %v13946_v53, %v10505_v15  ;;  %v4155_v62 = vrot.slane %v13946_v53, %v10513_v21  ;;  %v4162_v1 = vrot.slane %v13946_v53, %v10543_v3  ;;  %v12300_v0 = vcombine.low %v4099_v40, %v4106_v43  ;;  %v13953_v56 = vld [vmem:[#allocation25_spill] sm:$0xff]  ;;  %v12316_v53 = vpop.xlane.xlu0 %1376 }
 0x21b   : > { %13948 = vst [vmem:[#allocation91_spill] sm:$0xff] %v12302_v47  ;;  %7448 = vperm.xlu1 %9597, %v6015_v26   ;;  %v6202_v30 = vcombine.low %v6194_v33, %v6201_v45  ;;  %v6228_v61 = vrot.slane %v13949_v7, %v13688_v58  ;;  %v6235_v11 = vrot.slane %v13950_v59, %v13688_v58  ;;  %13954 = vst [vmem:[#allocation76_spill] sm:$0xff] %v12316_v53  ;;  %v13955_v45 = vld [vmem:[#allocation26_spill] sm:$0xff]  ;;  %v13959_v7 = vld [vmem:[#allocation79_spill] sm:$0xff] }
 0x21c   : > { %13947 = vst [vmem:[#allocation74_spill] sm:$0xff] %v12300_v0  ;;  %v12308_v31 = vcombine.low %v4057_v4, %v4064_v17  ;;  %v12310_v2 = vcombine.low %v4071_v19, %v4078_v25  ;;  %v4113_v8 = vrot.slane %v13953_v56, %v10502_v12  ;;  %v4120_v40 = vrot.slane %v13953_v56, %v10505_v15  ;;  %v13956_v4 = vld [vmem:[#allocation27_spill] sm:$0xff] }
 0x21d   : > { %v4127_v43 = vrot.slane %v13953_v56, %v10513_v21  ;;  %7481 = vperm.xlu0 %9596, %v6202_v30   ;;  %v6049_v33 = vcombine.low %v6041_v18, %v6048_v57  ;;  %v6075_v26 = vrot.slane %v13955_v45, %v13688_v58  ;;  %v6082_v17 = vrot.slane %v13956_v4, %v13688_v58  ;;  %v12334_v18 = vpop.xlane.xlu1 %1391  ;;  %v13961_v45 = vld [vmem:[#allocation32_spill] sm:$0xff] }
 0x21e   : > { %13951 = vst [vmem:[#allocation30_spill] sm:$0xff] %v12308_v31  ;;  %13952 = vst [vmem:[#allocation50_spill] sm:$0xff] %v12310_v2  ;;  %v12324_v19 = vcombine.low %v4141_v6, %v4148_v42  ;;  %v12326_v25 = vcombine.low %v4155_v62, %v4162_v1  ;;  %v4197_v59 = vrot.slane %v13959_v7, %v10502_v12  ;;  %v13962_v42 = vld [vmem:[#allocation40_spill] sm:$0xff] }
 0x21f   : > { %v4134_v53 = vrot.slane %v13953_v56, %v10543_v3  ;;  %v4204_v30 = vrot.slane %v13959_v7, %v10505_v15  ;;  %13960 = vst [vmem:[#allocation51_spill] sm:$0xff] %v12334_v18  ;;  %7454 = vperm.xlu1 %9597, %v6049_v33   ;;  %v6236_v57 = vcombine.low %v6228_v61, %v6235_v11  ;;  %v13963_v56 = vld [vmem:[#allocation35_spill] sm:$0xff]  ;;  %v12348_v33 = vpop.xlane.xlu0 %1386  ;;  %v13966_v2 = vld [vmem:[#allocation56_spill] sm:$0xff] }
 0x220   : > { %13957 = vst [vmem:[#allocation77_spill] sm:$0xff] %v12324_v19  ;;  %13958 = vst [vmem:[#allocation34_spill] sm:$0xff] %v12326_v25  ;;  %v6262_v4 = vrot.slane %v13961_v45, %v13688_v58  ;;  %v6269_v6 = vrot.slane %v13962_v42, %v13688_v58  ;;  %v4211_v62 = vrot.slane %v13959_v7, %v10513_v21  ;;  %v13965_v45 = vld [vmem:[#allocation69_spill] sm:$0xff] }
 0x221   : > { %v4218_v1 = vrot.slane %v13959_v7, %v10543_v3  ;;  %v4169_v47 = vrot.slane %v13963_v56, %v10502_v12  ;;  %v4176_v18 = vrot.slane %v13963_v56, %v10505_v15  ;;  %13964 = vst [vmem:[#allocation64_spill] sm:$0xff] %v12348_v33  ;;  %v4183_v11 = vrot.slane %v13963_v56, %v10513_v21  ;;  %v13967_v7 = vld [vmem:[#allocation38_spill] sm:$0xff] }
 0x222   : > { %7487 = vperm.xlu0 %9596, %v6236_v57   ;;  %v6083_v61 = vcombine.low %v6075_v26, %v6082_v17  ;;  %v6109_v42 = vrot.slane %v13965_v45, %v13688_v58  ;;  %v6116_v31 = vrot.slane %v13966_v2, %v13688_v58  ;;  %v4253_v25 = vrot.slane %v13967_v7, %v10502_v12  ;;  %v12366_v17 = vpop.xlane.xlu1 %1401  ;;  %v13969_v2 = vld [vmem:[#allocation86_spill] sm:$0xff] }
 0x223   : > { %v4260_v19 = vrot.slane %v13967_v7, %v10505_v15  ;;  %v4267_v33 = vrot.slane %v13967_v7, %v10513_v21  ;;  %v4190_v0 = vrot.slane %v13963_v56, %v10543_v3  ;;  %v4274_v26 = vrot.slane %v13967_v7, %v10543_v3  ;;  %13968 = vst [vmem:[#allocation75_spill] sm:$0xff] %v12366_v17 }
 0x224   : > { %7460 = vperm.xlu1 %9597, %v6083_v61   ;;  %v6270_v57 = vcombine.low %v6262_v4, %v6269_v6  ;;  %v6296_v45 = vrot.slane %v13969_v2, %v13688_v58  ;;  %v6303_v10 = vrot.slane %v13970_v52, %v13688_v58  ;;  %v12372_v20 = vcombine.low %v4113_v8, %v4120_v40 }
 0x225   : > { %v12374_v37 = vcombine.low %v4127_v43, %v4134_v53  ;;  %v4225_v56 = vrot.slane %v13971_v13, %v10502_v12  ;;  %v4232_v7 = vrot.slane %v13971_v13, %v10505_v15  ;;  %v12380_v32 = vcombine.low %v4197_v59, %v4204_v30  ;;  %v12394_v53 = vpop.xlane.xlu0 %1396 }
 0x226   : > { %v12382_v61 = vcombine.low %v4211_v62, %v4218_v1  ;;  %v12384_v4 = vcombine.low %v4169_v47, %v4176_v18  ;;  %7493 = vperm.xlu0 %9596, %v6270_v57   ;;  %v6117_v6 = vcombine.low %v6109_v42, %v6116_v31  ;;  %v12386_v2 = vcombine.low %v4253_v25, %v4260_v19  ;;  %v12398_v59 = vpop.permute.xlu1 %7295  ;;  %v13974_v31 = vld [vmem:[#allocation60_spill] sm:$0xff]  ;;  %v13977_v57 = vld [vmem:[#allocation63_spill] sm:$0xff] }
 0x227   : > { %v12388_v8 = vcombine.low %v4183_v11, %v4190_v0  ;;  %v4239_v52 = vrot.slane %v13971_v13, %v10513_v21  ;;  %v4246_v40 = vrot.slane %v13971_v13, %v10543_v3  ;;  %13972 = vst [vmem:[#allocation66_spill] sm:$0xff] %v12394_v53  ;;  %v12396_v43 = vcombine.low %v4267_v33, %v4274_v26  ;;  %v13975_v0 = vld [vmem:[#allocation61_spill] sm:$0xff] }
 0x228   : > { %13973 = vst [vmem:[#allocation90_spill] sm:$0xff] %v12398_v59  ;;  %7466 = vperm.xlu1 %9597, %v6117_v6   ;;  %v6304_v47 = vcombine.low %v6296_v45, %v6303_v10  ;;  %v6143_v19 = vrot.slane %v13974_v31, %v13688_v58  ;;  %v6150_v25 = vrot.slane %v13975_v0, %v13688_v58  ;;  %v13982_v59 = vld [vmem:[#allocation73_spill] sm:$0xff] }
 0x229   : > { %v4309_v30 = vrot.slane %v11918_v49, %v10502_v12  ;;  %v4316_v13 = vrot.slane %v11918_v49, %v10505_v15  ;;  %v4323_v18 = vrot.slane %v11918_v49, %v10513_v21  ;;  %v12410_v62 = vcombine.low %v4225_v56, %v4232_v7  ;;  %v13978_v56 = vld [vmem:[#allocation67_spill] sm:$0xff] }
 0x22a   : > { %v4330_v10 = vrot.slane %v11918_v49, %v10543_v3  ;;  %7499 = vperm.xlu0 %9596, %v6304_v47   ;;  %v6151_v1 = vcombine.low %v6143_v19, %v6150_v25  ;;  %v6330_v33 = vrot.slane %v11924_v9, %v13688_v58  ;;  %v6337_v11 = vrot.slane %v11926_v22, %v13688_v58  ;;  %v12428_v6 = vpop.permute.xlu1 %7298 }
 0x22b   : > { %13976 = vst [vmem:[#allocation25_spill] sm:$0xff] %v12410_v62  ;;  %v4281_v42 = vrot.slane %v11932_v50, %v10502_v12  ;;  %v4288_v26 = vrot.slane %v11932_v50, %v10505_v15  ;;  %v6177_v45 = vrot.slane %v13977_v57, %v13688_v58  ;;  %v6184_v49 = vrot.slane %v13978_v56, %v13688_v58 }
 0x22c   : > { %v4295_v7 = vrot.slane %v11932_v50, %v10513_v21  ;;  %13979 = vst [vmem:[#allocation26_spill] sm:$0xff] %v12428_v6  ;;  %7472 = vperm.xlu1 %9597, %v6151_v1   ;;  %v6338_v9 = vcombine.low %v6330_v33, %v6337_v11  ;;  %v6364_v22 = vrot.slane %v11940_v36, %v13688_v58  ;;  %v12442_v1 = vpop.permute.xlu0 %7292 }
 0x22d   : > { %v6371_v47 = vrot.slane %v11942_v34, %v13688_v58  ;;  %v4365_v31 = vrot.slane %v11950_v51, %v10502_v12  ;;  %v4372_v19 = vrot.slane %v11950_v51, %v10505_v15  ;;  %v4379_v0 = vrot.slane %v11950_v51, %v10513_v21  ;;  %13980 = vst [vmem:[#allocation27_spill] sm:$0xff] %v12442_v1 }
 0x22e   : > { %v4302_v25 = vrot.slane %v11932_v50, %v10543_v3  ;;  %v4386_v36 = vrot.slane %v11950_v51, %v10543_v3  ;;  %v4337_v34 = vrot.slane %v11964_v14, %v10502_v12  ;;  %v4344_v33 = vrot.slane %v11964_v14, %v10505_v15  ;;  %7505 = vperm.xlu0 %9596, %v6338_v9   ;;  %v13981_v50 = vld [vmem:[#allocation31_spill] sm:$0xff]  ;;  %v12460_v17 = vpop.permute.xlu1 %7301 }
 0x22f   : > { %v6185_v11 = vcombine.low %v6177_v45, %v6184_v49  ;;  %v4351_v57 = vrot.slane %v11964_v14, %v10513_v21  ;;  %v4358_v56 = vrot.slane %v11964_v14, %v10543_v3  ;;  %v6211_v6 = vrot.slane %v13981_v50, %v13688_v58  ;;  %13983 = vst [vmem:[#allocation79_spill] sm:$0xff] %v12460_v17 }
 0x230   : > { %v6218_v51 = vrot.slane %v13982_v59, %v13688_v58  ;;  %v12458_v1 = vcombine.low %v4239_v52, %v4246_v40  ;;  %v6372_v53 = vcombine.low %v6364_v22, %v6371_v47  ;;  %v6398_v45 = vrot.slane %v11998_v16, %v13688_v58  ;;  %v12474_v52 = vpop.permute.xlu0 %7319 }
 0x231   : > { %7478 = vperm.xlu1 %9597, %v6185_v11   ;;  %v6405_v49 = vrot.slane %v12004_v60, %v13688_v58  ;;  %v12466_v9 = vcombine.low %v4309_v30, %v4316_v13  ;;  %v12468_v14 = vcombine.low %v4323_v18, %v4330_v10  ;;  %v12470_v50 = vcombine.low %v4281_v42, %v4288_v26  ;;  %v13988_v13 = vld [vmem:[#allocation84_spill] sm:$0xff]  ;;  %v13989_v10 = vld [vmem:[#allocation78_spill] sm:$0xff] }
 0x232   : > { %v12472_v62 = vcombine.low %v4295_v7, %v4302_v25  ;;  %13985 = vst [vmem:[#allocation40_spill] sm:$0xff] %v12474_v52  ;;  %v12476_v40 = vcombine.low %v4365_v31, %v4372_v19  ;;  %v12478_v59 = vcombine.low %v4379_v0, %v4386_v36  ;;  %v12480_v22 = vcombine.low %v4337_v34, %v4344_v33  ;;  %v12492_v7 = vpop.permute.xlu1 %7304  ;;  %v13992_v25 = vld [vmem:[#allocation24_spill] sm:$0xff] }
 0x233   : > { %7511 = vperm.xlu0 %9596, %v6372_v53   ;;  %v6219_v16 = vcombine.low %v6211_v6, %v6218_v51  ;;  %v4421_v60 = vrot.slane %v11982_v46, %v10502_v12  ;;  %v12484_v30 = vcombine.low %v4351_v57, %v4358_v56  ;;  %v6245_v18 = vrot.slane %v13988_v13, %v13688_v58  ;;  %v13991_v6 = vld [vmem:[#allocation39_spill] sm:$0xff]  ;;  %v13994_v57 = vld [vmem:[#allocation81_spill] sm:$0xff] }
 0x234   : > { %13984 = vst [vmem:[#allocation32_spill] sm:$0xff] %v12472_v62  ;;  %13986 = vst [vmem:[#allocation35_spill] sm:$0xff] %v12480_v22  ;;  %v6252_v42 = vrot.slane %v13989_v10, %v13688_v58  ;;  %v4428_v26 = vrot.slane %v11982_v46, %v10505_v15  ;;  %v6406_v47 = vcombine.low %v6398_v45, %v6405_v49  ;;  %v12506_v33 = vpop.permute.xlu0 %7325  ;;  %v13995_v51 = vld [vmem:[#allocation55_spill] sm:$0xff] }
 0x235   : > { %13987 = vst [vmem:[#allocation69_spill] sm:$0xff] %v12484_v30  ;;  %13990 = vst [vmem:[#allocation56_spill] sm:$0xff] %v12492_v7  ;;  %7484 = vperm.xlu1 %9597, %v6219_v16   ;;  %v6432_v53 = vrot.slane %v12020_v29, %v13688_v58  ;;  %v6439_v31 = vrot.slane %v13991_v6, %v13688_v58  ;;  %v4435_v19 = vrot.slane %v11982_v46, %v10513_v21 }
 0x236   : > { %v4442_v0 = vrot.slane %v11982_v46, %v10543_v3  ;;  %v4393_v36 = vrot.slane %v13992_v25, %v10502_v12  ;;  %v4400_v34 = vrot.slane %v13992_v25, %v10505_v15  ;;  %13993 = vst [vmem:[#allocation38_spill] sm:$0xff] %v12506_v33  ;;  %v4407_v29 = vrot.slane %v13992_v25, %v10513_v21  ;;  %v13996_v46 = vld [vmem:[#allocation45_spill] sm:$0xff] }
 0x237   : > { %7517 = vperm.xlu0 %9596, %v6406_v47   ;;  %v6253_v11 = vcombine.low %v6245_v18, %v6252_v42  ;;  %v6279_v56 = vrot.slane %v13994_v57, %v13688_v58  ;;  %v6286_v45 = vrot.slane %v13995_v51, %v13688_v58  ;;  %v4477_v49 = vrot.slane %v13996_v46, %v10502_v12  ;;  %v12524_v42 = vpop.permute.xlu1 %7307  ;;  %v13998_v51 = vld [vmem:[#allocation82_spill] sm:$0xff] }
 0x238   : > { %v4484_v16 = vrot.slane %v13996_v46, %v10505_v15  ;;  %v4491_v13 = vrot.slane %v13996_v46, %v10513_v21  ;;  %v4414_v10 = vrot.slane %v13992_v25, %v10543_v3  ;;  %v4498_v18 = vrot.slane %v13996_v46, %v10543_v3  ;;  %13997 = vst [vmem:[#allocation86_spill] sm:$0xff] %v12524_v42  ;;  %v14001_v42 = vld [vmem:[#allocation44_spill] sm:$0xff] }
 0x239   : > { %7490 = vperm.xlu1 %9597, %v6253_v11   ;;  %v6440_v47 = vcombine.low %v6432_v53, %v6439_v31  ;;  %v6466_v6 = vrot.slane %v12084_v24, %v13688_v58  ;;  %v6473_v57 = vrot.slane %v12086_v35, %v13688_v58  ;;  %v4449_v33 = vrot.slane %v13998_v51, %v10502_v12  ;;  %v12538_v11 = vpop.permute.xlu0 %7331  ;;  %v14000_v35 = vld [vmem:[#allocation48_spill] sm:$0xff] }
 0x23a   : > { %v4456_v52 = vrot.slane %v13998_v51, %v10505_v15  ;;  %v4463_v25 = vrot.slane %v13998_v51, %v10513_v21  ;;  %v4470_v46 = vrot.slane %v13998_v51, %v10543_v3  ;;  %13999 = vst [vmem:[#allocation19_spill] sm:$0xff] %v12538_v11  ;;  %v12540_v53 = vcombine.low %v4421_v60, %v4428_v26 }
 0x23b   : > { %7523 = vperm.xlu0 %9596, %v6440_v47   ;;  %v6287_v24 = vcombine.low %v6279_v56, %v6286_v45  ;;  %v6313_v31 = vrot.slane %v14000_v35, %v13688_v58  ;;  %v6320_v7 = vrot.slane %v14001_v42, %v13688_v58  ;;  %v12546_v17 = vcombine.low %v4435_v19, %v4442_v0  ;;  %v12556_v60 = vpop.permute.xlu1 %7310  ;;  %v14003_v19 = vld [vmem:[#allocation83_spill] sm:$0xff] }
 0x23c   : > { %v12548_v30 = vcombine.low %v4477_v49, %v4484_v16  ;;  %v12550_v22 = vcombine.low %v4393_v36, %v4400_v34  ;;  %v12552_v62 = vcombine.low %v4407_v29, %v4414_v10  ;;  %v12554_v51 = vcombine.low %v4491_v13, %v4498_v18  ;;  %14002 = vst [vmem:[#allocation80_spill] sm:$0xff] %v12556_v60  ;;  %v14007_v13 = vld [vmem:[#allocation16_spill] sm:$0xff]  ;;  %v14008_v10 = vld [vmem:[#allocation17_spill] sm:$0xff] }
 0x23d   : > { %7496 = vperm.xlu1 %9597, %v6287_v24   ;;  %v6474_v26 = vcombine.low %v6466_v6, %v6473_v57  ;;  %v6500_v56 = vrot.slane %v12094_v27, %v13688_v58  ;;  %v6507_v45 = vrot.slane %v12100_v23, %v13688_v58  ;;  %v4533_v0 = vrot.slane %v14003_v19, %v10502_v12  ;;  %v12570_v49 = vpop.permute.xlu0 %7337 }
 0x23e   : > { %v4540_v36 = vrot.slane %v14003_v19, %v10505_v15  ;;  %v12566_v34 = vcombine.low %v4449_v33, %v4456_v52  ;;  %v12568_v29 = vcombine.low %v4463_v25, %v4470_v46  ;;  %14006 = vst [vmem:[#allocation63_spill] sm:$0xff] %v12570_v49  ;;  %v6321_v27 = vcombine.low %v6313_v31, %v6320_v7  ;;  %v14032_v19 = vld [vmem:[#allocation68_spill] sm:$0xff] }
 0x23f   : > { %7529 = vperm.xlu0 %9596, %v6474_v26   ;;  %v6347_v23 = vrot.slane %v14007_v13, %v13688_v58  ;;  %v6354_v18 = vrot.slane %v14008_v10, %v13688_v58  ;;  %v4701_v6 = vrot.slane %v12142_v55, %v10502_v12  ;;  %v4708_v7 = vrot.slane %v12142_v55, %v10505_v15  ;;  %v12588_v57 = vpop.permute.xlu1 %7313 }
 0x240   : > { %14004 = vst [vmem:[#allocation60_spill] sm:$0xff] %v12566_v34  ;;  %14005 = vst [vmem:[#allocation61_spill] sm:$0xff] %v12568_v29  ;;  %v6508_v25 = vcombine.low %v6500_v56, %v6507_v45  ;;  %v6534_v46 = vrot.slane %v12158_v38, %v13688_v58  ;;  %v6541_v24 = vrot.slane %v12164_v63, %v13688_v58  ;;  %v14012_v63 = vld [vmem:[#allocation33_spill] sm:$0xff] }
 0x241   : > { %14010 = vst [vmem:[#allocation67_spill] sm:$0xff] %v12588_v57  ;;  %7502 = vperm.xlu1 %9597, %v6321_v27   ;;  %v12594_v35 = vcombine.low %v4533_v0, %v4540_v36  ;;  %v4715_v13 = vrot.slane %v12142_v55, %v10513_v21  ;;  %v12602_v10 = vpop.permute.xlu0 %7343  ;;  %v4722_v56 = vrot.slane %v12142_v55, %v10543_v3  ;;  %v14013_v0 = vld [vmem:[#allocation18_spill] sm:$0xff] }
 0x242   : > { %v6355_v38 = vcombine.low %v6347_v23, %v6354_v18  ;;  %v6381_v45 = vrot.slane %v14012_v63, %v13688_v58  ;;  %v6388_v36 = vrot.slane %v14013_v0, %v13688_v58  ;;  %v4673_v27 = vrot.slane %v12156_v44, %v10502_v12 }
 0x243   : > { %14011 = vst [vmem:[#allocation31_spill] sm:$0xff] %v12594_v35  ;;  %7535 = vperm.xlu0 %9596, %v6508_v25   ;;  %v4680_v16 = vrot.slane %v12156_v44, %v10505_v15  ;;  %v4687_v42 = vrot.slane %v12156_v44, %v10513_v21  ;;  %v4694_v55 = vrot.slane %v12156_v44, %v10543_v3  ;;  %v12620_v23 = vpop.permute.xlu1 %7316 }
 0x244   : > { %v12618_v25 = vcombine.low %v4701_v6, %v4708_v7  ;;  %14014 = vst [vmem:[#allocation73_spill] sm:$0xff] %v12620_v23  ;;  %v6542_v18 = vcombine.low %v6534_v46, %v6541_v24  ;;  %v6568_v63 = vrot.slane %v12166_v54, %v13688_v58  ;;  %v6575_v0 = vrot.slane %v12172_v28, %v13688_v58  ;;  %v14015_v28 = vld [vmem:[#allocation41_spill] sm:$0xff] }
 0x245   : > { %7508 = vperm.xlu1 %9597, %v6355_v38   ;;  %v4757_v31 = vrot.slane %v12174_v39, %v10502_v12  ;;  %v4764_v26 = vrot.slane %v12174_v39, %v10505_v15  ;;  %v4771_v44 = vrot.slane %v12174_v39, %v10513_v21  ;;  %v4778_v6 = vrot.slane %v12174_v39, %v10543_v3  ;;  %v12634_v7 = vpop.permute.xlu0 %7349  ;;  %v14027_v23 = vld [vmem:[#allocation89_spill] sm:$0xff] }
 0x246   : > { %v12636_v46 = vcombine.low %v4715_v13, %v4722_v56  ;;  %v6389_v54 = vcombine.low %v6381_v45, %v6388_v36  ;;  %v6415_v24 = vrot.slane %v14015_v28, %v13688_v58  ;;  %v6422_v38 = vrot.slane %v12076_v41, %v13688_v58 }
 0x247   : > { %7541 = vperm.xlu0 %9596, %v6542_v18   ;;  %v12642_v33 = vcombine.low %v4673_v27, %v4680_v16  ;;  %v12644_v47 = vcombine.low %v4687_v42, %v4694_v55  ;;  %v4729_v49 = vrot.slane %v12188_v48, %v10502_v12  ;;  %v4736_v39 = vrot.slane %v12188_v48, %v10505_v15  ;;  %v12652_v56 = vpop.permute.xlu1 %7322  ;;  %v14019_v16 = vld [vmem:[#allocation29_spill] sm:$0xff]  ;;  %v14020_v55 = vld [vmem:[#allocation54_spill] sm:$0xff] }
 0x248   : > { %v4743_v13 = vrot.slane %v12188_v48, %v10513_v21  ;;  %14018 = vst [vmem:[#allocation39_spill] sm:$0xff] %v12652_v56  ;;  %v6576_v45 = vcombine.low %v6568_v63, %v6575_v0  ;;  %v6602_v41 = vrot.slane %v12212_v5, %v13688_v58  ;;  %v6609_v42 = vrot.slane %v14019_v16, %v13688_v58  ;;  %v14021_v0 = vld [vmem:[#allocation36_spill] sm:$0xff] }
 0x249   : > { %14016 = vst [vmem:[#allocation84_spill] sm:$0xff] %v12642_v33  ;;  %14017 = vst [vmem:[#allocation78_spill] sm:$0xff] %v12644_v47  ;;  %7514 = vperm.xlu1 %9597, %v6389_v54   ;;  %v12658_v36 = vcombine.low %v4757_v31, %v4764_v26  ;;  %v12660_v27 = vcombine.low %v4771_v44, %v4778_v6  ;;  %v4813_v18 = vrot.slane %v14020_v55, %v10502_v12  ;;  %v12666_v11 = vpop.permute.xlu0 %7355  ;;  %v14022_v31 = vld [vmem:[#allocation46_spill] sm:$0xff] }
 0x24a   : > { %v4750_v28 = vrot.slane %v12188_v48, %v10543_v3  ;;  %v4820_v63 = vrot.slane %v14020_v55, %v10505_v15  ;;  %v6423_v5 = vcombine.low %v6415_v24, %v6422_v38  ;;  %v6449_v54 = vrot.slane %v14021_v0, %v13688_v58  ;;  %v14023_v48 = vld [vmem:[#allocation47_spill] sm:$0xff]  ;;  %v14026_v0 = vld [vmem:[#allocation70_spill] sm:$0xff] }
 0x24b   : > { %7547 = vperm.xlu0 %9596, %v6576_v45   ;;  %v6456_v26 = vrot.slane %v14022_v31, %v13688_v58  ;;  %v4827_v44 = vrot.slane %v14020_v55, %v10513_v21  ;;  %v4834_v6 = vrot.slane %v14020_v55, %v10543_v3  ;;  %v4785_v16 = vrot.slane %v14023_v48, %v10502_v12  ;;  %v12684_v24 = vpop.permute.xlu1 %7328 }
 0x24c   : > { %v4792_v56 = vrot.slane %v14023_v48, %v10505_v15  ;;  %v12682_v45 = vcombine.low %v4729_v49, %v4736_v39  ;;  %14025 = vst [vmem:[#allocation81_spill] sm:$0xff] %v12684_v24  ;;  %v6610_v38 = vcombine.low %v6602_v41, %v6609_v42  ;;  %v6636_v31 = vrot.slane %v14026_v0, %v13688_v58 }
 0x24d   : > { %7520 = vperm.xlu1 %9597, %v6423_v5   ;;  %v6643_v57 = vrot.slane %v14027_v23, %v13688_v58  ;;  %v12690_v60 = vcombine.low %v4743_v13, %v4750_v28  ;;  %v4799_v55 = vrot.slane %v14023_v48, %v10513_v21  ;;  %v4806_v35 = vrot.slane %v14023_v48, %v10543_v3  ;;  %v12699_v24 = vpop.permute.xlu0 %7361  ;;  %v14030_v5 = vld [vmem:[#allocation52_spill] sm:$0xff]  ;;  %v14031_v13 = vld [vmem:[#allocation87_spill] sm:$0xff] }
 0x24e   : > { %14024 = vst [vmem:[#allocation24_spill] sm:$0xff] %v12682_v45  ;;  %v14029_v49 = vlaneseq  ;;  %v12701_v41 = vcombine.low %v4813_v18, %v4820_v63  ;;  %v6457_v42 = vcombine.low %v6449_v54, %v6456_v26  ;;  %v6483_v23 = vrot.slane %v14030_v5, %v13688_v58  ;;  %v14035_v26 = vld [vmem:[#allocation57_spill] sm:$0xff] }
 0x24f   : > { %14028 = vst [vmem:[#allocation55_spill] sm:$0xff] %v12690_v60  ;;  %7553 = vperm.xlu0 %9596, %v6610_v38   ;;  %v6490_v28 = vrot.slane %v14031_v13, %v13688_v58  ;;  %v12707_v0 = vcombine.low %v4827_v44, %v4834_v6  ;;  %v4869_v48 = vrot.slane %v14032_v19, %v10502_v12  ;;  %v12717_v63 = vpop.permute.xlu1 %7334  ;;  %v14036_v44 = vld [vmem:[#allocation74_spill] sm:$0xff]  ;;  %v14037_v13 = vld [vmem:[#allocation65_spill] sm:$0xff] }
 0x250   : > { %v12697_v39 = vand.u32 127, %v14029_v49  ;;  %v4876_v49 = vrot.slane %v14032_v19, %v10505_v15  ;;  %v12713_v52 = vcombine.low %v4785_v16, %v4792_v56  ;;  %v4883_v18 = vrot.slane %v14032_v19, %v10513_v21  ;;  %14034 = vst [vmem:[#allocation82_spill] sm:$0xff] %v12717_v63 }
 0x251   : > { %7526 = vperm.xlu1 %9597, %v6457_v42   ;;  %v6644_v54 = vcombine.low %v6636_v31, %v6643_v57  ;;  %v6670_v38 = vrot.slane %v14035_v26, %v13688_v58  ;;  %v6677_v6 = vrot.slane %v14036_v44, %v13688_v58  ;;  %v4890_v5 = vrot.slane %v14032_v19, %v10543_v3  ;;  %v12730_v63 = vpop.permute.xlu0 %7367  ;;  %v14039_v42 = vld [vmem:[#allocation49_spill] sm:$0xff]  ;;  %v14040_v44 = vld [vmem:[#allocation58_spill] sm:$0xff] }
 0x252   : > { %14033 = vst [vmem:[#allocation45_spill] sm:$0xff] %v12713_v52  ;;  %v4841_v56 = vrot.slane %v14037_v13, %v10502_v12  ;;  %v4848_v16 = vrot.slane %v14037_v13, %v10505_v15  ;;  %v7681_v52 = vadd.s32 4294967288, %v12697_v39  ;;  %v12732_v57 = vcombine.low %v4799_v55, %v4806_v35  ;;  %v14041_v35 = vld [vmem:[#allocation21_spill] sm:$0xff] }
 0x253   : > { %7559 = vperm.xlu0 %9596, %v6644_v54   ;;  %v6491_v31 = vcombine.low %v6483_v23, %v6490_v28  ;;  %v6517_v26 = vrot.slane %v14039_v42, %v13688_v58  ;;  %v6524_v19 = vrot.slane %v14040_v44, %v13688_v58  ;;  %v12738_v60 = vcombine.low %v4869_v48, %v4876_v49  ;;  %v7341_v23 = vpop.permute.xlu1 %7340  ;;  %v14042_v54 = vld [vmem:[#allocation77_spill] sm:$0xff]  ;;  %v14043_v48 = vld [vmem:[#allocation34_spill] sm:$0xff] }
 0x254   : > { %14038 = vst [vmem:[#allocation48_spill] sm:$0xff] %v12732_v57  ;;  %v7688_v33 = vadd.s32 4294967280, %v12697_v39  ;;  %v12747_v55 = vsub.s32 %v12697_v39, %v14041_v35  ;;  %v6678_v28 = vcombine.low %v6670_v38, %v6677_v6  ;;  %v6704_v42 = vrot.slane %v14042_v54, %v13688_v58  ;;  %v14046_v6 = vld [vmem:[#allocation59_spill] sm:$0xff] }
 0x255   : > { %7532 = vperm.xlu1 %9597, %v6491_v31   ;;  %v6711_v49 = vrot.slane %v14043_v48, %v13688_v58  ;;  %v12753_v44 = vcombine.low %v4883_v18, %v4890_v5  ;;  %v12755_v45 = vcombine.low %v4841_v56, %v4848_v16  ;;  %v12758_v47 = vsub.s32 %v7681_v52, %v14041_v35  ;;  %v12761_v29 = vpop.permute.xlu0 %7373  ;;  %v14047_v48 = vld [vmem:[#allocation53_spill] sm:$0xff]  ;;  %v14048_v5 = vld [vmem:[#allocation20_spill] sm:$0xff] }
 0x256   : > { %v7695_v57 = vadd.s32 4294967272, %v12697_v39  ;;  %v7789_v31 = vrot.slane %v7341_v23, %v12747_v55  ;;  %v6525_v38 = vcombine.low %v6517_v26, %v6524_v19  ;;  %v6551_v54 = vrot.slane %v14046_v6, %v13688_v58 }
 0x257   : > { %14044 = vst [vmem:[#allocation44_spill] sm:$0xff] %v12753_v44  ;;  %14045 = vst [vmem:[#allocation16_spill] sm:$0xff] %v12755_v45  ;;  %7565 = vperm.xlu0 %9596, %v6678_v28   ;;  %v6558_v18 = vrot.slane %v14047_v48, %v13688_v58  ;;  %v12771_v52 = vsub.s32 %v7688_v33, %v14041_v35  ;;  %v7702_v16 = vadd.s32 4294967264, %v12697_v39  ;;  %v7347_v28 = vpop.permute.xlu1 %7346  ;;  %v7709_v33 = vadd.s32 4294967256, %v12697_v39 }
 0x258   : > { %v7793_v23 = vrot.slane %v12602_v10, %v12758_v47  ;;  %v6712_v26 = vcombine.low %v6704_v42, %v6711_v49  ;;  %v6738_v19 = vrot.slane %v12380_v32, %v13688_v58  ;;  %v6745_v6 = vrot.slane %v12382_v61, %v13688_v58  ;;  %v14049_v49 = vld [vmem:[#allocation42_spill] sm:$0xff] }
 0x259   : > { %7538 = vperm.xlu1 %9597, %v6525_v38   ;;  %v12781_v48 = vsub.s32 %v7695_v57, %v14041_v35  ;;  %v7798_v56 = vrot.slane %v7347_v28, %v12771_v52  ;;  %v12785_v45 = vpop.permute.xlu0 %7379  ;;  %v6559_v42 = vcombine.low %v6551_v54, %v6558_v18  ;;  %v6585_v32 = vrot.slane %v14049_v49, %v13688_v58  ;;  %v14050_v38 = vld [vmem:[#allocation43_spill] sm:$0xff] }
 0x25a   : > { %v7794_v10 = vsel %vm7686_vm0, %v7793_v23, %v7789_v31  ;;  %v6592_v61 = vrot.slane %v14050_v38, %v13688_v58  ;;  %v12793_v57 = vsub.s32 %v7702_v16, %v14041_v35  ;;  %v7716_v34 = vadd.s32 4294967248, %v12697_v39 }
 0x25b   : > { %7571 = vperm.xlu0 %9596, %v6712_v26   ;;  %v7799_v28 = vsel %vm7693_vm1, %v7798_v56, %v7794_v10  ;;  %v7803_v44 = vrot.slane %v12634_v7, %v12781_v48  ;;  %v7353_v31 = vpop.permute.xlu1 %7352  ;;  %v6746_v54 = vcombine.low %v6738_v19, %v6745_v6  ;;  %v6772_v18 = vrot.slane %v12386_v2, %v13688_v58  ;;  %v14051_v6 = vld [vmem:[#allocation71_spill] sm:$0xff] }
 0x25c   : > { %v6779_v23 = vrot.slane %v12396_v43, %v13688_v58  ;;  %v12804_v16 = vsub.s32 %v7709_v33, %v14041_v35  ;;  %v7723_v26 = vadd.s32 4294967240, %v12697_v39  ;;  %v7808_v56 = vrot.slane %v7353_v31, %v12793_v57 }
 0x25d   : > { %7544 = vperm.xlu1 %9597, %v6559_v42   ;;  %v12808_v10 = vpop.permute.xlu0 %7385  ;;  %v7804_v7 = vsel %vm7700_vm2, %v7803_v44, %v7799_v28  ;;  %v6593_v19 = vcombine.low %v6585_v32, %v6592_v61  ;;  %v6619_v2 = vrot.slane %v14051_v6, %v13688_v58  ;;  %v14052_v42 = vld [vmem:[#allocation72_spill] sm:$0xff]  ;;  %v7737_v49 = vadd.s32 4294967224, %v12697_v39 }
 0x25e   : > { %v6626_v43 = vrot.slane %v14052_v42, %v13688_v58  ;;  %v12817_v33 = vsub.s32 %v7716_v34, %v14041_v35  ;;  %v7730_v38 = vadd.s32 4294967232, %v12697_v39  ;;  %v7809_v31 = vsel %vm7707_vm3, %v7808_v56, %v7804_v7 }
 0x25f   : > { %7577 = vperm.xlu0 %9596, %v6746_v54   ;;  %v7813_v44 = vrot.slane %v12666_v11, %v12804_v16  ;;  %v7359_v28 = vpop.permute.xlu1 %7358  ;;  %v6780_v32 = vcombine.low %v6772_v18, %v6779_v23  ;;  %v6806_v61 = vrot.slane %v12466_v9, %v13688_v58  ;;  %v6813_v54 = vrot.slane %v12468_v14, %v13688_v58  ;;  %v14053_v18 = vld [vmem:[#allocation30_spill] sm:$0xff] }
 0x260   : > { %v12828_v34 = vsub.s32 %v7723_v26, %v14041_v35  ;;  %v7818_v6 = vrot.slane %v7359_v28, %v12817_v33  ;;  %v6627_v7 = vcombine.low %v6619_v2, %v6626_v43  ;;  %v6653_v23 = vrot.slane %v14053_v18, %v13688_v58  ;;  %v14054_v9 = vld [vmem:[#allocation50_spill] sm:$0xff] }
 0x261   : > { %7550 = vperm.xlu1 %9597, %v6593_v19   ;;  %v12831_v56 = vpop.permute.xlu0 %7391  ;;  %v7814_v11 = vsel %vm7714_vm4, %v7813_v44, %v7809_v31  ;;  %v6660_v19 = vrot.slane %v14054_v9, %v13688_v58  ;;  %v7751_v14 = vadd.s32 4294967208, %v12697_v39  ;;  %v12840_v42 = vsub.s32 %v7730_v38, %v14041_v35 }
 0x262   : > { %v7744_v26 = vadd.s32 4294967216, %v12697_v39  ;;  %v7819_v28 = vsel %vm7721_vm5, %v7818_v6, %v7814_v11  ;;  %v7823_v31 = vrot.slane %v12699_v24, %v12828_v34  ;;  %v6814_v2 = vcombine.low %v6806_v61, %v6813_v54 }
 0x263   : > { %7583 = vperm.xlu0 %9596, %v6780_v32   ;;  %v7365_v44 = vpop.permute.xlu1 %7364  ;;  %v6840_v43 = vrot.slane %v12476_v40, %v13688_v58  ;;  %v6847_v32 = vrot.slane %v12478_v59, %v13688_v58  ;;  %v12851_v18 = vsub.s32 %v7737_v49, %v14041_v35  ;;  %v6661_v11 = vcombine.low %v6653_v23, %v6660_v19 }
 0x264   : > { %v7828_v38 = vrot.slane %v7365_v44, %v12840_v42  ;;  %v7824_v24 = vsel %vm7728_vm6, %v7823_v31, %v7819_v28  ;;  %v6687_v61 = vrot.slane %v12372_v20, %v13688_v58  ;;  %v6694_v40 = vrot.slane %v12374_v37, %v13688_v58 }
 0x265   : > { %7556 = vperm.xlu1 %9597, %v6627_v7   ;;  %v12854_v6 = vpop.permute.xlu0 %7397  ;;  %v12862_v59 = vsub.s32 %v7751_v14, %v14041_v35  ;;  %v12865_v49 = vsub.s32 %v7744_v26, %v14041_v35  ;;  %v7758_v54 = vadd.s32 4294967200, %v12697_v39  ;;  %v7833_v9 = vrot.slane %v12730_v63, %v12851_v18 }
 0x266   : > { %v7829_v7 = vsel %vm7735_vm7, %v7828_v38, %v7824_v24  ;;  %v6848_v19 = vcombine.low %v6840_v43, %v6847_v32  ;;  %v6874_v20 = vrot.slane %v12540_v53, %v13688_v58  ;;  %v6881_v37 = vrot.slane %v12546_v17, %v13688_v58 }
 0x267   : > { %7589 = vperm.xlu0 %9596, %v6814_v2   ;;  %v7371_v23 = vpop.permute.xlu1 %7370  ;;  %v7765_v14 = vadd.s32 4294967192, %v12697_v39  ;;  %v7834_v31 = vsel %vm7742_vm8, %v7833_v9, %v7829_v7  ;;  %v6695_v63 = vcombine.low %v6687_v61, %v6694_v40  ;;  %v6721_v44 = vrot.slane %v12384_v4, %v13688_v58  ;;  %v14055_v7 = vld [vmem:[#allocation25_spill] sm:$0xff] }
 0x268   : > { %v7838_v26 = vrot.slane %v7371_v23, %v12865_v49  ;;  %v6728_v53 = vrot.slane %v12388_v8, %v13688_v58  ;;  %v7779_v17 = vadd.s32 4294967176, %v12697_v39  ;;  %v12886_v2 = vsub.s32 %v7758_v54, %v14041_v35 }
 0x269   : > { %7562 = vperm.xlu1 %9597, %v6661_v11   ;;  %v12877_v28 = vpop.permute.xlu0 %7403  ;;  %v7772_v43 = vadd.s32 4294967184, %v12697_v39  ;;  %v7843_v38 = vrot.slane %v12761_v29, %v12862_v59  ;;  %v6882_v11 = vcombine.low %v6874_v20, %v6881_v37  ;;  %v6908_v4 = vrot.slane %v12548_v30, %v13688_v58 }
 0x26a   : > { %v7839_v32 = vsel %vm7749_vm9, %v7838_v26, %v7834_v31  ;;  %v6915_v8 = vrot.slane %v12554_v51, %v13688_v58  ;;  %v12897_v61 = vsub.s32 %v7765_v14, %v14041_v35  ;;  %v6729_v54 = vcombine.low %v6721_v44, %v6728_v53 }
 0x26b   : > { %7595 = vperm.xlu0 %9596, %v6848_v19   ;;  %v7377_v24 = vpop.permute.xlu1 %7376  ;;  %v7844_v29 = vsel %vm7756_vm10, %v7843_v38, %v7839_v32  ;;  %v6755_v9 = vrot.slane %v14055_v7, %v13688_v58  ;;  %v6762_v30 = vrot.slane %v12458_v1, %v13688_v58  ;;  %v4932_v51 = vrot.slane %v14048_v5, %v10505_v15 }
 0x26c   : > { %v7848_v39 = vrot.slane %v7377_v24, %v12886_v2  ;;  %v12910_v23 = vsub.s32 %v7779_v17, %v14041_v35  ;;  %v12913_v19 = vsub.s32 %v7772_v43, %v14041_v35  ;;  %v7853_v37 = vrot.slane %v12785_v45, %v12897_v61 }
 0x26d   : > { %7568 = vperm.xlu1 %9597, %v6695_v63   ;;  %v12900_v40 = vpop.permute.xlu0 %7409  ;;  %v6916_v26 = vcombine.low %v6908_v4, %v6915_v8  ;;  %v7044_v1 = vrot.slane %v12618_v25, %v13688_v58  ;;  %v7051_v31 = vrot.slane %v12636_v46, %v13688_v58  ;;  %v6789_v44 = vrot.slane %v12470_v50, %v13688_v58  ;;  %v14056_v25 = vld [vmem:[#allocation32_spill] sm:$0xff] }
 0x26e   : > { %v7849_v20 = vsel %vm7763_vm11, %v7848_v39, %v7844_v29  ;;  %v7863_v45 = vrot.slane %v12808_v10, %v12910_v23  ;;  %v6763_v17 = vcombine.low %v6755_v9, %v6762_v30  ;;  %v6796_v43 = vrot.slane %v14056_v25, %v13688_v58 }
 0x26f   : > { %7601 = vperm.xlu0 %9596, %v6882_v11   ;;  %v7383_v14 = vpop.permute.xlu1 %7382  ;;  %v7854_v53 = vsel %vm7770_vm12, %v7853_v37, %v7849_v20  ;;  %v4939_v46 = vrot.slane %v14048_v5, %v10513_v21  ;;  %v4946_v32 = vrot.slane %v14048_v5, %v10543_v3  ;;  %v7052_v24 = vcombine.low %v7044_v1, %v7051_v31  ;;  %v14060_v37 = vld [vmem:[#allocation35_spill] sm:$0xff] }
 0x270   : > { %v7858_v63 = vrot.slane %v7383_v14, %v12913_v19  ;;  %v7078_v11 = vrot.slane %v12658_v36, %v13688_v58  ;;  %v7085_v4 = vrot.slane %v12660_v27, %v13688_v58  ;;  %v14057_v8 = vrot.slane %v14037_v13, %v10543_v3  ;;  %v14061_v14 = vld [vmem:[#allocation69_spill] sm:$0xff] }
 0x271   : > { %7574 = vperm.xlu1 %9597, %v6729_v54   ;;  %v12923_v35 = vpop.permute.xlu0 %7415  ;;  %v14058_v39 = vrot.slane %v14037_v13, %v10513_v21  ;;  %v14059_v54 = vld [vmem:[#allocation62_spill] sm:$0xff]  ;;  %v7872_v9 = vrot.slane %v12831_v56, %v12758_v47  ;;  %v6797_v20 = vcombine.low %v6789_v44, %v6796_v43  ;;  %v6823_v13 = vrot.slane %v14060_v37, %v13688_v58 }
 0x272   : > { %v7859_v38 = vsel %vm7777_vm13, %v7858_v63, %v7854_v53  ;;  %v4897_v7 = vrot.slane %v14059_v54, %v10502_v12  ;;  %v4904_v27 = vrot.slane %v14059_v54, %v10505_v15  ;;  %v14062_v1 = vrot.slane %v14048_v5, %v10502_v12 }
 0x273   : > { %7607 = vperm.xlu0 %9596, %v6916_v26   ;;  %v12938_v50 = vsel %vm7784_vm14, %v7863_v45, %v7859_v38  ;;  %v7389_v10 = vpop.permute.xlu1 %7388  ;;  %v12950_v29 = vcombine.low %v14058_v39, %v14057_v8  ;;  %v6830_v26 = vrot.slane %v14061_v14, %v13688_v58  ;;  %v4911_v56 = vrot.slane %v14059_v54, %v10513_v21 }
 0x274   : > { %v7868_v30 = vrot.slane %v7389_v10, %v12747_v55  ;;  %v12968_v31 = vcombine.low %v14062_v1, %v4932_v51  ;;  %v4918_v63 = vrot.slane %v14059_v54, %v10543_v3  ;;  %v12975_v44 = vcombine.low %v4939_v46, %v4946_v32  ;;  %v14063_v51 = vld [vmem:[#allocation91_spill] sm:$0xff]  ;;  %v14064_v10 = vld [vmem:[#allocation76_spill] sm:$0xff]  ;;  %v14074_v54 = vld [vmem:[#allocation66_spill] sm:$0xff] }
 0x275   : > { %7580 = vperm.xlu1 %9597, %v6763_v17   ;;  %v12957_v36 = vpop.permute.xlu0 %7421  ;;  %v7086_v17 = vcombine.low %v7078_v11, %v7085_v4  ;;  %v7112_v25 = vrot.slane %v12701_v41, %v13688_v58  ;;  %v7119_v5 = vrot.slane %v12707_v0, %v13688_v58  ;;  %v4981_v43 = vrot.slane %v14063_v51, %v10502_v12 }
 0x276   : > { %v7873_v45 = vsel %vm7686_vm0, %v7872_v9, %v7868_v30  ;;  %v4988_v38 = vrot.slane %v14063_v51, %v10505_v15  ;;  %v7882_v11 = vrot.slane %v12854_v6, %v12781_v48  ;;  %v6831_v41 = vcombine.low %v6823_v13, %v6830_v26 }
 0x277   : > { %7631 = vperm.xlu0 %9596, %v7052_v24   ;;  %v7395_v53 = vpop.permute.xlu1 %7394  ;;  %v4953_v24 = vrot.slane %v14064_v10, %v10502_v12  ;;  %v6857_v0 = vrot.slane %v12550_v22, %v13688_v58  ;;  %v6864_v4 = vrot.slane %v12552_v62, %v13688_v58  ;;  %v4960_v8 = vrot.slane %v14064_v10, %v10505_v15  ;;  %v14065_v62 = vld [vmem:[#allocation44_spill] sm:$0xff] }
 0x278   : > { %v7877_v46 = vrot.slane %v7395_v53, %v12771_v52  ;;  %v4967_v39 = vrot.slane %v14064_v10, %v10513_v21  ;;  %v4974_v9 = vrot.slane %v14064_v10, %v10543_v3  ;;  %v7120_v37 = vcombine.low %v7112_v25, %v7119_v5  ;;  %v14066_v25 = vld [vmem:[#allocation60_spill] sm:$0xff]  ;;  %v14067_v10 = vld [vmem:[#allocation61_spill] sm:$0xff] }
 0x279   : > { %7586 = vperm.xlu1 %9597, %v6797_v20   ;;  %v12988_v32 = vpop.permute.xlu0 %7427  ;;  %v7146_v22 = vrot.slane %v12738_v60, %v13688_v58  ;;  %v7153_v13 = vrot.slane %v14065_v62, %v13688_v58  ;;  %v4995_v14 = vrot.slane %v14063_v51, %v10513_v21  ;;  %v5002_v26 = vrot.slane %v14063_v51, %v10543_v3 }
 0x27a   : > { %v7878_v30 = vsel %vm7693_vm1, %v7877_v46, %v7873_v45  ;;  %v13012_v1 = vcombine.low %v4897_v7, %v4904_v27  ;;  %v6865_v60 = vcombine.low %v6857_v0, %v6864_v4  ;;  %v6891_v5 = vrot.slane %v14066_v25, %v13688_v58 }
 0x27b   : > { %7637 = vperm.xlu0 %9596, %v7086_v17   ;;  %v7401_v6 = vpop.permute.xlu1 %7400  ;;  %v7883_v20 = vsel %vm7700_vm2, %v7882_v11, %v7878_v30  ;;  %v7892_v17 = vrot.slane %v12877_v28, %v12804_v16  ;;  %v6898_v46 = vrot.slane %v14067_v10, %v13688_v58  ;;  %v13023_v11 = vcombine.low %v4981_v43, %v4988_v38  ;;  %v14069_v38 = vld [vmem:[#allocation64_spill] sm:$0xff] }
 0x27c   : > { %v7887_v45 = vrot.slane %v7401_v6, %v12793_v57  ;;  %v7189_v51 = vcombine.low %v4953_v24, %v4960_v8  ;;  %v7190_v7 = vcombine.low %v4967_v39, %v4974_v9  ;;  %v7154_v6 = vcombine.low %v7146_v22, %v7153_v13 }
 0x27d   : > { %7592 = vperm.xlu1 %9597, %v6831_v41   ;;  %v13015_v53 = vpop.permute.xlu0 %7433  ;;  %v7180_v28 = vrot.slane %v12968_v31, %v13688_v58  ;;  %v7187_v0 = vrot.slane %v12975_v44, %v13688_v58  ;;  %v7207_v4 = vcombine.low %v4995_v14, %v5002_v26  ;;  %v5009_v24 = vrot.slane %v14069_v38, %v10502_v12  ;;  %v14070_v31 = vld [vmem:[#allocation84_spill] sm:$0xff]  ;;  %v14071_v44 = vld [vmem:[#allocation78_spill] sm:$0xff] }
 0x27e   : > { %v7888_v27 = vsel %vm7707_vm3, %v7887_v45, %v7883_v20  ;;  %v7902_v9 = vrot.slane %v12900_v40, %v12828_v34  ;;  %v6899_v20 = vcombine.low %v6891_v5, %v6898_v46  ;;  %v7027_v22 = vrot.slane %v14070_v31, %v13688_v58 }
 0x27f   : > { %7643 = vperm.xlu0 %9596, %v7120_v37   ;;  %v7407_v41 = vpop.permute.xlu1 %7406  ;;  %v7893_v30 = vsel %vm7714_vm4, %v7892_v17, %v7888_v27  ;;  %v14068_v37 = vld [vmem:[#allocation51_spill] sm:$0xff]  ;;  %v7034_v62 = vrot.slane %v14071_v44, %v13688_v58  ;;  %v5016_v13 = vrot.slane %v14069_v38, %v10505_v15  ;;  %v5023_v14 = vrot.slane %v14069_v38, %v10513_v21 }
 0x280   : > { %v5037_v43 = vrot.slane %v14068_v37, %v10502_v12  ;;  %v7897_v8 = vrot.slane %v7407_v41, %v12817_v33  ;;  %v5030_v26 = vrot.slane %v14069_v38, %v10543_v3  ;;  %v7197_v25 = vrot.slane %v7189_v51, %v13688_v58 }
 0x281   : > { %7598 = vperm.xlu1 %9597, %v6865_v60   ;;  %v13036_v39 = vpop.permute.xlu0 %7439  ;;  %v7188_v60 = vcombine.low %v7180_v28, %v7187_v0  ;;  %v7204_v5 = vrot.slane %v7190_v7, %v13688_v58  ;;  %v5044_v10 = vrot.slane %v14068_v37, %v10505_v15  ;;  %v5051_v46 = vrot.slane %v14068_v37, %v10513_v21  ;;  %v14072_v7 = vld [vmem:[#allocation24_spill] sm:$0xff]  ;;  %v14073_v0 = vld [vmem:[#allocation55_spill] sm:$0xff] }
 0x282   : > { %v7898_v45 = vsel %vm7721_vm5, %v7897_v8, %v7893_v30  ;;  %v5058_v27 = vrot.slane %v14068_v37, %v10543_v3  ;;  %v7035_v51 = vcombine.low %v7027_v22, %v7034_v62  ;;  %v7061_v28 = vrot.slane %v14072_v7, %v13688_v58 }
 0x283   : > { %7649 = vperm.xlu0 %9596, %v7154_v6   ;;  %v7413_v40 = vpop.permute.xlu1 %7412  ;;  %v7903_v17 = vsel %vm7728_vm6, %v7902_v9, %v7898_v45  ;;  %v7912_v6 = vrot.slane %v12923_v35, %v12851_v18  ;;  %v7068_v38 = vrot.slane %v14073_v0, %v13688_v58  ;;  %v13075_v37 = vcombine.low %v4911_v56, %v4918_v63 }
 0x284   : > { %v7907_v41 = vrot.slane %v7413_v40, %v12840_v42  ;;  %v7223_v8 = vcombine.low %v5009_v24, %v5016_v13  ;;  %v7224_v9 = vcombine.low %v5023_v14, %v5030_v26  ;;  %v7205_v22 = vcombine.low %v7197_v25, %v7204_v5  ;;  %v14075_v26 = vld [vmem:[#allocation45_spill] sm:$0xff] }
 0x285   : > { %7604 = vperm.xlu1 %9597, %v6899_v20   ;;  %v13061_v30 = vpop.permute.xlu0 %7445  ;;  %v7214_v44 = vrot.slane %v13023_v11, %v13688_v58  ;;  %v7221_v62 = vrot.slane %v7207_v4, %v13688_v58  ;;  %v7240_v45 = vcombine.low %v5037_v43, %v5044_v10  ;;  %v7241_v40 = vcombine.low %v5051_v46, %v5058_v27  ;;  %v14076_v11 = vld [vmem:[#allocation48_spill] sm:$0xff] }
 0x286   : > { %v7908_v35 = vsel %vm7735_vm7, %v7907_v41, %v7903_v17  ;;  %v5065_v56 = vrot.slane %v14074_v54, %v10502_v12  ;;  %v7922_v13 = vrot.slane %v12957_v36, %v12862_v59  ;;  %v7069_v14 = vcombine.low %v7061_v28, %v7068_v38 }
 0x287   : > { %7655 = vperm.xlu0 %9596, %v7188_v60   ;;  %v7419_v20 = vpop.permute.xlu1 %7418  ;;  %v7913_v31 = vsel %vm7742_vm8, %v7912_v6, %v7908_v35  ;;  %v7095_v17 = vrot.slane %v14075_v26, %v13688_v58  ;;  %v7102_v4 = vrot.slane %v14076_v11, %v13688_v58  ;;  %v5072_v43 = vrot.slane %v14074_v54, %v10505_v15  ;;  %v14077_v6 = vld [vmem:[#allocation75_spill] sm:$0xff] }
 0x288   : > { %v7917_v63 = vrot.slane %v7419_v20, %v12865_v49  ;;  %v5079_v60 = vrot.slane %v14074_v54, %v10513_v21  ;;  %v5086_v25 = vrot.slane %v14074_v54, %v10543_v3  ;;  %v7222_v46 = vcombine.low %v7214_v44, %v7221_v62 }
 0x289   : > { %7628 = vperm.xlu1 %9597, %v7035_v51   ;;  %v13085_v24 = vpop.permute.xlu0 %7451  ;;  %v7231_v27 = vrot.slane %v7223_v8, %v13688_v58  ;;  %v7238_v41 = vrot.slane %v7224_v9, %v13688_v58  ;;  %v5093_v51 = vrot.slane %v14077_v6, %v10502_v12  ;;  %v5100_v7 = vrot.slane %v14077_v6, %v10505_v15  ;;  %v14078_v9 = vld [vmem:[#allocation16_spill] sm:$0xff] }
 0x28a   : > { %v7918_v5 = vsel %vm7749_vm9, %v7917_v63, %v7913_v31  ;;  %v5107_v28 = vrot.slane %v14077_v6, %v10513_v21  ;;  %v7932_v35 = vrot.slane %v12988_v32, %v12897_v61  ;;  %v7103_v8 = vcombine.low %v7095_v17, %v7102_v4  ;;  %v14079_v17 = vld [vmem:[#allocation37_spill] sm:$0xff] }
 0x28b   : > { %7658 = vperm.xlu0 %9596, %v7205_v22   ;;  %v7425_v36 = vpop.permute.xlu1 %7424  ;;  %v7923_v10 = vsel %vm7756_vm10, %v7922_v13, %v7918_v5  ;;  %v7129_v20 = vrot.slane %v14078_v9, %v13688_v58  ;;  %v7136_v31 = vrot.slane %v12950_v29, %v13688_v58  ;;  %v5114_v22 = vrot.slane %v14077_v6, %v10543_v3 }
 0x28c   : > { %v7927_v0 = vrot.slane %v7425_v36, %v12886_v2  ;;  %v7257_v44 = vcombine.low %v5065_v56, %v5072_v43  ;;  %v7258_v62 = vcombine.low %v5079_v60, %v5086_v25  ;;  %v7239_v32 = vcombine.low %v7231_v27, %v7238_v41  ;;  %v14084_v25 = vld [vmem:[#allocation23_spill] sm:$0xff] }
 0x28d   : > { %7634 = vperm.xlu1 %9597, %v7069_v14   ;;  %v13110_v38 = vpop.permute.xlu0 %7457  ;;  %v7248_v14 = vrot.slane %v7240_v45, %v13688_v58  ;;  %v7255_v26 = vrot.slane %v7241_v40, %v13688_v58  ;;  %v14080_v11 = vrot.slane %v14079_v17, %v10505_v15  ;;  %v14081_v29 = vrot.slane %v14079_v17, %v10502_v12 }
 0x28e   : > { %v7928_v54 = vsel %vm7763_vm11, %v7927_v0, %v7923_v10  ;;  %v14082_v56 = vrot.slane %v14079_v17, %v10543_v3  ;;  %v14083_v43 = vrot.slane %v14079_v17, %v10513_v21  ;;  %v4561_v5 = vrot.slane %v14084_v25, %v10502_v12 }
 0x28f   : > { %7661 = vperm.xlu0 %9596, %v7222_v46   ;;  %v7431_v63 = vpop.permute.xlu1 %7430  ;;  %v7933_v13 = vsel %vm7770_vm12, %v7932_v35, %v7928_v54  ;;  %v6917_v4 = vcombine.low %v14081_v29, %v14080_v11  ;;  %v7942_v36 = vrot.slane %v13015_v53, %v12910_v23  ;;  %v7137_v10 = vcombine.low %v7129_v20, %v7136_v31 }
 0x290   : > { %v6918_v60 = vcombine.low %v14083_v43, %v14082_v56  ;;  %v7937_v45 = vrot.slane %v7431_v63, %v12913_v19  ;;  %v7163_v46 = vrot.slane %v13012_v1, %v13688_v58  ;;  %v7170_v27 = vrot.slane %v13075_v37, %v13688_v58 }
 0x291   : > { %7640 = vperm.xlu1 %9597, %v7103_v8   ;;  %v13139_v40 = vpop.permute.xlu0 %7463  ;;  %v4568_v41 = vrot.slane %v14084_v25, %v10505_v15  ;;  %v7274_v6 = vcombine.low %v5093_v51, %v5100_v7  ;;  %v7275_v0 = vcombine.low %v5107_v28, %v5114_v22  ;;  %v7256_v53 = vcombine.low %v7248_v14, %v7255_v26  ;;  %v14085_v22 = vld [vmem:[#allocation83_spill] sm:$0xff]  ;;  %v14088_v14 = vld [vmem:[#allocation85_spill] sm:$0xff] }
 0x292   : > { %v7938_v35 = vsel %vm7777_vm13, %v7937_v45, %v7933_v13  ;;  %v7265_v20 = vrot.slane %v7257_v44, %v13688_v58  ;;  %v7272_v1 = vrot.slane %v7258_v62, %v13688_v58  ;;  %v4575_v37 = vrot.slane %v14084_v25, %v10513_v21 }
 0x293   : > { %7664 = vperm.xlu0 %9596, %v7239_v32   ;;  %v13151_v8 = vsel %vm7784_vm14, %v7942_v36, %v7938_v35  ;;  %v7437_v9 = vpop.permute.xlu1 %7436  ;;  %v4582_v31 = vrot.slane %v14084_v25, %v10543_v3  ;;  %v7951_v51 = vrot.slane %v13036_v39, %v12758_v47  ;;  %v14086_v54 = vrot.slane %v14085_v22, %v10543_v3  ;;  %v14089_v35 = vld [vmem:[#allocation31_spill] sm:$0xff] }
 0x294   : > { %v7947_v7 = vrot.slane %v7437_v9, %v12747_v55  ;;  %v14087_v44 = vrot.slane %v14085_v22, %v10513_v21  ;;  %v7171_v63 = vcombine.low %v7163_v46, %v7170_v27  ;;  %v6925_v13 = vrot.slane %v6917_v4, %v13688_v58 }
 0x295   : > { %7646 = vperm.xlu1 %9597, %v7137_v10   ;;  %v13162_v28 = vpop.permute.xlu0 %7469  ;;  %v6932_v32 = vrot.slane %v6918_v60, %v13688_v58  ;;  %v4589_v39 = vrot.slane %v14088_v14, %v10502_v12  ;;  %v4596_v26 = vrot.slane %v14088_v14, %v10505_v15  ;;  %v4603_v17 = vrot.slane %v14088_v14, %v10513_v21 }
 0x296   : > { %v6935_v62 = vcombine.low %v14087_v44, %v14086_v54  ;;  %v7952_v11 = vsel %vm7686_vm0, %v7951_v51, %v7947_v7  ;;  %v4610_v29 = vrot.slane %v14088_v14, %v10543_v3  ;;  %v7273_v43 = vcombine.low %v7265_v20, %v7272_v1  ;;  %v14091_v14 = vld [vmem:[#allocation88_spill] sm:$0xff] }
 0x297   : > { %7667 = vperm.xlu0 %9596, %v7256_v53   ;;  %v7443_v56 = vpop.permute.xlu1 %7442  ;;  %v7282_v4 = vrot.slane %v7274_v6, %v13688_v58  ;;  %v7289_v60 = vrot.slane %v7275_v0, %v13688_v58  ;;  %v6951_v25 = vcombine.low %v4561_v5, %v4568_v41  ;;  %v6952_v45 = vcombine.low %v4575_v37, %v4582_v31  ;;  %v14090_v5 = vld [vmem:[#allocation22_spill] sm:$0xff] }
 0x298   : > { %v7956_v36 = vrot.slane %v7443_v56, %v12771_v52  ;;  %v7961_v46 = vrot.slane %v13061_v30, %v12781_v48  ;;  %v6933_v27 = vcombine.low %v6925_v13, %v6932_v32  ;;  %v6942_v9 = vrot.slane %v14089_v35, %v13688_v58 }
 0x299   : > { %7652 = vperm.xlu1 %9597, %v7171_v63   ;;  %v13184_v10 = vpop.permute.xlu0 %7475  ;;  %v6949_v53 = vrot.slane %v6935_v62, %v13688_v58  ;;  %v6968_v20 = vcombine.low %v4589_v39, %v4596_v26  ;;  %v6969_v0 = vcombine.low %v4603_v17, %v4610_v29  ;;  %v4617_v41 = vrot.slane %v14090_v5, %v10502_v12 }
 0x29a   : > { %v7957_v6 = vsel %vm7693_vm1, %v7956_v36, %v7952_v11  ;;  %v7290_v31 = vcombine.low %v7282_v4, %v7289_v60  ;;  %v4624_v30 = vrot.slane %v14090_v5, %v10505_v15  ;;  %v4631_v51 = vrot.slane %v14090_v5, %v10513_v21 }
 0x29b   : > { %7670 = vperm.xlu0 %9596, %v7273_v43   ;;  %v7449_v1 = vpop.permute.xlu1 %7448  ;;  %v7962_v37 = vsel %vm7700_vm2, %v7961_v46, %v7957_v6  ;;  %v4638_v7 = vrot.slane %v14090_v5, %v10543_v3  ;;  %v7971_v44 = vrot.slane %v13085_v24, %v12804_v16  ;;  %v6950_v62 = vcombine.low %v6942_v9, %v6949_v53 }
 0x29c   : > { %v7966_v22 = vrot.slane %v7449_v1, %v12793_v57  ;;  %v6959_v63 = vrot.slane %v6951_v25, %v13688_v58  ;;  %v6966_v13 = vrot.slane %v6952_v45, %v13688_v58  ;;  %v4645_v39 = vrot.slane %v14091_v14, %v10502_v12 }
 0x29d   : > { %7610 = vperm.xlu1 %9597, %v6933_v27   ;;  %v7482_v54 = vpop.permute.xlu0 %7481  ;;  %v4652_v26 = vrot.slane %v14091_v14, %v10505_v15  ;;  %v4659_v17 = vrot.slane %v14091_v14, %v10513_v21  ;;  %v4666_v29 = vrot.slane %v14091_v14, %v10543_v3  ;;  %v6985_v56 = vcombine.low %v4617_v41, %v4624_v30 }
 0x29e   : > { %v7967_v32 = vsel %vm7707_vm3, %v7966_v22, %v7962_v37  ;;  %v6986_v43 = vcombine.low %v4631_v51, %v4638_v7  ;;  %v7981_v12 = vrot.slane %v13110_v38, %v12828_v34  ;;  %v6967_v25 = vcombine.low %v6959_v63, %v6966_v13 }
 0x29f   : > { %7673 = vperm.xlu0 %9596, %v7290_v31   ;;  %v7455_v11 = vpop.permute.xlu1 %7454  ;;  %v7972_v24 = vsel %vm7714_vm4, %v7971_v44, %v7967_v32  ;;  %v6976_v15 = vrot.slane %v6968_v20, %v13688_v58  ;;  %v6983_v21 = vrot.slane %v6969_v0, %v13688_v58  ;;  %v7002_v3 = vcombine.low %v4645_v39, %v4652_v26 }
 0x2a0   : > { %v7976_v4 = vrot.slane %v7455_v11, %v12817_v33  ;;  %v7003_v27 = vcombine.low %v4659_v17, %v4666_v29  ;;  %v7991_v53 = vrot.slane %v13139_v40, %v12851_v18  ;;  %v6993_v6 = vrot.slane %v6985_v56, %v13688_v58 }
 0x2a1   : > { %7613 = vperm.xlu1 %9597, %v6950_v62   ;;  %v7488_v60 = vpop.permute.xlu0 %7487  ;;  %v6984_v38 = vcombine.low %v6976_v15, %v6983_v21  ;;  %v7000_v20 = vrot.slane %v6986_v43, %v13688_v58  ;;  %v8001_v31 = vrot.slane %v13162_v28, %v12862_v59  ;;  %v7010_v40 = vrot.slane %v7002_v3, %v13688_v58 }
 0x2a2   : > { %v7977_v45 = vsel %vm7721_vm5, %v7976_v4, %v7972_v24  ;;  %v7017_v51 = vrot.slane %v7003_v27, %v13688_v58  ;;  %v8011_v13 = vrot.slane %v13184_v10, %v12897_v61  ;;  %v8021_v11 = vrot.slane %v7482_v54, %v12910_v23 }
 0x2a3   : > { %v7461_v36 = vpop.permute.xlu1 %7460  ;;  %v7982_v46 = vsel %vm7728_vm6, %v7981_v12, %v7977_v45  ;;  %v7001_v30 = vcombine.low %v6993_v6, %v7000_v20  ;;  %v8030_v10 = vrot.slane %v7488_v60, %v12758_v47 }
 0x2a4   : > { %v7986_v35 = vrot.slane %v7461_v36, %v12840_v42  ;;  %v7018_v32 = vcombine.low %v7010_v40, %v7017_v51 }
 0x2a5   : > { %7616 = vperm.xlu1 %9597, %v6967_v25   ;;  %v7494_v9 = vpop.permute.xlu0 %7493 }
 0x2a6   : > { %v7987_v0 = vsel %vm7735_vm7, %v7986_v35, %v7982_v46  ;;  %v8040_v45 = vrot.slane %v7494_v9, %v12781_v48 }
 0x2a7   : > { %v7467_v5 = vpop.permute.xlu1 %7466  ;;  %v7992_v41 = vsel %vm7742_vm8, %v7991_v53, %v7987_v0 }
 0x2a8   : > { %v7996_v1 = vrot.slane %v7467_v5, %v12865_v49 }
 0x2a9   : > { %7619 = vperm.xlu1 %9597, %v6984_v38   ;;  %v7500_v37 = vpop.permute.xlu0 %7499 }
 0x2aa   : > { %v7997_v7 = vsel %vm7749_vm9, %v7996_v1, %v7992_v41  ;;  %v8050_v60 = vrot.slane %v7500_v37, %v12804_v16 }
 0x2ab   : > { %v7473_v22 = vpop.permute.xlu1 %7472  ;;  %v8002_v44 = vsel %vm7756_vm10, %v8001_v31, %v7997_v7 }
 0x2ac   : > { %v8006_v62 = vrot.slane %v7473_v22, %v12886_v2 }
 0x2ad   : > { %7622 = vperm.xlu1 %9597, %v7001_v30   ;;  %v7506_v63 = vpop.permute.xlu0 %7505 }
 0x2ae   : > { %v8007_v28 = vsel %vm7763_vm11, %v8006_v62, %v8002_v44  ;;  %v8060_v9 = vrot.slane %v7506_v63, %v12828_v34 }
 0x2af   : > { %v8012_v39 = vsel %vm7770_vm12, %v8011_v13, %v8007_v28 }
 0x2b0   : > { %v7479_v14 = vpop.permute.xlu1 %7478 }
 0x2b1   : > { %7625 = vperm.xlu1 %9597, %v7018_v32   ;;  %v8016_v26 = vrot.slane %v7479_v14, %v12913_v19 }
 0x2b2   : > { %v7512_v17 = vpop.permute.xlu0 %7511 }
 0x2b3   : > { %v8017_v24 = vsel %vm7777_vm13, %v8016_v26, %v8012_v39  ;;  %v8070_v37 = vrot.slane %v7512_v17, %v12851_v18 }
 0x2b4   : > { %v13246_v29 = vsel %vm7784_vm14, %v8021_v11, %v8017_v24  ;;  %v7485_v56 = vpop.permute.xlu1 %7484 }
 0x2b5   : > { %v8026_v43 = vrot.slane %v7485_v56, %v12747_v55 }
 0x2b6   : > { %v7518_v4 = vpop.permute.xlu0 %7517 }
 0x2b7   : > { %v8031_v12 = vsel %vm7686_vm0, %v8030_v10, %v8026_v43  ;;  %v8080_v44 = vrot.slane %v7518_v4, %v12862_v59 }
 0x2b8   : > { %v7491_v25 = vpop.permute.xlu1 %7490 }
 0x2b9   : > { %v8035_v15 = vrot.slane %v7491_v25, %v12771_v52 }
 0x2ba   : > { %v7524_v21 = vpop.permute.xlu0 %7523 }
 0x2bb   : > { %v8036_v54 = vsel %vm7693_vm1, %v8035_v15, %v8031_v12  ;;  %v8090_v14 = vrot.slane %v7524_v21, %v12897_v61 }
 0x2bc   : > { %v7497_v36 = vpop.permute.xlu1 %7496  ;;  %v8041_v46 = vsel %vm7700_vm2, %v8040_v45, %v8036_v54  ;;  %v14092_v45 = vld [vmem:[#allocation27_spill] sm:$0xff] }
 0x2bd   : > { %v8045_v3 = vrot.slane %v7497_v36, %v12793_v57  ;;  %v7680_v54 = vrot.slane %v14092_v45, %v12747_v55 }
 0x2be   : > { %v7530_v27 = vpop.permute.xlu0 %7529 }
 0x2bf   : > { %v8046_v35 = vsel %vm7707_vm3, %v8045_v3, %v8041_v46  ;;  %v8100_v56 = vrot.slane %v7530_v27, %v12910_v23  ;;  %v14093_v27 = vld [vmem:[#allocation90_spill] sm:$0xff] }
 0x2c0   : > { %v7503_v53 = vpop.permute.xlu1 %7502  ;;  %v8051_v38 = vsel %vm7714_vm4, %v8050_v60, %v8046_v35  ;;  %v7685_v60 = vrot.slane %v14093_v27, %v12758_v47 }
 0x2c1   : > { %v8055_v6 = vrot.slane %v7503_v53, %v12817_v33  ;;  %v14094_v53 = vld [vmem:[#allocation26_spill] sm:$0xff] }
 0x2c2   : > { %v7536_v20 = vpop.permute.xlu0 %7535 }
 0x2c3   : > { %v8056_v0 = vsel %vm7721_vm5, %v8055_v6, %v8051_v38  ;;  %v8109_v12 = vrot.slane %v7536_v20, %v12758_v47  ;;  %v7692_v38 = vrot.slane %v14094_v53, %v12771_v52  ;;  %v7687_v20 = vsel %vm7686_vm0, %v7685_v60, %v7680_v54  ;;  %v14101_v60 = vld [vmem:[#allocation39_spill] sm:$0xff] }
 0x2c4   : > { %v7509_v5 = vpop.permute.xlu1 %7508  ;;  %v8061_v41 = vsel %vm7728_vm6, %v8060_v9, %v8056_v0  ;;  %v14095_v9 = vld [vmem:[#allocation79_spill] sm:$0xff] }
 0x2c5   : > { %v8065_v1 = vrot.slane %v7509_v5, %v12840_v42  ;;  %v7699_v0 = vrot.slane %v14095_v9, %v12781_v48 }
 0x2c6   : > { %v7542_v31 = vpop.permute.xlu0 %7541 }
 0x2c7   : > { %v8066_v30 = vsel %vm7735_vm7, %v8065_v1, %v8061_v41  ;;  %v8119_v35 = vrot.slane %v7542_v31, %v12781_v48  ;;  %v14096_v1 = vld [vmem:[#allocation56_spill] sm:$0xff]  ;;  %v14097_v31 = vld [vmem:[#allocation86_spill] sm:$0xff] }
 0x2c8   : > { %v7515_v40 = vpop.permute.xlu1 %7514  ;;  %v8071_v51 = vsel %vm7742_vm8, %v8070_v37, %v8066_v30  ;;  %v7706_v37 = vrot.slane %v14096_v1, %v12793_v57 }
 0x2c9   : > { %v8075_v7 = vrot.slane %v7515_v40, %v12865_v49 }
 0x2ca   : > { %v7548_v22 = vpop.permute.xlu0 %7547 }
 0x2cb   : > { %v8076_v62 = vsel %vm7749_vm9, %v8075_v7, %v8071_v51  ;;  %v7713_v51 = vrot.slane %v14097_v31, %v12804_v16  ;;  %v8129_v7 = vrot.slane %v7548_v22, %v12804_v16 }
 0x2cc   : > { %v7521_v63 = vpop.permute.xlu1 %7520  ;;  %v8081_v13 = vsel %vm7756_vm10, %v8080_v44, %v8076_v62  ;;  %v7694_v44 = vsel %vm7693_vm1, %v7692_v38, %v7687_v20  ;;  %v14098_v62 = vld [vmem:[#allocation80_spill] sm:$0xff] }
 0x2cd   : > { %v8085_v32 = vrot.slane %v7521_v63, %v12886_v2  ;;  %v7720_v63 = vrot.slane %v14098_v62, %v12817_v33 }
 0x2ce   : > { %v7554_v28 = vpop.permute.xlu0 %7553 }
 0x2cf   : > { %v8086_v39 = vsel %vm7763_vm11, %v8085_v32, %v8081_v13  ;;  %v7701_v32 = vsel %vm7700_vm2, %v7699_v0, %v7694_v44 }
 0x2d0   : > { %v7527_v26 = vpop.permute.xlu1 %7526  ;;  %v8091_v17 = vsel %vm7770_vm12, %v8090_v14, %v8086_v39  ;;  %v14099_v14 = vld [vmem:[#allocation67_spill] sm:$0xff] }
 0x2d1   : > { %v8095_v11 = vrot.slane %v7527_v26, %v12913_v19  ;;  %v7727_v39 = vrot.slane %v14099_v14, %v12828_v34 }
 0x2d2   : > { %v7560_v24 = vpop.permute.xlu0 %7559 }
 0x2d3   : > { %v8096_v10 = vsel %vm7777_vm13, %v8095_v11, %v8091_v17  ;;  %v7708_v11 = vsel %vm7707_vm3, %v7706_v37, %v7701_v32  ;;  %v8149_v20 = vrot.slane %v7560_v24, %v12851_v18  ;;  %v14103_v37 = vld [vmem:[#allocation81_spill] sm:$0xff] }
 0x2d4   : > { %v13279_v43 = vsel %vm7784_vm14, %v8100_v56, %v8096_v10  ;;  %v7533_v4 = vpop.permute.xlu1 %7532  ;;  %v14100_v56 = vld [vmem:[#allocation73_spill] sm:$0xff] }
 0x2d5   : > { %v8105_v25 = vrot.slane %v7533_v4, %v12747_v55  ;;  %v7734_v22 = vrot.slane %v14100_v56, %v12840_v42  ;;  %v14106_v56 = vld [vmem:[#allocation19_spill] sm:$0xff] }
 0x2d6   : > { %v7566_v15 = vpop.permute.xlu0 %7565 }
 0x2d7   : > { %v8110_v21 = vsel %vm7686_vm0, %v8109_v12, %v8105_v25  ;;  %v7715_v12 = vsel %vm7714_vm4, %v7713_v51, %v7708_v11  ;;  %v8139_v25 = vrot.slane %v7554_v28, %v12828_v34  ;;  %v14102_v28 = vld [vmem:[#allocation40_spill] sm:$0xff]  ;;  %v8159_v24 = vrot.slane %v7566_v15, %v12862_v59 }
 0x2d8   : > { %v7539_v36 = vpop.permute.xlu1 %7538 }
 0x2d9   : > { %v8114_v46 = vrot.slane %v7539_v36, %v12771_v52 }
 0x2da   : > { %v13287_v3 = vpop.permute.xlu0 %7571 }
 0x2db   : > { %v8115_v6 = vsel %vm7693_vm1, %v8114_v46, %v8110_v21  ;;  %v7722_v21 = vsel %vm7721_vm5, %v7720_v63, %v7715_v12  ;;  %v8169_v15 = vrot.slane %v13287_v3, %v12897_v61 }
 0x2dc   : > { %v7545_v5 = vpop.permute.xlu1 %7544  ;;  %v8120_v41 = vsel %vm7700_vm2, %v8119_v35, %v8115_v6  ;;  %v7729_v54 = vsel %vm7728_vm6, %v7727_v39, %v7722_v21  ;;  %v7748_v35 = vrot.slane %v14101_v60, %v12865_v49  ;;  %v7741_v6 = vrot.slane %v14102_v28, %v12851_v18  ;;  %v14105_v39 = vld [vmem:[#allocation82_spill] sm:$0xff] }
 0x2dd   : > { %v8124_v30 = vrot.slane %v7545_v5, %v12793_v57  ;;  %v7736_v27 = vsel %vm7735_vm7, %v7734_v22, %v7729_v54  ;;  %v7769_v22 = vrot.slane %v14106_v56, %v12897_v61 }
 0x2de   : > { %v7578_v40 = vpop.permute.xlu0 %7577  ;;  %v7743_v0 = vsel %vm7742_vm8, %v7741_v6, %v7736_v27 }
 0x2df   : > { %v8125_v13 = vsel %vm7707_vm3, %v8124_v30, %v8120_v41  ;;  %v7750_v1 = vsel %vm7749_vm9, %v7748_v35, %v7743_v0  ;;  %v7762_v30 = vrot.slane %v14103_v37, %v12886_v2  ;;  %v8179_v60 = vrot.slane %v7578_v40, %v12910_v23 }
 0x2e0   : > { %v7551_v26 = vpop.permute.xlu1 %7550  ;;  %v8130_v17 = vsel %vm7714_vm4, %v8129_v7, %v8125_v13  ;;  %v14104_v7 = vld [vmem:[#allocation38_spill] sm:$0xff] }
 0x2e1   : > { %v8134_v10 = vrot.slane %v7551_v26, %v12817_v33  ;;  %v7755_v44 = vrot.slane %v14104_v7, %v12862_v59  ;;  %v7776_v26 = vrot.slane %v14105_v39, %v12913_v19 }
 0x2e2   : > { %v13317_v4 = vpop.permute.xlu0 %7583 }
 0x2e3   : > { %v8135_v45 = vsel %vm7721_vm5, %v8134_v10, %v8130_v17  ;;  %v7757_v63 = vsel %vm7756_vm10, %v7755_v44, %v7750_v1 }
 0x2e4   : > { %v7557_v36 = vpop.permute.xlu1 %7556  ;;  %v8140_v46 = vsel %vm7728_vm6, %v8139_v25, %v8135_v45  ;;  %v7764_v14 = vsel %vm7763_vm11, %v7762_v30, %v7757_v63 }
 0x2e5   : > { %v8144_v53 = vrot.slane %v7557_v36, %v12840_v42  ;;  %v7771_v12 = vsel %vm7770_vm12, %v7769_v22, %v7764_v14 }
 0x2e6   : > { %v13329_v38 = vpop.permute.xlu0 %7589  ;;  %v7778_v45 = vsel %vm7777_vm13, %v7776_v26, %v7771_v12 }
 0x2e7   : > { %v8145_v9 = vsel %vm7735_vm7, %v8144_v53, %v8140_v46  ;;  %v14107_v46 = vld [vmem:[#allocation63_spill] sm:$0xff] }
 0x2e8   : > { %v7563_v5 = vpop.permute.xlu1 %7562  ;;  %v8150_v41 = vsel %vm7742_vm8, %v8149_v20, %v8145_v9  ;;  %v7783_v27 = vrot.slane %v14107_v46, %v12910_v23 }
 0x2e9   : > { %v8154_v31 = vrot.slane %v7563_v5, %v12865_v49 }
 0x2ea   : > { %v13341_v51 = vpop.permute.xlu0 %7595  ;;  %v7785_v35 = vsel %vm7784_vm14, %v7783_v27, %v7778_v45 }
 0x2eb   : > { %v8155_v62 = vsel %vm7749_vm9, %v8154_v31, %v8150_v41  ;;  %v13374_v6 = vsel %vm8339_vm15, %v13279_v43, %v7785_v35  ;;  %v8188_v35 = vrot.slane %v13317_v4, %v12758_v47 }
 0x2ec   : > { %v7569_v13 = vpop.permute.xlu1 %7568  ;;  %v8160_v32 = vsel %vm7756_vm10, %v8159_v24, %v8155_v62 }
 0x2ed   : > { %v8164_v17 = vrot.slane %v7569_v13, %v12886_v2 }
 0x2ee   : > { %v13353_v11 = vpop.permute.xlu0 %7601 }
 0x2ef   : > { %v8165_v10 = vsel %vm7763_vm11, %v8164_v17, %v8160_v32 }
 0x2f0   : > { %v7575_v25 = vpop.permute.xlu1 %7574  ;;  %v8170_v21 = vsel %vm7770_vm12, %v8169_v15, %v8165_v10 }
 0x2f1   : > { %v8174_v54 = vrot.slane %v7575_v25, %v12913_v19 }
 0x2f2   : > { %v13364_v36 = vpop.permute.xlu0 %7607 }
 0x2f3   : > { %v8175_v3 = vsel %vm7777_vm13, %v8174_v54, %v8170_v21 }
 0x2f4   : > { %v8180_v53 = vsel %vm7784_vm14, %v8179_v60, %v8175_v3  ;;  %v7581_v28 = vpop.permute.xlu1 %7580 }
 0x2f5   : > { %v13378_v20 = vsel %vm8339_vm15, %v8180_v53, %v12938_v50  ;;  %v8184_v54 = vrot.slane %v7581_v28, %v12747_v55 }
 0x2f6   : > { %v7632_v9 = vpop.permute.xlu0 %7631  ;;  %v8344_v0 = vcombine.low %v13374_v6, %v13378_v20  ;;  %v9603_v6 = vld [vmem:[#allocation10 + $0x1c8] sm:$0xff] (!%p9336_p5)  }
 0x2f7   : > { %v8267_v62 = vrot.slane %v7632_v9, %v12758_v47  ;;  %v9604_v20 = vld [vmem:[#allocation10 + $0x108] sm:$0xff] (!%p9336_p5)  }
 0x2f8   : > { %v7587_v40 = vpop.permute.xlu1 %7586 }
 0x2f9   : > { %v8193_v60 = vrot.slane %v7587_v40, %v12771_v52 }
 0x2fa   : > { %v7638_v5 = vpop.permute.xlu0 %7637 }
 0x2fb   : > { %v8277_v39 = vrot.slane %v7638_v5, %v12781_v48 }
 0x2fc   : > { %v7593_v41 = vpop.permute.xlu1 %7592 }
 0x2fd   : > { %v8203_v28 = vrot.slane %v7593_v41, %v12793_v57 }
 0x2fe   : > { %v7644_v1 = vpop.permute.xlu0 %7643 }
 0x2ff   : > { %v8287_v10 = vrot.slane %v7644_v1, %v12804_v16  ;;  %v8189_v1 = vsel %vm7686_vm0, %v8188_v35, %v8184_v54  ;;  %v8352_v35 = vrot.slane %v8344_v0, %v13688_v58  ;;  %v9606_v0 = vld [vmem:[#allocation10 + $0x150] sm:$0xff] (!%p9336_p5)  }
 0x300   : > { %v7599_v37 = vpop.permute.xlu1 %7598 }
 0x302   : > { %v7650_v30 = vpop.permute.xlu0 %7649 }
 0x303   : > { %v8297_v46 = vrot.slane %v7650_v30, %v12828_v34 }
 0x304   : > { %v7605_v31 = vpop.permute.xlu1 %7604 }
 0x306   : > { %v7656_v7 = vpop.permute.xlu0 %7655 }
 0x308   : > { %v7629_v44 = vpop.permute.xlu1 %7628 }
 0x309   : > { %v8263_v43 = vrot.slane %v7629_v44, %v12747_v55  ;;  %v8307_v44 = vrot.slane %v7656_v7, %v12851_v18  ;;  %v8194_v55 = vsel %vm7693_vm1, %v8193_v60, %v8189_v1  ;;  %v9598_v1 = vld [vmem:[#allocation10 + $0x140] sm:$0xff] (!%p9336_p5)  }
 0x30a   : > { %v7659_v63 = vpop.permute.xlu0 %7658  ;;  %9419 = vmatprep.subr.bf16.mxu0 (!%p9336_p5), %v9598_v1 }
 0x30b   : > { %v8268_v13 = vsel %vm7686_vm0, %v8267_v62, %v8263_v43  ;;  %v8312_v47 = vrot.slane %v7659_v63, %v12865_v49  ;;  %v8213_v62 = vrot.slane %v7599_v37, %v12817_v33  ;;  %vm8492_vm0 = vcmask (!%p9336_p5), 1040384  }
 0x30c   : > { %v7635_v24 = vpop.permute.xlu1 %7634 }
 0x30d   : > { %v8272_v50 = vrot.slane %v7635_v24, %v12771_v52  ;;  %v8198_v52 = vrot.slane %v13329_v38, %v12781_v48 }
 0x30e   : > { %v7662_v56 = vpop.permute.xlu0 %7661 }
 0x30f   : > { %v8273_v32 = vsel %vm7693_vm1, %v8272_v50, %v8268_v13  ;;  %v8199_v43 = vsel %vm7700_vm2, %v8198_v52, %v8194_v55  ;;  %v8317_v41 = vrot.slane %v7662_v56, %v12862_v59  ;;  %v8223_v13 = vrot.slane %v7605_v31, %v12840_v42  ;;  %v9602_v55 = vld [vmem:[#allocation10 + $0x148] sm:$0xff] (!%p9336_p5)   ;;  %v9608_v52 = vld [vmem:[#allocation10 + $0x110] sm:$0xff] (!%p9336_p5)  }
 0x310   : > { %v7641_v14 = vpop.permute.xlu1 %7640  ;;  %v8278_v17 = vsel %vm7700_vm2, %v8277_v39, %v8273_v32  ;;  %v8204_v24 = vsel %vm7707_vm3, %v8203_v28, %v8199_v43  ;;  %v9607_v28 = vld [vmem:[#allocation10 + $0x1d0] sm:$0xff] (!%p9336_p5)   ;;  %v9613_v43 = vld [vmem:[#allocation10 + $0x198] sm:$0xff] (!%p9336_p5)   ;;  %vm9212_vm1 = vcmask (!%p9336_p5), 1041408  }
 0x311   : > { %v8282_v26 = vrot.slane %v7641_v14, %v12793_v57  ;;  %v8208_v57 = vrot.slane %v13341_v51, %v12804_v16 }
 0x312   : > { %v7665_v3 = vpop.permute.xlu0 %7664 }
 0x313   : > { %v8283_v22 = vsel %vm7707_vm3, %v8282_v26, %v8278_v17  ;;  %v8209_v38 = vsel %vm7714_vm4, %v8208_v57, %v8204_v24  ;;  %v8322_v32 = vrot.slane %v7665_v3, %v12886_v2  ;;  %v9614_v24 = vld [vmem:[#allocation10 + $0x160] sm:$0xff] (!%p9336_p5)  }
 0x314   : > { %v7647_v15 = vpop.permute.xlu1 %7646  ;;  %v8288_v25 = vsel %vm7714_vm4, %v8287_v10, %v8283_v22  ;;  %v8214_v63 = vsel %vm7721_vm5, %v8213_v62, %v8209_v38  ;;  %v9615_v62 = vld [vmem:[#allocation10 + $0x1e0] sm:$0xff] (!%p9336_p5)   ;;  %v9620_v38 = vld [vmem:[#allocation10 + $0x128] sm:$0xff] (!%p9336_p5)  }
 0x315   : > { %v8292_v12 = vrot.slane %v7647_v15, %v12817_v33  ;;  %v8218_v33 = vrot.slane %v13353_v11, %v12828_v34  ;;  %v9617_v57 = vld [vmem:[#allocation10 + $0x1a0] sm:$0xff] (!%p9336_p5)  }
 0x316   : > { %v7668_v4 = vpop.permute.xlu0 %7667 }
 0x317   : > { %v8293_v21 = vsel %vm7721_vm5, %v8292_v12, %v8288_v25  ;;  %v8219_v51 = vsel %vm7728_vm6, %v8218_v33, %v8214_v63  ;;  %v8327_v39 = vrot.slane %v7668_v4, %v12897_v61  ;;  %v9611_v4 = vld [vmem:[#allocation10 + $0x1d8] sm:$0xff] (!%p9336_p5)   ;;  %v9622_v63 = vld [vmem:[#allocation10 + $0x170] sm:$0xff] (!%p9336_p5)  }
 0x318   : > { %v7653_v45 = vpop.permute.xlu1 %7652  ;;  %v8298_v53 = vsel %vm7728_vm6, %v8297_v46, %v8293_v21  ;;  %v8224_v26 = vsel %vm7735_vm7, %v8223_v13, %v8219_v51  ;;  %v9623_v13 = vld [vmem:[#allocation10 + $0x1f0] sm:$0xff] (!%p9336_p5)   ;;  %v9626_v33 = vld [vmem:[#allocation10 + $0x178] sm:$0xff] (!%p9336_p5)  }
 0x319   : > { %v8302_v27 = vrot.slane %v7653_v45, %v12840_v42  ;;  %v8228_v42 = vrot.slane %v13364_v36, %v12851_v18  ;;  %v9629_v51 = vld [vmem:[#allocation10 + $0x1b8] sm:$0xff] (!%p9336_p5)  }
 0x31a   : > { %v7671_v14 = vpop.permute.xlu0 %7670 }
 0x31b   : > { %v8303_v9 = vsel %vm7735_vm7, %v8302_v27, %v8298_v53  ;;  %v8332_v34 = vrot.slane %v7671_v14, %v12913_v19  ;;  %v8229_v10 = vsel %vm7742_vm8, %v8228_v42, %v8224_v26  ;;  %v9625_v14 = vld [vmem:[#allocation10 + $0x1b0] sm:$0xff] (!%p9336_p5)   ;;  %v9631_v42 = vld [vmem:[#allocation10 + $0xc0] sm:$0xff] (!%p9336_p5)  }
 0x31c   : > { %v7611_v5 = vpop.permute.xlu1 %7610  ;;  %v8308_v40 = vsel %vm7742_vm8, %v8307_v44, %v8303_v9  ;;  %v250_v9 = vld [vmem:[#allocation2] sm:$0xff]  ;;  %v9600_v44 = vld [vmem:[#allocation10 + $0x100] sm:$0xff] (!%p9336_p5)  }
 0x31d   : > { %v8313_v7 = vsel %vm7749_vm9, %v8312_v47, %v8308_v40  ;;  %v8233_v17 = vrot.slane %v7611_v5, %v12865_v49  ;;  %9420 = vmatpush3.bf16.msra.mxu0 (!%p9336_p5), %v9600_v44  ;;  %v9609_v40 = vld [vmem:[#allocation10 + $0x190] sm:$0xff] (!%p9336_p5)   ;;  %v9610_v47 = vld [vmem:[#allocation10 + $0x158] sm:$0xff] (!%p9336_p5)  }
 0x31e   : > { %v8318_v50 = vsel %vm7756_vm10, %v8317_v41, %v8313_v7  ;;  %v7674_v11 = vpop.permute.xlu0 %7673  ;;  %9421 = vmatprep.subr.bf16.mxu0 (!%p9336_p5), %v9602_v55  ;;  %v9616_v7 = vld [vmem:[#allocation10 + $0x120] sm:$0xff] (!%p9336_p5)   ;;  %v9618_v41 = vld [vmem:[#allocation10 + $0x168] sm:$0xff] (!%p9336_p5)  }
 0x31f   : > { %v8323_v37 = vsel %vm7763_vm11, %v8322_v32, %v8318_v50  ;;  %v8234_v49 = vsel %vm7749_vm9, %v8233_v17, %v8229_v10  ;;  %v8337_v36 = vrot.slane %v7674_v11, %v12910_v23  ;;  %v9621_v50 = vld [vmem:[#allocation10 + $0x1a8] sm:$0xff] (!%p9336_p5)   ;;  %v9624_v32 = vld [vmem:[#allocation10 + $0x130] sm:$0xff] (!%p9336_p5)   ;;  %v9630_v17 = vld [vmem:[#allocation10 + $0x40] sm:$0xff] (!%p9336_p5)   ;;  %v8373_v11 = vstv (!%p9336_p5), %s8372_s25 }
 0x320   : > { %v7614_v30 = vpop.permute.xlu1 %7613  ;;  %v8328_v31 = vsel %vm7770_vm12, %v8327_v39, %v8323_v37  ;;  %v9627_v37 = vld [vmem:[#allocation10 + $0x1f8] sm:$0xff] (!%p9336_p5)   ;;  %v8370_v39 = vld [vmem:[#allocation8] sm:$0xff] (!%p9336_p5) }
 0x321   : > { %v8238_v56 = vrot.slane %v7614_v30, %v12862_v59  ;;  %v8333_v25 = vsel %vm7777_vm13, %v8332_v34, %v8328_v31  ;;  %9422 = vmatpush3.bf16.msra.mxu0 (!%p9336_p5), %v9604_v20  ;;  %v9612_v30 = vld [vmem:[#allocation10 + $0x118] sm:$0xff] (!%p9336_p5)   ;;  %v8406_v26 = vrot.slane (!%p9336_p5), %v8370_v39, 7  ;;  %v14108_v31 = vld [vmem:[#allocation21_spill] sm:$0xff] (!%p9336_p5) }
 0x322   : > { %9423 = vmatprep.subr.bf16.mxu0 (!%p9336_p5), %v9606_v0  ;;  %v8371_v34 = vld [vmem:[#allocation8 + $0x8] sm:$0xff] (!%p9336_p5) }
 0x323   : > { %v8239_v59 = vsel %vm7756_vm10, %v8238_v56, %v8234_v49  ;;  %v8456_v56 = vsub.s32 (!%p9336_p5), 4, %v14108_v31  ;;  %v8408_v10 = vrot.slane (!%p9336_p5), %v8371_v34, 7  ;;  %v8391_v49 = vstv (!%p9336_p5), %s9340_s30 }
 0x324   : > { %v7617_v48 = vpop.permute.xlu1 %7616 }
 0x325   : > { %v8243_v22 = vrot.slane %v7617_v48, %v12886_v2  ;;  %v8338_v2 = vsel %vm7784_vm14, %v8337_v36, %v8333_v25  ;;  %9424 = vmatpush3.bf16.msra.mxu0 (!%p9336_p5), %v9608_v52  ;;  %v9619_v48 = vld [vmem:[#allocation10 + $0x1e8] sm:$0xff] (!%p9336_p5)   ;;  %v8392_v36 = vmul.f32 (!%p9336_p5), %v8391_v49, %v8370_v39 }
 0x326   : > { %9425 = vmatprep.subr.bf16.mxu0 (!%p9336_p5), %v9610_v47 }
 0x327   : > { %v8244_v21 = vsel %vm7763_vm11, %v8243_v22, %v8239_v59  ;;  %v8377_v22 = vstv (!%p9336_p5), %s9337_s26 }
 0x328   : > { %v7620_v16 = vpop.permute.xlu1 %7619  ;;  %v8378_v25 = vmul.f32 (!%p9336_p5), %v8377_v22, %v8370_v39 }
 0x329   : > { %v8248_v12 = vrot.slane %v7620_v16, %v12897_v61  ;;  %9426 = vmatpush3.bf16.msra.mxu0 (!%p9336_p5), %v9612_v30  ;;  %v9628_v16 = vld [vmem:[#allocation10 + $0x138] sm:$0xff] (!%p9336_p5)  }
 0x32a   : > { %9427 = vmatprep.subr.bf16.mxu0 (!%p9336_p5), %v9614_v24 }
 0x32b   : > { %v8249_v54 = vsel %vm7770_vm12, %v8248_v12, %v8244_v21  ;;  %v8374_v12 = vmul.f32 (!%p9336_p5), %v8373_v11, %v8370_v39  ;;  %v8419_v21 = vstv (!%p9336_p5), %s13459_s27 }
 0x32c   : > { %v7623_v15 = vpop.permute.xlu1 %7622 }
 0x32d   : > { %v8253_v18 = vrot.slane %v7623_v15, %v12913_v19  ;;  %v8343_v19 = vsel %vm8339_vm15, %v8338_v2, %v13246_v29  ;;  %v9599_v29 = vld [vmem:[#allocation10 + $0x1c0] sm:$0xff] (!%p9336_p5)   ;;  %9428 = vmatpush3.bf16.msra.mxu0 (!%p9336_p5), %v9616_v7  ;;  %v8407_v15 = vrot.slane (!%p9336_p5), %v8406_v26, 4  ;;  %v9338_v2 = vrot.slane (!%p9336_p5), %v8378_v25, 9  ;;  %v9639_v25 = vld [vmem:[#allocation10 + $0xd0] sm:$0xff] (!%p9336_p5)  }
 0x32e   : > { %9441 = vmatprep.subr.bf16.mxu1 (!%p9336_p5), %v9599_v29  ;;  %9429 = vmatprep.subr.bf16.mxu0 (!%p9336_p5), %v9618_v41 }
 0x32f   : > { %v8254_v61 = vsel %vm7777_vm13, %v8253_v18, %v8249_v54  ;;  %v8415_v18 = vstv (!%p9336_p5), %s9343_s22  ;;  %v8420_v54 = vmul.f32 (!%p9336_p5), %v8419_v21, %v8370_v39 }
 0x330   : > { %v7626_v45 = vpop.permute.xlu1 %7625  ;;  %v8416_v59 = vmul.f32 (!%p9336_p5), %v8415_v18, %v8370_v39 }
 0x331   : > { %v8258_v46 = vrot.slane %v7626_v45, %v12910_v23  ;;  %9430 = vmatpush3.bf16.msra.mxu0 (!%p9336_p5), %v9620_v38  ;;  %v8433_v45 = vstv (!%p9336_p5), %s13461_s29 }
 0x332   : > { %9431 = vmatprep.subr.bf16.mxu0 (!%p9336_p5), %v9622_v63  ;;  %v8435_v29 = vmul.f32 (!%p9336_p5), %v8433_v45, %v8371_v34 }
 0x333   : > { %v8259_v27 = vsel %vm7784_vm14, %v8258_v46, %v8254_v61  ;;  %v8434_v46 = vmul.f32 (!%p9336_p5), %v8433_v45, %v8370_v39  ;;  %v8375_v61 = vmul.f32 (!%p9336_p5), %v8373_v11, %v8371_v34  ;;  %v9644_v45 = vld [vmem:[#allocation10 + $0x18] sm:$0xff] (!%p9336_p5)  }
 0x334   : > { %v8342_v60 = vsel %vm8339_vm15, %v8259_v27, %v13151_v8  ;;  %v9601_v8 = vld [vmem:[#allocation10 + $0x180] sm:$0xff] (!%p9336_p5)   ;;  %v9341_v27 = vrot.slane (!%p9336_p5), %v8392_v36, 10  ;;  %v9349_v0 = vrot.slane (!%p9336_p5), %v8435_v29, 10  ;;  %v9641_v36 = vld [vmem:[#allocation10 + $0x90] sm:$0xff] (!%p9336_p5)   ;;  %v9652_v29 = vld [vmem:[#allocation10 + $0x28] sm:$0xff] (!%p9336_p5)  }
 0x335   : > { %v8345_v3 = vcombine.low %v8342_v60, %v8343_v19  ;;  %9442 = vmatpush3.bf16.msra.mxu1 (!%p9336_p5), %v9601_v8  ;;  %9432 = vmatpush3.bf16.msra.mxu0 (!%p9336_p5), %v9624_v32  ;;  %v8379_v19 = vmul.f32 (!%p9336_p5), %v8377_v22, %v8371_v34  ;;  %v8393_v60 = vmul.f32 (!%p9336_p5), %v8391_v49, %v8371_v34  ;;  %v9633_v22 = vld [vmem:[#allocation10 + $0x80] sm:$0xff] (!%p9336_p5)   ;;  %v9640_v49 = vld [vmem:[#allocation10 + $0x10] sm:$0xff] (!%p9336_p5)  }
 0x336   : > { %9443 = vmatprep.subr.bf16.mxu1 (!%p9336_p5), %v9603_v6  ;;  %9433 = vmatprep.subr.bf16.mxu0 (!%p9336_p5), %v9626_v33  ;;  %v13467_v6 = vsub.s32 (!%p9336_p5), 0, %v14108_v31  ;;  %v9634_v31 = vld [vmem:[#allocation10 + $0x48] sm:$0xff] (!%p9336_p5)  }
 0x337   : > { %v8359_v53 = vrot.slane %v8345_v3, %v13688_v58  ;;  %8367 = sbr.rel (%p9336_p5) target bundleno = 1162 (0x48a), region = 60  ;;  %v9605_v58 = vld [vmem:[#allocation10 + $0x188] sm:$0xff] (!%p9336_p5)   ;;  %v8417_v3 = vmul.f32 (!%p9336_p5), %v8415_v18, %v8371_v34  ;;  %v9342_v1 = vrot.slane (!%p9336_p5), %v8393_v60, 10  ;;  %v9642_v18 = vld [vmem:[#allocation10 + $0x58] sm:$0xff] (!%p9336_p5)  }
 0x338   : > { %v14109_v60 = vld [vmem:[#allocation28_spill] sm:$0xff] (!%p9336_p5) }
 0x339   : > { %v8360_v23 = vcombine.low %v8352_v35, %v8359_v53  ;;  %9444 = vmatpush3.bf16.msra.mxu1 (!%p9336_p5), %v9605_v58  ;;  %9434 = vmatpush3.bf16.msra.mxu0 (!%p9336_p5), %v9628_v16  ;;  %v8388_v35 = vadd.f32 (!%p9336_p5), %v9338_v2, %v8374_v12  ;;  %v9345_v53 = vrot.slane (!%p9336_p5), %v8420_v54, 9  ;;  %v8409_v58 = vrot.slane (!%p9336_p5), %v8408_v10, 4  ;;  %v9638_v10 = vld [vmem:[#allocation10 + $0x50] sm:$0xff] (!%p9336_p5)   ;;  %v9637_v12 = vld [vmem:[#allocation10 + $0x88] sm:$0xff] (!%p9336_p5)   ;;  %v9646_v54 = vld [vmem:[#allocation10 + $0x60] sm:$0xff] (!%p9336_p5)  }
 0x33a   : > { %9445 = vmatprep.subr.bf16.mxu1 (!%p9336_p5), %v9607_v28  ;;  %9463 = vmatprep.subr.bf16.mxu0 (!%p9336_p5), %v9630_v17 }
 0x33b   : > { %v8362_v5 = vadd.f32 %v8360_v23, %v250_v9  ;;  %v9348_v9 = vrot.slane (!%p9336_p5), %v8434_v46, 10  ;;  %v8421_v23 = vmul.f32 (!%p9336_p5), %v8419_v21, %v8371_v34  ;;  %v8402_v44 = vadd.f32 (!%p9336_p5), %v9341_v27, %v8388_v35  ;;  %v9645_v46 = vld [vmem:[#allocation10 + $0x98] sm:$0xff] (!%p9336_p5)   ;;  %v9647_v27 = vld [vmem:[#allocation10 + $0xe0] sm:$0xff] (!%p9336_p5)  }
 0x33c   : > { %v8430_v8 = vadd.f32 (!%p9336_p5), %v9345_v53, %v8416_v59  ;;  %v9643_v59 = vld [vmem:[#allocation10 + $0xd8] sm:$0xff] (!%p9336_p5)   ;;  %v9650_v53 = vld [vmem:[#allocation10 + $0x68] sm:$0xff] (!%p9336_p5)  }
 0x33d   : > { %8363 = vst [vmem:[#allocation2] sm:$0xff] %v8362_v5  ;;  %9446 = vmatpush3.bf16.msra.mxu1 (!%p9336_p5), %v9609_v40  ;;  %v9339_v5 = vrot.slane (!%p9336_p5), %v8379_v19, 9  ;;  %v9346_v55 = vrot.slane (!%p9336_p5), %v8421_v23, 9  ;;  %v8412_v28 = vadd.f32 (!%p9336_p5), %v8407_v15, %v8402_v44  ;;  %v9648_v19 = vld [vmem:[#allocation10 + $0x20] sm:$0xff] (!%p9336_p5)  }
 0x33e   : > { %9447 = vmatprep.subr.bf16.mxu1 %v9611_v4  ;;  %v8444_v52 = vadd.f32 %v9348_v9, %v8430_v8  ;;  %v9649_v9 = vld [vmem:[#allocation10 + $0xa0] sm:$0xff]  }
 0x33f   : > { %v8389_v20 = vadd.f32 %v9339_v5, %v8375_v61  ;;  %v8431_v40 = vadd.f32 %v9346_v55, %v8417_v3  ;;  %v8457_v30 = vrot.slane %v8412_v28, %v8456_v56  ;;  %v8453_v24 = vrot.slane %v8412_v28, %v13467_v6  ;;  %v9654_v55 = vld [vmem:[#allocation10 + $0x70] sm:$0xff]  }
 0x340   : > { %v8446_v4 = vadd.f32 %v8444_v52, %v8407_v15  ;;  %v9635_v15 = vld [vmem:[#allocation10 + $0xc8] sm:$0xff]   ;;  %v9656_v28 = vld [vmem:[#allocation10 + $0x30] sm:$0xff]   ;;  %v9658_v52 = vld [vmem:[#allocation10 + $0x78] sm:$0xff]  }
 0x341   : > { %9448 = vmatpush3.bf16.msra.mxu1 %v9613_v43  ;;  %v8403_v47 = vadd.f32 %v9342_v1, %v8389_v20  ;;  %v8445_v43 = vadd.f32 %v9349_v0, %v8431_v40  ;;  %v9651_v1 = vld [vmem:[#allocation10 + $0xe8] sm:$0xff]   ;;  %v9655_v0 = vld [vmem:[#allocation10 + $0xf0] sm:$0xff]  }
 0x342   : > { %9449 = vmatprep.subr.bf16.mxu1 %v9615_v62  ;;  %v8479_v7 = vrot.slane %v8446_v4, %v8456_v56  ;;  %v8475_v41 = vrot.slane %v8446_v4, %v13467_v6  ;;  %v9653_v20 = vld [vmem:[#allocation10 + $0xa8] sm:$0xff]   ;;  %v9657_v40 = vld [vmem:[#allocation10 + $0xb0] sm:$0xff]   ;;  %v9660_v4 = vld [vmem:[#allocation10 + $0x38] sm:$0xff]  }
 0x343   : > { %v8413_v62 = vadd.f32 %v8409_v58, %v8403_v47  ;;  %v9659_v47 = vld [vmem:[#allocation10 + $0xf8] sm:$0xff]  }
 0x344   : > { %v8368_v21 = vld [vmem:[#allocation2] sm:$0xff] }
 0x345   : > { %9450 = vmatpush3.bf16.msra.mxu1 %v9617_v57  ;;  %v8447_v57 = vadd.f32 %v8445_v43, %v8409_v58  ;;  %v8461_v38 = vrot.slane %v8413_v62, %v13467_v6  ;;  %v8369_v2 = vmul.f32 0.0009765625, %v8368_v21 }
 0x346   : > { %9451 = vmatprep.subr.bf16.mxu1 %v9619_v48  ;;  %v8465_v48 = vrot.slane %v8413_v62, %v8456_v56 }
 0x347   : > { %v8487_v63 = vrot.slane %v8447_v57, %v8456_v56  ;;  %v8483_v32 = vrot.slane %v8447_v57, %v13467_v6  ;;  %v9636_v56 = vld [vmem:[#allocation10 + $0x8] sm:$0xff]   ;;  %v8497_v61 = vmax.f32 %v8369_v2, 0.0 }
 0x349   : > { %9452 = vmatpush3.bf16.msra.mxu1 %v9621_v50  ;;  %v8494_v50 = vsel %vm8492_vm0, %v8457_v30, %v8479_v7  ;;  %v8495_v16 = vsel %vm8492_vm0, %v8461_v38, %v8483_v32  ;;  %v8506_v3 = vrot.slane %v8497_v61, %v14109_v60  ;;  %v8499_v35 = vcombine.high %v8497_v61, %v8497_v61  ;;  %v9661_v30 = vld [vmem:[#allocation10 + $0xb8] sm:$0xff]  }
 0x34a   : > { %9453 = vmatprep.subr.bf16.mxu1 %v9623_v13  ;;  %v8493_v13 = vsel %vm8492_vm0, %v8453_v24, %v8475_v41  ;;  %v8526_v17 = vmax.f32 %v8495_v16, 0.0 }
 0x34b   : > { %v8524_v33 = vmax.f32 %v8493_v13, 0.0  ;;  %v8514_v23 = vcombine.high %v8506_v3, %v8506_v3  ;;  %v8513_v5 = vrot.slane %v8499_v35, %v14109_v60  ;;  %v8520_v43 = vpack.c.bf16 %v8506_v3, %v8506_v3 }
 0x34c   : > { %v8530_v11 = vpack.c.bf16 %v8526_v17, %v8526_v17 }
 0x34d   : > { %9454 = vmatpush3.bf16.msra.mxu1 %v9625_v14  ;;  %v8525_v14 = vmax.f32 %v8494_v50, 0.0  ;;  %v8528_v26 = vpack.c.bf16 %v8524_v33, %v8524_v33  ;;  %v8521_v44 = vpack.c.bf16 %v8514_v23, %v8514_v23  ;;  %v8515_v8 = vcombine.high %v8513_v5, %v8513_v5  ;;  %v8660_v33 = vld [vmem:[#allocation10 + $0x200] sm:$0x1] }
 0x34e   : > { %9455 = vmatprep.subr.bf16.mxu1 %v9627_v37  ;;  %v8496_v37 = vsel %vm8492_vm0, %v8465_v48, %v8487_v63  ;;  %v8522_v24 = vpack.c.bf16 %v8513_v5, %v8513_v5  ;;  %v8661_v16 = vunpack.c.l.bf16 %v8660_v33 }
 0x34f   : > { %v8527_v39 = vmax.f32 %v8496_v37, 0.0  ;;  %v8523_v58 = vpack.c.bf16 %v8515_v8, %v8515_v8 }
 0x351   : > { %9456 = vmatpush3.bf16.msra.mxu1 %v9629_v51  ;;  %v8529_v51 = vpack.c.bf16 %v8525_v14, %v8525_v14  ;;  %v8531_v34 = vpack.c.bf16 %v8527_v39, %v8527_v39 }
 0x352   : > { %9485 = vmatprep.subr.bf16.mxu1 %v9631_v42  ;;  %v9632_v42 = vld [vmem:[#allocation10] sm:$0xff]  }
 0x353   : > { %8886 = vmatprep.mubr.bf16.mxu0 %v8529_v51  ;;  %8926 = vmatprep.mubr.bf16.mxu1 %v8531_v34 }
 0x354   : > { %8887 = vmatmul.mubr.bf16.vlgmr.msra.gmra.mrb[0].mxu0 %v8528_v26  ;;  %8927 = vmatmul.mubr.bf16.vlgmr.msra.gmra.mrb[0].mxu1 %v8530_v11 }
 0x355   : > { %9464 = vmatpush3.bf16.msra.mxu0 %v9632_v42  ;;  %9486 = vmatpush3.bf16.msra.mxu1 %v9633_v22  ;;  %v9209_v22 = vrot.slane %v8661_v16, %v13467_v6 }
 0x356   : > { %9465 = vmatprep.subr.bf16.mxu0 %v9634_v31  ;;  %9487 = vmatprep.subr.bf16.mxu1 %v9635_v15 }
 0x357   : > { %9158 = vmatprep.mubr.bf16.mxu0 %v8521_v44  ;;  %9198 = vmatprep.mubr.bf16.mxu1 %v8523_v58 }
 0x359   : > { %9466 = vmatpush3.bf16.msra.mxu0 %v9636_v56  ;;  %9488 = vmatpush3.bf16.msra.mxu1 %v9637_v12 }
 0x35a   : > { %9467 = vmatprep.subr.bf16.mxu0 %v9638_v10  ;;  %9489 = vmatprep.subr.bf16.mxu1 %v9639_v25 }
 0x35d   : > { %9468 = vmatpush3.bf16.msra.mxu0 %v9640_v49  ;;  %9490 = vmatpush3.bf16.msra.mxu1 %v9641_v36 }
 0x35e   : > { %9469 = vmatprep.subr.bf16.mxu0 %v9642_v18  ;;  %9491 = vmatprep.subr.bf16.mxu1 %v9643_v59 }
 0x361   : > { %9470 = vmatpush3.bf16.msra.mxu0 %v9644_v45  ;;  %9492 = vmatpush3.bf16.msra.mxu1 %v9645_v46 }
 0x362   : > { %9471 = vmatprep.subr.bf16.mxu0 %v9646_v54  ;;  %9493 = vmatprep.subr.bf16.mxu1 %v9647_v27 }
 0x365   : > { %9472 = vmatpush3.bf16.msra.mxu0 %v9648_v19  ;;  %9494 = vmatpush3.bf16.msra.mxu1 %v9649_v9 }
 0x366   : > { %9473 = vmatprep.subr.bf16.mxu0 %v9650_v53  ;;  %9495 = vmatprep.subr.bf16.mxu1 %v9651_v1 }
 0x369   : > { %9474 = vmatpush3.bf16.msra.mxu0 %v9652_v29  ;;  %9496 = vmatpush3.bf16.msra.mxu1 %v9653_v20 }
 0x36a   : > { %9475 = vmatprep.subr.bf16.mxu0 %v9654_v55  ;;  %9497 = vmatprep.subr.bf16.mxu1 %v9655_v0 }
 0x36d   : > { %9476 = vmatpush3.bf16.msra.mxu0 %v9656_v28  ;;  %9498 = vmatpush3.bf16.msra.mxu1 %v9657_v40 }
 0x36e   : > { %9477 = vmatprep.subr.bf16.mxu0 %v9658_v52  ;;  %9499 = vmatprep.subr.bf16.mxu1 %v9659_v47 }
 0x371   : > { %9478 = vmatpush3.bf16.msra.mxu0 %v9660_v4  ;;  %9500 = vmatpush3.bf16.msra.mxu1 %v9661_v30 }
 0x374   : > { %9159 = vmatmul.mubr.bf16.vlgmr.msra.gmra.mrb[4].mxu0 %v8520_v43  ;;  %9199 = vmatmul.mubr.bf16.vlgmr.msra.gmra.mrb[4].mxu1 %v8522_v24 }
 0x427   : > { %v9435_v62 = vpop.f32.mrb[0].mxu0  ;;  %v9457_v57 = vpop.f32.mrb[0].mxu1 }
 0x428   : > { %v9436_v7 = vpop.f32.mrb[1].mxu0  ;;  %v9458_v38 = vpop.f32.mrb[1].mxu1 }
 0x429   : > { %v9437_v41 = vadd.f32 %v9436_v7, %v9435_v62  ;;  %v9438_v48 = vpop.f32.mrb[2].mxu0  ;;  %v9459_v63 = vadd.f32 %v9458_v38, %v9457_v57  ;;  %v9460_v13 = vpop.f32.mrb[2].mxu1 }
 0x42a   : > { %v9439_v50 = vpop.f32.mrb[3].mxu0  ;;  %v9461_v32 = vpop.f32.mrb[3].mxu1 }
 0x42b   : > { %v8929_v14 = vadd.f32 %v9459_v63, %v9437_v41 }
 0x447   : > { %v9479_v37 = vpop.f32.mrb[4].mxu0  ;;  %v9501_v39 = vpop.f32.mrb[4].mxu1 }
 0x448   : > { %v9480_v51 = vpop.f32.mrb[5].mxu0  ;;  %v9502_v42 = vpop.f32.mrb[5].mxu1 }
 0x449   : > { %v9481_v26 = vadd.f32 %v9480_v51, %v9479_v37  ;;  %v9482_v17 = vpop.f32.mrb[6].mxu0  ;;  %v9503_v11 = vadd.f32 %v9502_v42, %v9501_v39  ;;  %v9504_v15 = vpop.f32.mrb[6].mxu1 }
 0x44a   : > { %v9483_v31 = vpop.f32.mrb[7].mxu0  ;;  %v9505_v56 = vpop.f32.mrb[7].mxu1 }
 0x44b   : > { %v9161_v34 = vadd.f32 %v9481_v26, %v8929_v14 }
 0x44d   : > { %v9201_v10 = vadd.f32 %v9503_v11, %v9161_v34 }
 0x44f   : > { %v9210_v12 = vadd.f32 %v9209_v22, %v9201_v10 }
 0x451   : > { %v9211_v25 = vmax.f32 %v9210_v12, 0.0 }
 0x453   : > { %v9213_v49 = vsel %vm9212_vm1, %v9211_v25, -inf }
 0x454   : > { %v9214_v18 = vrot.slane %v9213_v49, 4 }
 0x456   : > { %v9215_v36 = vmax.f32 %v9213_v49, %v9214_v18 }
 0x458   : > { %v9216_v59 = vrot.slane %v9215_v36, 2 }
 0x45a   : > { %v9217_v21 = vmax.f32 %v9215_v36, %v9216_v59 }
 0x45c   : > { %v9218_v45 = vrot.slane %v9217_v21, 1 }
 0x45e   : > { %v9219_v2 = vmax.f32 %v9217_v21, %v9218_v45 }
 0x460   : > { %v9220_v54 = vsub.f32 %v9211_v25, %v9219_v2 }
 0x462   : > { %v9221_v46 = vmul.f32 1.442695, %v9220_v54 }
 0x464   : > { %9662 = vpow2.f32 %v9221_v46 }
 0x46e   : > { %v9663_v61 = vpop.eup %9662 }
 0x46f   : > { %v9223_v27 = vsel %vm9212_vm1, %v9663_v61, 0.0 }
 0x470   : > { %v9224_v19 = vrot.slane %v9223_v27, 4 }
 0x472   : > { %v9225_v6 = vadd.f32 %v9224_v19, %v9223_v27 }
 0x474   : > { %v9226_v60 = vrot.slane %v9225_v6, 2 }
 0x476   : > { %v9227_v3 = vadd.f32 %v9226_v60, %v9225_v6 }
 0x478   : > { %v9228_v35 = vrot.slane %v9227_v3, 1 }
 0x47a   : > { %v9229_v53 = vadd.f32 %v9228_v35, %v9227_v3 }
 0x47c   : > { %9664 = vrcp.f32 %v9229_v53 }
 0x486   : > { %v9665_v9 = vpop.eup %9664 }
 0x487   : > { %v9231_v23 = vmul.f32 %v9665_v9, %v9663_v61 }
 0x489   : > { %9232 = vst [vmem:[#allocation11] sm:$0x3] %v9231_v23 }
 0x48a PF: > { %p9546_p8 = scmp.eq.s32.totalorder %s9900_s19, 1  ;;  %s9855_s6 = smov [#allocation11]  }
 0x48b   : > { %s9240_s7 = sshll.u32 %s9855_s6, 4  ;;  %s9241_s7 = int_to_ptr.vmem [resolvable:$true] %s9240_s7 }
 0x48c   : > { %s9765_s8 = scalar_lea.vmem %s9241_s7, 32  ;;  %p9772_p6 = scmp.lt.s32.totalorder %s9241_s7, %s9241_s7 }
 0x48d   : > { %p9766_p9 = scmp.ne.s32.totalorder %s9241_s7, %s9765_s8  ;;  %p9773_p7 = scmp.lt.s32.totalorder %s9765_s8, %s9765_s8 }
 0x48f   : > { %p9767_p2 = pnand %p9766_p9, %p9546_p8  ;;  %p9774_p10 = por %p9773_p7, %p9772_p6 }
 0x491   : > { %p9768_p0 = pneg %p9767_p2 }
 0x493   : > { %p9775_p4 = pnand %p9774_p10, %p9768_p0 }
 0x495   : > { %9778 = shalt.err (!%p9775_p4)
}
 0x496   : > { %s9779_s10 = scalar_lea.hbm %s13516_s4, 32 }
 0x497   : > { %p9780_p11 = scmp.ne.s32.totalorder %s13516_s4, %s9779_s10  ;;  %p9785_p1 = scmp.lt.u32.totalorder %s9779_s10, %s13516_s4 }
 0x499   : > { %p9781_p12 = pnand %p9780_p11, %p9546_p8 }
 0x49b   : > { %p9782_p13 = pneg %p9781_p12 }
 0x49d   : > { %p9787_p3 = pnand %p9785_p1, %p9782_p13 }
 0x49f   : > { %9790 = shalt.err (!%p9787_p3)
}
 0x4a0   : > { %9522 = dma.vmem_to_hbm [thread:$0]  (%p9546_p8), %s9241_s7, 32, %s13516_s4, [#allocation5]  }
 0x4a1   : > { %9820 = dma.done.wait (%p9546_p8), [#allocation5], 32  }
 0x4a2   : > { %9822 = vsyncadd (%p9546_p8), [#allocation5], 4294967264 }
 0x4a3 PF: > { %p17_p5 = scmp.ge.s32.totalorder %s9903_s20, 4   ;;  %s14110_s15 = smov %s9829_s16 }
 0x4a4   : > { %s14111_s16 = smov %s9833_s17  ;;  %s14112_s17 = smov %s9913_s23 }
 0x4a5   : > { %s14113_s18 = smov %s9903_s20  ;;  %19 = sbr.rel (!%p17_p5) target bundleno = 6 (0x6), region = 94 }
 0x4ac   :  { %9253 = vsyncpa [#allocation4], 1 }
 0x4ad   :  { %9255 = vsyncpa [#allocation4 + $0x1], 1 }
 0x4ae   :  { %9256 = vsyncpa [#allocation9], 1 }
 0x4af   :  { %9257 = vsyncpa [#allocation5], 1 }
 0x4b0   :  { %9259 = vsyncpa [#allocation5 + $0x1], 1 }
 0x4b1   :  { %9260 = vsyncpa [#allocation6], 1 }
 0x4b2   :  { %9262 = vsyncpa [#allocation6 + $0x1], 1 }

</bundles_post_ra>
